<compile_context>
chip_gen: v7x
topology: tpu7x:2x2x1
jax: 0.10.0
libtpu: 0.0.40
codegen_flags: <defaults>
</compile_context>

<pallas_src>
import functools

import jax
import jax.numpy as jnp
from jax.experimental import pallas as pl
from jax.experimental.pallas import tpu as pltpu

# ----------------------- configuration (DWABlockV2 defaults) -----------------------
DIM = 32                      # dim  (C)
PATCH = 3                     # patch_size
NUM_HEADS = 8                 # num_heads
HEAD_DIM = DIM // NUM_HEADS   # 4
SCALE = HEAD_DIM ** (-0.5)    # qk scale (applied in-kernel)
MLP_RATIO = 1                 # mlp_ratio
HIDDEN = MLP_RATIO * DIM
LN_EPS = 1e-5
TM_MAX = 512                  # max row tile for the row-parallel matmul kernels


def _row_tiles(M, tm_max=TM_MAX):
    """Pick (padded_M, TM): one full (8-aligned) block when small, else 512-row tiles."""
    if M <= tm_max:
        Mp = ((M + 7) // 8) * 8
        return Mp, Mp
    Mp = ((M + tm_max - 1) // tm_max) * tm_max
    return Mp, tm_max


# ================================ Pallas kernels ===================================

def conv_mlp_kernel(x_ref, w1_ref, b1_ref, w2_ref, b2_ref, w3_ref, b3_ref, o_ref):
    """LAConv.attention1: conv3x3 (as im2col matmul)+ReLU -> 1x1+ReLU -> 1x1+Sigmoid."""
    h = jnp.dot(x_ref[...], w1_ref[...], preferred_element_type=jnp.float32) + b1_ref[...]
    h = jnp.maximum(h, 0.0)
    h = jnp.dot(h, w2_ref[...], preferred_element_type=jnp.float32) + b2_ref[...]
    h = jnp.maximum(h, 0.0)
    o = jnp.dot(h, w3_ref[...], preferred_element_type=jnp.float32) + b3_ref[...]
    o_ref[...] = jax.nn.sigmoid(o)


def conv_mlp_call(x, w1, b1, w2, b2, w3, b3):
    M, K = x.shape
    Hd = w1.shape[1]
    Dout = w3.shape[1]
    Mp, TM = _row_tiles(M)
    if Mp != M:
        x = jnp.pad(x, ((0, Mp - M), (0, 0)))   # padded rows: finite, sliced off below
    out = pl.pallas_call(
        conv_mlp_kernel,
        out_shape=jax.ShapeDtypeStruct((Mp, Dout), jnp.float32),
        grid=(Mp // TM,),
        in_specs=[
            pl.BlockSpec((TM, K), lambda i: (i, 0)),
            pl.BlockSpec((K, Hd), lambda i: (0, 0)),
            pl.BlockSpec((1, Hd), lambda i: (0, 0)),
            pl.BlockSpec((Hd, Hd), lambda i: (0, 0)),
            pl.BlockSpec((1, Hd), lambda i: (0, 0)),
            pl.BlockSpec((Hd, Dout), lambda i: (0, 0)),
            pl.BlockSpec((1, Dout), lambda i: (0, 0)),
        ],
        out_specs=pl.BlockSpec((TM, Dout), lambda i: (i, 0)),
        compiler_params=pltpu.CompilerParams(dimension_semantics=("parallel",)),
    )(x, w1, b1.reshape(1, -1), w2, b2.reshape(1, -1), w3, b3.reshape(1, -1))
    return out[:M]


def attention_kernel(q_ref, k_ref, v_ref, wo_ref, o_ref, oacc_ref):
    """Single-window multi-head attention fused with out_proj.

    q/k/v: [heads, N, hd]; wo: [C, C]; output [N, C].
    The qk scale is applied here (cannot be folded into the qkv conv weights because of the
    sigmoid in between).  Per-head outputs are written into channel columns of a VMEM
    scratch and the out_proj is a single [N,C]x[C,C] matmul (no per-head wo slices).
    """
    heads, n_tok, hd = q_ref.shape
    q = q_ref[...] * SCALE
    k = k_ref[...]
    v = v_ref[...]
    for h in range(heads):                                   # tiny static loop, unrolled
        s = jax.lax.dot_general(q[h], k[h], (((1,), (1,)), ((), ())),
                                preferred_element_type=jnp.float32)        # [N, N]
        s = s - jnp.max(s, axis=-1, keepdims=True)
        e = jnp.exp(s)
        p = e / jnp.sum(e, axis=-1, keepdims=True)
        oacc_ref[:, h * hd:(h + 1) * hd] = jnp.dot(p, v[h],
                                                   preferred_element_type=jnp.float32)
    o_ref[...] = jnp.dot(oacc_ref[...], wo_ref[...], preferred_element_type=jnp.float32)


def attention_call(q, k, v, wo):
    heads, N, hd = q.shape
    C = heads * hd
    return pl.pallas_call(
        attention_kernel,
        out_shape=jax.ShapeDtypeStruct((N, C), jnp.float32),
        grid=(1,),
        in_specs=[
            pl.BlockSpec((heads, N, hd), lambda i: (0, 0, 0)),
            pl.BlockSpec((heads, N, hd), lambda i: (0, 0, 0)),
            pl.BlockSpec((heads, N, hd), lambda i: (0, 0, 0)),
            pl.BlockSpec((C, C), lambda i: (0, 0)),
        ],
        out_specs=pl.BlockSpec((N, C), lambda i: (0, 0)),
        scratch_shapes=[pltpu.VMEM((N, C), jnp.float32)],
    )(q, k, v, wo)


def ln_mlp_kernel(x_ref, g_ref, bt_ref, w1_ref, b1_ref, w2_ref, b2_ref, o_ref):
    """out = mlp_head(LayerNorm(x)) + x   (Dropout p=0 -> identity)."""
    x = x_ref[...]
    mu = jnp.mean(x, axis=-1, keepdims=True)
    var = jnp.mean((x - mu) ** 2, axis=-1, keepdims=True)
    y = (x - mu) * jax.lax.rsqrt(var + LN_EPS) * g_ref[...] + bt_ref[...]
    h = jnp.dot(y, w1_ref[...], preferred_element_type=jnp.float32) + b1_ref[...]
    h = jnp.maximum(h, 0.0)
    o = jnp.dot(h, w2_ref[...], preferred_element_type=jnp.float32) + b2_ref[...]
    o_ref[...] = o + x


def ln_mlp_call(x, gamma, beta, w1, b1, w2, b2):
    M, C = x.shape
    Hd = w1.shape[1]
    Mp, TM = _row_tiles(M)
    if Mp != M:
        # LayerNorm on zero-padded rows is finite (rsqrt(eps)); those rows are sliced off.
        x = jnp.pad(x, ((0, Mp - M), (0, 0)))
    out = pl.pallas_call(
        ln_mlp_kernel,
        out_shape=jax.ShapeDtypeStruct((Mp, C), jnp.float32),
        grid=(Mp // TM,),
        in_specs=[
            pl.BlockSpec((TM, C), lambda i: (i, 0)),
            pl.BlockSpec((1, C), lambda i: (0, 0)),
            pl.BlockSpec((1, C), lambda i: (0, 0)),
            pl.BlockSpec((C, Hd), lambda i: (0, 0)),
            pl.BlockSpec((1, Hd), lambda i: (0, 0)),
            pl.BlockSpec((Hd, C), lambda i: (0, 0)),
            pl.BlockSpec((1, C), lambda i: (0, 0)),
        ],
        out_specs=pl.BlockSpec((TM, C), lambda i: (i, 0)),
        compiler_params=pltpu.CompilerParams(dimension_semantics=("parallel",)),
    )(x, gamma.reshape(1, -1), beta.reshape(1, -1),
      w1, b1.reshape(1, -1), w2, b2.reshape(1, -1))
    return out[:M]


# TODO(synk): outputs keep a 32-lane last dim (masked stores); a lane-dense [M//4,128] view
#             would need an in-kernel lane relayout that costs about as much at these few-KB
#             output sizes, so it is intentionally skipped.
# TODO(synk): bf16 MXU inputs (v6e/v7x) skipped to keep the f32 reference tolerance and v5e
#             VPU behaviour; at these shapes the chain is launch-bound, not MXU bound.


# =========================== pure-JAX reference ops ================================

def conv_mlp_ref(x, w1, b1, w2, b2, w3, b3):
    h = jnp.maximum(x @ w1 + b1, 0.0)
    h = jnp.maximum(h @ w2 + b2, 0.0)
    return jax.nn.sigmoid(h @ w3 + b3)


def attention_ref(q, k, v, wo):
    heads, N, hd = q.shape
    s = jnp.einsum('hnd,hmd->hnm', q * SCALE, k)
    p = jax.nn.softmax(s, axis=-1)
    o = jnp.einsum('hnm,hmd->hnd', p, v)
    o = o.transpose(1, 0, 2).reshape(N, heads * hd)
    return o @ wo


def ln_mlp_ref(x, gamma, beta, w1, b1, w2, b2):
    mu = jnp.mean(x, -1, keepdims=True)
    var = jnp.mean((x - mu) ** 2, -1, keepdims=True)
    y = (x - mu) / jnp.sqrt(var + LN_EPS) * gamma + beta
    h = jnp.maximum(y @ w1 + b1, 0.0)
    return h @ w2 + b2 + x


PALLAS_OPS = dict(conv_mlp=conv_mlp_call, attention=attention_call, ln_mlp=ln_mlp_call)
REF_OPS = dict(conv_mlp=conv_mlp_ref, attention=attention_ref, ln_mlp=ln_mlp_ref)


# ================================ module glue ======================================
# TODO(synk): the 3x3 im2col and the unfold/fold/chunk index scrambles of the original
#             module stay as plain-JAX glue (pure permutations of <100 KB tensors); fusing
#             them in-kernel would need sublane-merging relayouts / gathers at DIM=32.

def im2col3(x_img):
    """im2col for a 3x3 conv, stride 1, padding 1.  [B,C,H,W] -> [B*H*W, C*9]."""
    B, C, H, W = x_img.shape
    xp = jnp.pad(x_img, ((0, 0), (0, 0), (1, 1), (1, 1)))
    cols = jnp.stack([xp[:, :, kh:kh + H, kw:kw + W]
                      for kh in range(3) for kw in range(3)], axis=2)   # [B,C,9,H,W]
    return cols.transpose(0, 3, 4, 1, 2).reshape(B * H * W, C * 9)


def laconv_parts(x_img, pr, outdim, ops):
    """Shared LAConv internals: returns (attention map flat [B,L,p*p*outdim], unfold y)."""
    B, C, H, W = x_img.shape
    patch = PATCH
    nh, nw = H // patch, W // patch
    # y = F.unfold(x, patch, stride=patch).permute(0, 2, 1)  -> [B, L, C*p*p]
    y = (x_img.reshape(B, C, nh, patch, nw, patch)
         .transpose(0, 2, 4, 1, 3, 5)
         .reshape(B, nh * nw, C * patch * patch))
    # attention1(x) as an im2col matmul chain (Pallas kernel)
    patches = im2col3(x_img)                                   # [B*H*W, C*9]
    a = ops['conv_mlp'](patches, *pr)                          # [B*H*W, outdim]
    a_img = a.reshape(B, H, W, outdim).transpose(0, 3, 1, 2)   # [B, outdim, H, W]
    xa = (a_img.reshape(B, outdim, nh, patch, nw, patch)
          .transpose(0, 2, 4, 3, 5, 1)
          .reshape(B, nh * nw, patch * patch * outdim))
    return xa, y


def laconv_chunk1(x_img, pr, ops):
    xa, y = laconv_parts(x_img, pr, outdim=DIM, ops=ops)
    return xa * y                                              # [B, L, p*p*C]


def laconv_chunk3(x_img, pr, ops):
    B, C, _, _ = x_img.shape
    patch = PATCH
    xa, y = laconv_parts(x_img, pr, outdim=3 * DIM, ops=ops)   # xa:[B,1,9*3C]  y:[B,1,C*9]
    qkv = jnp.split(xa, 3, axis=-1)                            # same contiguous split as .chunk
    return [(t * y).reshape(-1, patch, patch, C).transpose(0, 3, 1, 2) for t in qkv]


def dw_attention_window0(xw0, params, ops):
    """DWAttentionV2.forward evaluated for a single window xw0: [N=p*p, C] -> [N, C]."""
    N, C = xw0.shape
    patch = PATCH
    x_img = xw0.reshape(1, patch, patch, C).transpose(0, 3, 1, 2)       # [1, C, p, p]
    q, k, v = laconv_chunk3(x_img, params['qkv'], ops)                  # each [1, C, p, p]

    def to_heads(t):  # .contiguous().view(1, N, heads, hd).transpose(1, 2), squeezed
        return t.reshape(N, NUM_HEADS, HEAD_DIM).transpose(1, 0, 2)     # [heads, N, hd]

    # qk scale is applied inside the attention kernel.
    return ops['attention'](to_heads(q), to_heads(k), to_heads(v), params['wo'])


def dwablock_forward(x, H, W, params, ops):
    """DWABlockV2.forward.  x: [bs, p, N, C] with N == H*W (H == W)."""
    bs, p, N, C = x.shape
    patch = PATCH
    nh, nw = H // patch, W // patch
    x_img = x.transpose(0, 1, 3, 2).reshape(bs * p, C, H, W)
    # x = self.laconv(x)
    lac = laconv_chunk1(x_img, params['la'], ops)                      # [bs*p, L, p*p*C]
    xw = lac.reshape(-1, patch * patch, C)                             # [Bw, p*p, C]
    # x = x + self.encoder(x)[0]
    # Only batch element 0 of the encoder output is consumed (exactly as in the PyTorch
    # code) and the encoder is per-window independent, so only window 0's qkv conv +
    # attention is evaluated (bit-identical, removes a Bw x factor from the hot path).
    enc0 = dw_attention_window0(xw[0], params, ops)                    # [p*p, C]
    # TODO(synk): this broadcast-add (~9 KB) could be fused into ln_mlp with an in-kernel
    #             sublane tile of enc0; kept as one fused XLA elementwise for lowering safety.
    x1 = xw + enc0[None, :, :]
    # x = self.mlp_head(self.norm2(x)) + x   (LayerNorm -> Linear -> ReLU -> Linear + res)
    Bw = x1.shape[0]
    flat = ops['ln_mlp'](x1.reshape(Bw * patch * patch, C),
                         params['ln_g'], params['ln_b'],
                         params['mlp_w1'], params['mlp_b1'],
                         params['mlp_w2'], params['mlp_b2'])
    xw_out = flat.reshape(Bw, patch * patch, C)
    # x = F.fold(x.view(bs*p, -1, p*p*C).transpose(1, 2), H, (p, p), stride=(p, p))
    xv = xw_out.reshape(bs * p, -1, patch * patch * C)                 # [bs*p, L, p*p*C]
    cols = xv.transpose(0, 2, 1)                                       # [bs*p, p*p*C, L]
    cols = cols.reshape(bs * p, C, patch, patch, nh, nw)               # fold channel semantics
    folded = cols.transpose(0, 1, 4, 2, 5, 3).reshape(bs * p, C, H, W)
    return folded.reshape(bs, p, C, N).transpose(0, 1, 3, 2)           # [bs, p, N, C]


# ============================== parameter init =====================================

def init_params(key):
    C, Hd = DIM, HIDDEN
    ks = jax.random.split(key, 17)
    w = lambda k, shape, s=0.1: jax.random.normal(k, shape, jnp.float32) * s
    return {
        # LAConv(dim, dim)    attention1 weights  (conv3x3 -> 1x1 -> 1x1)
        'la': (w(ks[0], (C * 9, Hd)), w(ks[1], (Hd,)),
               w(ks[2], (Hd, Hd)),    w(ks[3], (Hd,)),
               w(ks[4], (Hd, C)),     w(ks[5], (C,))),
        # LAConv(dim, 3*dim)  qkv_proj attention1 weights
        'qkv': (w(ks[6], (C * 9, Hd)), w(ks[7], (Hd,)),
                w(ks[8], (Hd, Hd)),    w(ks[9], (Hd,)),
                w(ks[10], (Hd, 3 * C)), w(ks[11], (3 * C,))),
        # out_proj Linear(dim, dim, bias=False)
        'wo': w(ks[12], (C, C)),
        # norm2 LayerNorm(dim)  (PyTorch default init)
        'ln_g': jnp.ones((C,), jnp.float32),
        'ln_b': jnp.zeros((C,), jnp.float32),
        # mlp_head: Linear(dim, hidden) -> ReLU -> Linear(hidden, dim)
        'mlp_w1': w(ks[13], (C, Hd)), 'mlp_b1': w(ks[14], (Hd,)),
        'mlp_w2': w(ks[15], (Hd, C)), 'mlp_b2': w(ks[16], (C,)),
    }


# ==================================== main =========================================

if __name__ == "__main__":
    key = jax.random.PRNGKey(0)
    kx, kp = jax.random.split(key)

    bs, p = 2, 1
    H = W = 6                      # divisible by patch_size=3
    N = H * W
    x = jax.random.normal(kx, (bs, p, N, DIM), jnp.float32)
    params = init_params(kp)

    fwd_pallas = jax.jit(functools.partial(dwablock_forward, H=H, W=W,
                                           params=params, ops=PALLAS_OPS))
    fwd_ref = jax.jit(functools.partial(dwablock_forward, H=H, W=W,
                                        params=params, ops=REF_OPS))

    out = fwd_pallas(x)
    out = jax.block_until_ready(out)
    ref = jax.block_until_ready(fwd_ref(x))

    assert out.shape == (bs, p, N, DIM), out.shape
    assert bool(jnp.all(jnp.isfinite(out)))
    assert bool(jnp.allclose(out, ref, atol=1e-2, rtol=1e-2)), \
        float(jnp.max(jnp.abs(out - ref)))
    print("KERNEL_OK")
</pallas_src>

<mosaic_0001>
module attributes {stable_mosaic.version = 11 : i64} {
  func.func @conv_mlp_kernel(%arg0: i32, %arg1: memref<72x288xf32, #tpu.memory_space<vmem>>, %arg2: memref<288x32xf32, #tpu.memory_space<vmem>>, %arg3: memref<1x32xf32, #tpu.memory_space<vmem>>, %arg4: memref<32x32xf32, #tpu.memory_space<vmem>>, %arg5: memref<1x32xf32, #tpu.memory_space<vmem>>, %arg6: memref<32x32xf32, #tpu.memory_space<vmem>>, %arg7: memref<1x32xf32, #tpu.memory_space<vmem>>, %arg8: memref<72x32xf32, #tpu.memory_space<vmem>>) attributes {dimension_semantics = [#tpu.dimension_semantics<parallel>], iteration_bounds = array<i64: 1>, scalar_prefetch = 0 : i64, scratch_operands = 0 : i64, tpu.core_type = #tpu.core_type<tc>, window_params = [{transform_indices = @transform_0, window_bounds = array<i64: 72, 288>}, {pipeline_mode = #tpu.pipeline_mode<synchronous>, transform_indices = @transform_1, window_bounds = array<i64: 288, 32>}, {pipeline_mode = #tpu.pipeline_mode<synchronous>, transform_indices = @transform_2, window_bounds = array<i64: 1, 32>}, {pipeline_mode = #tpu.pipeline_mode<synchronous>, transform_indices = @transform_3, window_bounds = array<i64: 32, 32>}, {pipeline_mode = #tpu.pipeline_mode<synchronous>, transform_indices = @transform_4, window_bounds = array<i64: 1, 32>}, {pipeline_mode = #tpu.pipeline_mode<synchronous>, transform_indices = @transform_5, window_bounds = array<i64: 32, 32>}, {pipeline_mode = #tpu.pipeline_mode<synchronous>, transform_indices = @transform_6, window_bounds = array<i64: 1, 32>}, {transform_indices = @transform_7, window_bounds = array<i64: 72, 32>}]} {
    %c0 = arith.constant 0 : index
    %c0_0 = arith.constant 0 : index
    %0 = vector.load %arg1[%c0, %c0_0] : memref<72x288xf32, #tpu.memory_space<vmem>>, vector<72x288xf32>
    %c0_1 = arith.constant 0 : index
    %c0_2 = arith.constant 0 : index
    %1 = vector.load %arg2[%c0_1, %c0_2] : memref<288x32xf32, #tpu.memory_space<vmem>>, vector<288x32xf32>
    %cst = arith.constant dense<0.000000e+00> : vector<72x32xf32>
    %2 = tpu.matmul %0, %1, %cst {dimension_numbers = #tpu.dot_dimension_numbers<[1], [0], [0], [1], [0, 0, 1, 1], [], []>} : vector<72x288xf32>, vector<288x32xf32>, vector<72x32xf32> -> vector<72x32xf32>
    %c0_3 = arith.constant 0 : index
    %c0_4 = arith.constant 0 : index
    %3 = vector.load %arg3[%c0_3, %c0_4] : memref<1x32xf32, #tpu.memory_space<vmem>>, vector<1x32xf32>
    %4 = vector.broadcast %3 : vector<1x32xf32> to vector<72x32xf32>
    %5 = arith.addf %2, %4 : vector<72x32xf32>
    %cst_5 = arith.constant 0.000000e+00 : f32
    %6 = vector.broadcast %cst_5 : f32 to vector<72x32xf32>
    %7 = arith.maximumf %5, %6 : vector<72x32xf32>
    %c0_6 = arith.constant 0 : index
    %c0_7 = arith.constant 0 : index
    %8 = vector.load %arg4[%c0_6, %c0_7] : memref<32x32xf32, #tpu.memory_space<vmem>>, vector<32x32xf32>
    %cst_8 = arith.constant dense<0.000000e+00> : vector<72x32xf32>
    %9 = tpu.matmul %7, %8, %cst_8 {dimension_numbers = #tpu.dot_dimension_numbers<[1], [0], [0], [1], [0, 0, 1, 1], [], []>} : vector<72x32xf32>, vector<32x32xf32>, vector<72x32xf32> -> vector<72x32xf32>
    %c0_9 = arith.constant 0 : index
    %c0_10 = arith.constant 0 : index
    %10 = vector.load %arg5[%c0_9, %c0_10] : memref<1x32xf32, #tpu.memory_space<vmem>>, vector<1x32xf32>
    %11 = vector.broadcast %10 : vector<1x32xf32> to vector<72x32xf32>
    %12 = arith.addf %9, %11 : vector<72x32xf32>
    %cst_11 = arith.constant 0.000000e+00 : f32
    %13 = vector.broadcast %cst_11 : f32 to vector<72x32xf32>
    %14 = arith.maximumf %12, %13 : vector<72x32xf32>
    %c0_12 = arith.constant 0 : index
    %c0_13 = arith.constant 0 : index
    %15 = vector.load %arg6[%c0_12, %c0_13] : memref<32x32xf32, #tpu.memory_space<vmem>>, vector<32x32xf32>
    %cst_14 = arith.constant dense<0.000000e+00> : vector<72x32xf32>
    %16 = tpu.matmul %14, %15, %cst_14 {dimension_numbers = #tpu.dot_dimension_numbers<[1], [0], [0], [1], [0, 0, 1, 1], [], []>} : vector<72x32xf32>, vector<32x32xf32>, vector<72x32xf32> -> vector<72x32xf32>
    %c0_15 = arith.constant 0 : index
    %c0_16 = arith.constant 0 : index
    %17 = vector.load %arg7[%c0_15, %c0_16] : memref<1x32xf32, #tpu.memory_space<vmem>>, vector<1x32xf32>
    %18 = vector.broadcast %17 : vector<1x32xf32> to vector<72x32xf32>
    %19 = arith.addf %16, %18 : vector<72x32xf32>
    %20 = arith.negf %19 : vector<72x32xf32>
    %21 = math.exp %20 : vector<72x32xf32>
    %cst_17 = arith.constant 1.000000e+00 : f32
    %22 = vector.broadcast %cst_17 : f32 to vector<72x32xf32>
    %23 = arith.addf %22, %21 : vector<72x32xf32>
    %24 = arith.divf %22, %23 : vector<72x32xf32>
    %c0_18 = arith.constant 0 : index
    %c0_19 = arith.constant 0 : index
    %25 = vector.load %arg8[%c0_18, %c0_19] : memref<72x32xf32, #tpu.memory_space<vmem>>, vector<72x32xf32>
    tpu.vector_store %arg8[%c0_18, %c0_19], %24 {strides = array<i32>} : memref<72x32xf32, #tpu.memory_space<vmem>>, vector<72x32xf32>,
    return
  }
  func.func @transform_0(%arg0: i32) -> (i32, i32) {
    %c0_i32 = arith.constant 0 : i32
    %c0_i32_0 = arith.constant 0 : i32
    return %arg0, %c0_i32 : i32, i32
  }
  func.func @transform_1(%arg0: i32) -> (i32, i32) {
    %c0_i32 = arith.constant 0 : i32
    %c0_i32_0 = arith.constant 0 : i32
    %c0_i32_1 = arith.constant 0 : i32
    return %c0_i32, %c0_i32_0 : i32, i32
  }
  func.func @transform_2(%arg0: i32) -> (i32, i32) {
    %c0_i32 = arith.constant 0 : i32
    %c0_i32_0 = arith.constant 0 : i32
    %c0_i32_1 = arith.constant 0 : i32
    return %c0_i32, %c0_i32_0 : i32, i32
  }
  func.func @transform_3(%arg0: i32) -> (i32, i32) {
    %c0_i32 = arith.constant 0 : i32
    %c0_i32_0 = arith.constant 0 : i32
    %c0_i32_1 = arith.constant 0 : i32
    return %c0_i32, %c0_i32_0 : i32, i32
  }
  func.func @transform_4(%arg0: i32) -> (i32, i32) {
    %c0_i32 = arith.constant 0 : i32
    %c0_i32_0 = arith.constant 0 : i32
    %c0_i32_1 = arith.constant 0 : i32
    return %c0_i32, %c0_i32_0 : i32, i32
  }
  func.func @transform_5(%arg0: i32) -> (i32, i32) {
    %c0_i32 = arith.constant 0 : i32
    %c0_i32_0 = arith.constant 0 : i32
    %c0_i32_1 = arith.constant 0 : i32
    return %c0_i32, %c0_i32_0 : i32, i32
  }
  func.func @transform_6(%arg0: i32) -> (i32, i32) {
    %c0_i32 = arith.constant 0 : i32
    %c0_i32_0 = arith.constant 0 : i32
    %c0_i32_1 = arith.constant 0 : i32
    return %c0_i32, %c0_i32_0 : i32, i32
  }
  func.func @transform_7(%arg0: i32) -> (i32, i32) {
    %c0_i32 = arith.constant 0 : i32
    %c0_i32_0 = arith.constant 0 : i32
    return %arg0, %c0_i32 : i32, i32
  }
}

module attributes {stable_mosaic.version = 11 : i64} {
  func.func @conv_mlp_kernel(%arg0: i32, %arg1: memref<16x288xf32, #tpu.memory_space<vmem>>, %arg2: memref<288x32xf32, #tpu.memory_space<vmem>>, %arg3: memref<1x32xf32, #tpu.memory_space<vmem>>, %arg4: memref<32x32xf32, #tpu.memory_space<vmem>>, %arg5: memref<1x32xf32, #tpu.memory_space<vmem>>, %arg6: memref<32x96xf32, #tpu.memory_space<vmem>>, %arg7: memref<1x96xf32, #tpu.memory_space<vmem>>, %arg8: memref<16x96xf32, #tpu.memory_space<vmem>>) attributes {dimension_semantics = [#tpu.dimension_semantics<parallel>], iteration_bounds = array<i64: 1>, scalar_prefetch = 0 : i64, scratch_operands = 0 : i64, tpu.core_type = #tpu.core_type<tc>, window_params = [{transform_indices = @transform_0, window_bounds = array<i64: 16, 288>}, {pipeline_mode = #tpu.pipeline_mode<synchronous>, transform_indices = @transform_1, window_bounds = array<i64: 288, 32>}, {pipeline_mode = #tpu.pipeline_mode<synchronous>, transform_indices = @transform_2, window_bounds = array<i64: 1, 32>}, {pipeline_mode = #tpu.pipeline_mode<synchronous>, transform_indices = @transform_3, window_bounds = array<i64: 32, 32>}, {pipeline_mode = #tpu.pipeline_mode<synchronous>, transform_indices = @transform_4, window_bounds = array<i64: 1, 32>}, {pipeline_mode = #tpu.pipeline_mode<synchronous>, transform_indices = @transform_5, window_bounds = array<i64: 32, 96>}, {pipeline_mode = #tpu.pipeline_mode<synchronous>, transform_indices = @transform_6, window_bounds = array<i64: 1, 96>}, {transform_indices = @transform_7, window_bounds = array<i64: 16, 96>}]} {
    %c0 = arith.constant 0 : index
    %c0_0 = arith.constant 0 : index
    %0 = vector.load %arg1[%c0, %c0_0] : memref<16x288xf32, #tpu.memory_space<vmem>>, vector<16x288xf32>
    %c0_1 = arith.constant 0 : index
    %c0_2 = arith.constant 0 : index
    %1 = vector.load %arg2[%c0_1, %c0_2] : memref<288x32xf32, #tpu.memory_space<vmem>>, vector<288x32xf32>
    %cst = arith.constant dense<0.000000e+00> : vector<16x32xf32>
    %2 = tpu.matmul %0, %1, %cst {dimension_numbers = #tpu.dot_dimension_numbers<[1], [0], [0], [1], [0, 0, 1, 1], [], []>} : vector<16x288xf32>, vector<288x32xf32>, vector<16x32xf32> -> vector<16x32xf32>
    %c0_3 = arith.constant 0 : index
    %c0_4 = arith.constant 0 : index
    %3 = vector.load %arg3[%c0_3, %c0_4] : memref<1x32xf32, #tpu.memory_space<vmem>>, vector<1x32xf32>
    %4 = vector.broadcast %3 : vector<1x32xf32> to vector<16x32xf32>
    %5 = arith.addf %2, %4 : vector<16x32xf32>
    %cst_5 = arith.constant 0.000000e+00 : f32
    %6 = vector.broadcast %cst_5 : f32 to vector<16x32xf32>
    %7 = arith.maximumf %5, %6 : vector<16x32xf32>
    %c0_6 = arith.constant 0 : index
    %c0_7 = arith.constant 0 : index
    %8 = vector.load %arg4[%c0_6, %c0_7] : memref<32x32xf32, #tpu.memory_space<vmem>>, vector<32x32xf32>
    %cst_8 = arith.constant dense<0.000000e+00> : vector<16x32xf32>
    %9 = tpu.matmul %7, %8, %cst_8 {dimension_numbers = #tpu.dot_dimension_numbers<[1], [0], [0], [1], [0, 0, 1, 1], [], []>} : vector<16x32xf32>, vector<32x32xf32>, vector<16x32xf32> -> vector<16x32xf32>
    %c0_9 = arith.constant 0 : index
    %c0_10 = arith.constant 0 : index
    %10 = vector.load %arg5[%c0_9, %c0_10] : memref<1x32xf32, #tpu.memory_space<vmem>>, vector<1x32xf32>
    %11 = vector.broadcast %10 : vector<1x32xf32> to vector<16x32xf32>
    %12 = arith.addf %9, %11 : vector<16x32xf32>
    %cst_11 = arith.constant 0.000000e+00 : f32
    %13 = vector.broadcast %cst_11 : f32 to vector<16x32xf32>
    %14 = arith.maximumf %12, %13 : vector<16x32xf32>
    %c0_12 = arith.constant 0 : index
    %c0_13 = arith.constant 0 : index
    %15 = vector.load %arg6[%c0_12, %c0_13] : memref<32x96xf32, #tpu.memory_space<vmem>>, vector<32x96xf32>
    %cst_14 = arith.constant dense<0.000000e+00> : vector<16x96xf32>
    %16 = tpu.matmul %14, %15, %cst_14 {dimension_numbers = #tpu.dot_dimension_numbers<[1], [0], [0], [1], [0, 0, 1, 1], [], []>} : vector<16x32xf32>, vector<32x96xf32>, vector<16x96xf32> -> vector<16x96xf32>
    %c0_15 = arith.constant 0 : index
    %c0_16 = arith.constant 0 : index
    %17 = vector.load %arg7[%c0_15, %c0_16] : memref<1x96xf32, #tpu.memory_space<vmem>>, vector<1x96xf32>
    %18 = vector.broadcast %17 : vector<1x96xf32> to vector<16x96xf32>
    %19 = arith.addf %16, %18 : vector<16x96xf32>
    %20 = arith.negf %19 : vector<16x96xf32>
    %21 = math.exp %20 : vector<16x96xf32>
    %cst_17 = arith.constant 1.000000e+00 : f32
    %22 = vector.broadcast %cst_17 : f32 to vector<16x96xf32>
    %23 = arith.addf %22, %21 : vector<16x96xf32>
    %24 = arith.divf %22, %23 : vector<16x96xf32>
    %c0_18 = arith.constant 0 : index
    %c0_19 = arith.constant 0 : index
    %25 = vector.load %arg8[%c0_18, %c0_19] : memref<16x96xf32, #tpu.memory_space<vmem>>, vector<16x96xf32>
    tpu.vector_store %arg8[%c0_18, %c0_19], %24 {strides = array<i32>} : memref<16x96xf32, #tpu.memory_space<vmem>>, vector<16x96xf32>,
    return
  }
  func.func @transform_0(%arg0: i32) -> (i32, i32) {
    %c0_i32 = arith.constant 0 : i32
    %c0_i32_0 = arith.constant 0 : i32
    return %arg0, %c0_i32 : i32, i32
  }
  func.func @transform_1(%arg0: i32) -> (i32, i32) {
    %c0_i32 = arith.constant 0 : i32
    %c0_i32_0 = arith.constant 0 : i32
    %c0_i32_1 = arith.constant 0 : i32
    return %c0_i32, %c0_i32_0 : i32, i32
  }
  func.func @transform_2(%arg0: i32) -> (i32, i32) {
    %c0_i32 = arith.constant 0 : i32
    %c0_i32_0 = arith.constant 0 : i32
    %c0_i32_1 = arith.constant 0 : i32
    return %c0_i32, %c0_i32_0 : i32, i32
  }
  func.func @transform_3(%arg0: i32) -> (i32, i32) {
    %c0_i32 = arith.constant 0 : i32
    %c0_i32_0 = arith.constant 0 : i32
    %c0_i32_1 = arith.constant 0 : i32
    return %c0_i32, %c0_i32_0 : i32, i32
  }
  func.func @transform_4(%arg0: i32) -> (i32, i32) {
    %c0_i32 = arith.constant 0 : i32
    %c0_i32_0 = arith.constant 0 : i32
    %c0_i32_1 = arith.constant 0 : i32
    return %c0_i32, %c0_i32_0 : i32, i32
  }
  func.func @transform_5(%arg0: i32) -> (i32, i32) {
    %c0_i32 = arith.constant 0 : i32
    %c0_i32_0 = arith.constant 0 : i32
    %c0_i32_1 = arith.constant 0 : i32
    return %c0_i32, %c0_i32_0 : i32, i32
  }
  func.func @transform_6(%arg0: i32) -> (i32, i32) {
    %c0_i32 = arith.constant 0 : i32
    %c0_i32_0 = arith.constant 0 : i32
    %c0_i32_1 = arith.constant 0 : i32
    return %c0_i32, %c0_i32_0 : i32, i32
  }
  func.func @transform_7(%arg0: i32) -> (i32, i32) {
    %c0_i32 = arith.constant 0 : i32
    %c0_i32_0 = arith.constant 0 : i32
    return %arg0, %c0_i32 : i32, i32
  }
}

module attributes {stable_mosaic.version = 11 : i64} {
  func.func @attention_kernel(%arg0: i32, %arg1: memref<8x9x4xf32, #tpu.memory_space<vmem>>, %arg2: memref<8x9x4xf32, #tpu.memory_space<vmem>>, %arg3: memref<8x9x4xf32, #tpu.memory_space<vmem>>, %arg4: memref<32x32xf32, #tpu.memory_space<vmem>>, %arg5: memref<9x32xf32, #tpu.memory_space<vmem>>, %arg6: memref<9x32xf32, #tpu.memory_space<vmem>>) attributes {dimension_semantics = [#tpu.dimension_semantics<arbitrary>], iteration_bounds = array<i64: 1>, scalar_prefetch = 0 : i64, scratch_operands = 1 : i64, tpu.core_type = #tpu.core_type<tc>, window_params = [{pipeline_mode = #tpu.pipeline_mode<synchronous>, transform_indices = @transform_0, window_bounds = array<i64: 8, 9, 4>}, {pipeline_mode = #tpu.pipeline_mode<synchronous>, transform_indices = @transform_1, window_bounds = array<i64: 8, 9, 4>}, {pipeline_mode = #tpu.pipeline_mode<synchronous>, transform_indices = @transform_2, window_bounds = array<i64: 8, 9, 4>}, {pipeline_mode = #tpu.pipeline_mode<synchronous>, transform_indices = @transform_3, window_bounds = array<i64: 32, 32>}, {pipeline_mode = #tpu.pipeline_mode<synchronous>, transform_indices = @transform_4, window_bounds = array<i64: 9, 32>}]} {
    %c0 = arith.constant 0 : index
    %c0_0 = arith.constant 0 : index
    %c0_1 = arith.constant 0 : index
    %0 = vector.load %arg1[%c0, %c0_0, %c0_1] : memref<8x9x4xf32, #tpu.memory_space<vmem>>, vector<8x9x4xf32>
    %cst = arith.constant 5.000000e-01 : f32
    %1 = vector.broadcast %cst : f32 to vector<8x9x4xf32>
    %2 = arith.mulf %0, %1 : vector<8x9x4xf32>
    %c0_2 = arith.constant 0 : index
    %c0_3 = arith.constant 0 : index
    %c0_4 = arith.constant 0 : index
    %3 = vector.load %arg2[%c0_2, %c0_3, %c0_4] : memref<8x9x4xf32, #tpu.memory_space<vmem>>, vector<8x9x4xf32>
    %c0_5 = arith.constant 0 : index
    %c0_6 = arith.constant 0 : index
    %c0_7 = arith.constant 0 : index
    %4 = vector.load %arg3[%c0_5, %c0_6, %c0_7] : memref<8x9x4xf32, #tpu.memory_space<vmem>>, vector<8x9x4xf32>
    %5 = vector.extract_strided_slice %2 {offsets = [0, 0, 0], sizes = [1, 9, 4], strides = [1, 1, 1]} : vector<8x9x4xf32> to vector<1x9x4xf32>
    %6 = vector.shape_cast %5 : vector<1x9x4xf32> to vector<9x4xf32>
    %7 = vector.extract_strided_slice %3 {offsets = [0, 0, 0], sizes = [1, 9, 4], strides = [1, 1, 1]} : vector<8x9x4xf32> to vector<1x9x4xf32>
    %8 = vector.shape_cast %7 : vector<1x9x4xf32> to vector<9x4xf32>
    %cst_8 = arith.constant dense<0.000000e+00> : vector<9x9xf32>
    %9 = tpu.matmul %6, %8, %cst_8 {dimension_numbers = #tpu.dot_dimension_numbers<[1], [1], [0], [0], [0, 0, 1, 0], [], []>} : vector<9x4xf32>, vector<9x4xf32>, vector<9x9xf32> -> vector<9x9xf32>
    %cst_9 = arith.constant dense<0xFF800000> : vector<9xf32>
    %10 = vector.multi_reduction <maximumf>, %9, %cst_9 [1] : vector<9x9xf32> to vector<9xf32>
    %11 = vector.shape_cast %10 : vector<9xf32> to vector<9x1xf32>
    %12 = vector.broadcast %11 : vector<9x1xf32> to vector<9x9xf32>
    %13 = arith.subf %9, %12 : vector<9x9xf32>
    %14 = math.exp %13 : vector<9x9xf32>
    %cst_10 = arith.constant dense<0.000000e+00> : vector<9xf32>
    %15 = vector.multi_reduction <add>, %14, %cst_10 [1] : vector<9x9xf32> to vector<9xf32>
    %16 = vector.shape_cast %15 : vector<9xf32> to vector<9x1xf32>
    %17 = vector.broadcast %16 : vector<9x1xf32> to vector<9x9xf32>
    %18 = arith.divf %14, %17 : vector<9x9xf32>
    %19 = vector.extract_strided_slice %4 {offsets = [0, 0, 0], sizes = [1, 9, 4], strides = [1, 1, 1]} : vector<8x9x4xf32> to vector<1x9x4xf32>
    %20 = vector.shape_cast %19 : vector<1x9x4xf32> to vector<9x4xf32>
    %cst_11 = arith.constant dense<0.000000e+00> : vector<9x4xf32>
    %21 = tpu.matmul %18, %20, %cst_11 {dimension_numbers = #tpu.dot_dimension_numbers<[1], [0], [0], [1], [0, 0, 1, 1], [], []>} : vector<9x9xf32>, vector<9x4xf32>, vector<9x4xf32> -> vector<9x4xf32>
    %c0_12 = arith.constant 0 : index
    %c0_13 = arith.constant 0 : index
    %22 = vector.load %arg6[%c0_12, %c0_13] : memref<9x32xf32, #tpu.memory_space<vmem>>, vector<9x4xf32>
    tpu.vector_store %arg6[%c0_12, %c0_13], %21 {strides = array<i32>} : memref<9x32xf32, #tpu.memory_space<vmem>>, vector<9x4xf32>,
    %23 = vector.extract_strided_slice %2 {offsets = [1, 0, 0], sizes = [1, 9, 4], strides = [1, 1, 1]} : vector<8x9x4xf32> to vector<1x9x4xf32>
    %24 = vector.shape_cast %23 : vector<1x9x4xf32> to vector<9x4xf32>
    %25 = vector.extract_strided_slice %3 {offsets = [1, 0, 0], sizes = [1, 9, 4], strides = [1, 1, 1]} : vector<8x9x4xf32> to vector<1x9x4xf32>
    %26 = vector.shape_cast %25 : vector<1x9x4xf32> to vector<9x4xf32>
    %cst_14 = arith.constant dense<0.000000e+00> : vector<9x9xf32>
    %27 = tpu.matmul %24, %26, %cst_14 {dimension_numbers = #tpu.dot_dimension_numbers<[1], [1], [0], [0], [0, 0, 1, 0], [], []>} : vector<9x4xf32>, vector<9x4xf32>, vector<9x9xf32> -> vector<9x9xf32>
    %cst_15 = arith.constant dense<0xFF800000> : vector<9xf32>
    %28 = vector.multi_reduction <maximumf>, %27, %cst_15 [1] : vector<9x9xf32> to vector<9xf32>
    %29 = vector.shape_cast %28 : vector<9xf32> to vector<9x1xf32>
    %30 = vector.broadcast %29 : vector<9x1xf32> to vector<9x9xf32>
    %31 = arith.subf %27, %30 : vector<9x9xf32>
    %32 = math.exp %31 : vector<9x9xf32>
    %cst_16 = arith.constant dense<0.000000e+00> : vector<9xf32>
    %33 = vector.multi_reduction <add>, %32, %cst_16 [1] : vector<9x9xf32> to vector<9xf32>
    %34 = vector.shape_cast %33 : vector<9xf32> to vector<9x1xf32>
    %35 = vector.broadcast %34 : vector<9x1xf32> to vector<9x9xf32>
    %36 = arith.divf %32, %35 : vector<9x9xf32>
    %37 = vector.extract_strided_slice %4 {offsets = [1, 0, 0], sizes = [1, 9, 4], strides = [1, 1, 1]} : vector<8x9x4xf32> to vector<1x9x4xf32>
    %38 = vector.shape_cast %37 : vector<1x9x4xf32> to vector<9x4xf32>
    %cst_17 = arith.constant dense<0.000000e+00> : vector<9x4xf32>
    %39 = tpu.matmul %36, %38, %cst_17 {dimension_numbers = #tpu.dot_dimension_numbers<[1], [0], [0], [1], [0, 0, 1, 1], [], []>} : vector<9x9xf32>, vector<9x4xf32>, vector<9x4xf32> -> vector<9x4xf32>
    %c0_18 = arith.constant 0 : index
    %c4 = arith.constant 4 : index
    %40 = vector.load %arg6[%c0_18, %c4] : memref<9x32xf32, #tpu.memory_space<vmem>>, vector<9x4xf32>
    tpu.vector_store %arg6[%c0_18, %c4], %39 {strides = array<i32>} : memref<9x32xf32, #tpu.memory_space<vmem>>, vector<9x4xf32>,
    %41 = vector.extract_strided_slice %2 {offsets = [2, 0, 0], sizes = [1, 9, 4], strides = [1, 1, 1]} : vector<8x9x4xf32> to vector<1x9x4xf32>
    %42 = vector.shape_cast %41 : vector<1x9x4xf32> to vector<9x4xf32>
    %43 = vector.extract_strided_slice %3 {offsets = [2, 0, 0], sizes = [1, 9, 4], strides = [1, 1, 1]} : vector<8x9x4xf32> to vector<1x9x4xf32>
    %44 = vector.shape_cast %43 : vector<1x9x4xf32> to vector<9x4xf32>
    %cst_19 = arith.constant dense<0.000000e+00> : vector<9x9xf32>
    %45 = tpu.matmul %42, %44, %cst_19 {dimension_numbers = #tpu.dot_dimension_numbers<[1], [1], [0], [0], [0, 0, 1, 0], [], []>} : vector<9x4xf32>, vector<9x4xf32>, vector<9x9xf32> -> vector<9x9xf32>
    %cst_20 = arith.constant dense<0xFF800000> : vector<9xf32>
    %46 = vector.multi_reduction <maximumf>, %45, %cst_20 [1] : vector<9x9xf32> to vector<9xf32>
    %47 = vector.shape_cast %46 : vector<9xf32> to vector<9x1xf32>
    %48 = vector.broadcast %47 : vector<9x1xf32> to vector<9x9xf32>
    %49 = arith.subf %45, %48 : vector<9x9xf32>
    %50 = math.exp %49 : vector<9x9xf32>
    %cst_21 = arith.constant dense<0.000000e+00> : vector<9xf32>
    %51 = vector.multi_reduction <add>, %50, %cst_21 [1] : vector<9x9xf32> to vector<9xf32>
    %52 = vector.shape_cast %51 : vector<9xf32> to vector<9x1xf32>
    %53 = vector.broadcast %52 : vector<9x1xf32> to vector<9x9xf32>
    %54 = arith.divf %50, %53 : vector<9x9xf32>
    %55 = vector.extract_strided_slice %4 {offsets = [2, 0, 0], sizes = [1, 9, 4], strides = [1, 1, 1]} : vector<8x9x4xf32> to vector<1x9x4xf32>
    %56 = vector.shape_cast %55 : vector<1x9x4xf32> to vector<9x4xf32>
    %cst_22 = arith.constant dense<0.000000e+00> : vector<9x4xf32>
    %57 = tpu.matmul %54, %56, %cst_22 {dimension_numbers = #tpu.dot_dimension_numbers<[1], [0], [0], [1], [0, 0, 1, 1], [], []>} : vector<9x9xf32>, vector<9x4xf32>, vector<9x4xf32> -> vector<9x4xf32>
    %c0_23 = arith.constant 0 : index
    %c8 = arith.constant 8 : index
    %58 = vector.load %arg6[%c0_23, %c8] : memref<9x32xf32, #tpu.memory_space<vmem>>, vector<9x4xf32>
    tpu.vector_store %arg6[%c0_23, %c8], %57 {strides = array<i32>} : memref<9x32xf32, #tpu.memory_space<vmem>>, vector<9x4xf32>,
    %59 = vector.extract_strided_slice %2 {offsets = [3, 0, 0], sizes = [1, 9, 4], strides = [1, 1, 1]} : vector<8x9x4xf32> to vector<1x9x4xf32>
    %60 = vector.shape_cast %59 : vector<1x9x4xf32> to vector<9x4xf32>
    %61 = vector.extract_strided_slice %3 {offsets = [3, 0, 0], sizes = [1, 9, 4], strides = [1, 1, 1]} : vector<8x9x4xf32> to vector<1x9x4xf32>
    %62 = vector.shape_cast %61 : vector<1x9x4xf32> to vector<9x4xf32>
    %cst_24 = arith.constant dense<0.000000e+00> : vector<9x9xf32>
    %63 = tpu.matmul %60, %62, %cst_24 {dimension_numbers = #tpu.dot_dimension_numbers<[1], [1], [0], [0], [0, 0, 1, 0], [], []>} : vector<9x4xf32>, vector<9x4xf32>, vector<9x9xf32> -> vector<9x9xf32>
    %cst_25 = arith.constant dense<0xFF800000> : vector<9xf32>
    %64 = vector.multi_reduction <maximumf>, %63, %cst_25 [1] : vector<9x9xf32> to vector<9xf32>
    %65 = vector.shape_cast %64 : vector<9xf32> to vector<9x1xf32>
    %66 = vector.broadcast %65 : vector<9x1xf32> to vector<9x9xf32>
    %67 = arith.subf %63, %66 : vector<9x9xf32>
    %68 = math.exp %67 : vector<9x9xf32>
    %cst_26 = arith.constant dense<0.000000e+00> : vector<9xf32>
    %69 = vector.multi_reduction <add>, %68, %cst_26 [1] : vector<9x9xf32> to vector<9xf32>
    %70 = vector.shape_cast %69 : vector<9xf32> to vector<9x1xf32>
    %71 = vector.broadcast %70 : vector<9x1xf32> to vector<9x9xf32>
    %72 = arith.divf %68, %71 : vector<9x9xf32>
    %73 = vector.extract_strided_slice %4 {offsets = [3, 0, 0], sizes = [1, 9, 4], strides = [1, 1, 1]} : vector<8x9x4xf32> to vector<1x9x4xf32>
    %74 = vector.shape_cast %73 : vector<1x9x4xf32> to vector<9x4xf32>
    %cst_27 = arith.constant dense<0.000000e+00> : vector<9x4xf32>
    %75 = tpu.matmul %72, %74, %cst_27 {dimension_numbers = #tpu.dot_dimension_numbers<[1], [0], [0], [1], [0, 0, 1, 1], [], []>} : vector<9x9xf32>, vector<9x4xf32>, vector<9x4xf32> -> vector<9x4xf32>
    %c0_28 = arith.constant 0 : index
    %c12 = arith.constant 12 : index
    %76 = vector.load %arg6[%c0_28, %c12] : memref<9x32xf32, #tpu.memory_space<vmem>>, vector<9x4xf32>
    tpu.vector_store %arg6[%c0_28, %c12], %75 {strides = array<i32>} : memref<9x32xf32, #tpu.memory_space<vmem>>, vector<9x4xf32>,
    %77 = vector.extract_strided_slice %2 {offsets = [4, 0, 0], sizes = [1, 9, 4], strides = [1, 1, 1]} : vector<8x9x4xf32> to vector<1x9x4xf32>
    %78 = vector.shape_cast %77 : vector<1x9x4xf32> to vector<9x4xf32>
    %79 = vector.extract_strided_slice %3 {offsets = [4, 0, 0], sizes = [1, 9, 4], strides = [1, 1, 1]} : vector<8x9x4xf32> to vector<1x9x4xf32>
    %80 = vector.shape_cast %79 : vector<1x9x4xf32> to vector<9x4xf32>
    %cst_29 = arith.constant dense<0.000000e+00> : vector<9x9xf32>
    %81 = tpu.matmul %78, %80, %cst_29 {dimension_numbers = #tpu.dot_dimension_numbers<[1], [1], [0], [0], [0, 0, 1, 0], [], []>} : vector<9x4xf32>, vector<9x4xf32>, vector<9x9xf32> -> vector<9x9xf32>
    %cst_30 = arith.constant dense<0xFF800000> : vector<9xf32>
    %82 = vector.multi_reduction <maximumf>, %81, %cst_30 [1] : vector<9x9xf32> to vector<9xf32>
    %83 = vector.shape_cast %82 : vector<9xf32> to vector<9x1xf32>
    %84 = vector.broadcast %83 : vector<9x1xf32> to vector<9x9xf32>
    %85 = arith.subf %81, %84 : vector<9x9xf32>
    %86 = math.exp %85 : vector<9x9xf32>
    %cst_31 = arith.constant dense<0.000000e+00> : vector<9xf32>
    %87 = vector.multi_reduction <add>, %86, %cst_31 [1] : vector<9x9xf32> to vector<9xf32>
    %88 = vector.shape_cast %87 : vector<9xf32> to vector<9x1xf32>
    %89 = vector.broadcast %88 : vector<9x1xf32> to vector<9x9xf32>
    %90 = arith.divf %86, %89 : vector<9x9xf32>
    %91 = vector.extract_strided_slice %4 {offsets = [4, 0, 0], sizes = [1, 9, 4], strides = [1, 1, 1]} : vector<8x9x4xf32> to vector<1x9x4xf32>
    %92 = vector.shape_cast %91 : vector<1x9x4xf32> to vector<9x4xf32>
    %cst_32 = arith.constant dense<0.000000e+00> : vector<9x4xf32>
    %93 = tpu.matmul %90, %92, %cst_32 {dimension_numbers = #tpu.dot_dimension_numbers<[1], [0], [0], [1], [0, 0, 1, 1], [], []>} : vector<9x9xf32>, vector<9x4xf32>, vector<9x4xf32> -> vector<9x4xf32>
    %c0_33 = arith.constant 0 : index
    %c16 = arith.constant 16 : index
    %94 = vector.load %arg6[%c0_33, %c16] : memref<9x32xf32, #tpu.memory_space<vmem>>, vector<9x4xf32>
    tpu.vector_store %arg6[%c0_33, %c16], %93 {strides = array<i32>} : memref<9x32xf32, #tpu.memory_space<vmem>>, vector<9x4xf32>,
    %95 = vector.extract_strided_slice %2 {offsets = [5, 0, 0], sizes = [1, 9, 4], strides = [1, 1, 1]} : vector<8x9x4xf32> to vector<1x9x4xf32>
    %96 = vector.shape_cast %95 : vector<1x9x4xf32> to vector<9x4xf32>
    %97 = vector.extract_strided_slice %3 {offsets = [5, 0, 0], sizes = [1, 9, 4], strides = [1, 1, 1]} : vector<8x9x4xf32> to vector<1x9x4xf32>
    %98 = vector.shape_cast %97 : vector<1x9x4xf32> to vector<9x4xf32>
    %cst_34 = arith.constant dense<0.000000e+00> : vector<9x9xf32>
    %99 = tpu.matmul %96, %98, %cst_34 {dimension_numbers = #tpu.dot_dimension_numbers<[1], [1], [0], [0], [0, 0, 1, 0], [], []>} : vector<9x4xf32>, vector<9x4xf32>, vector<9x9xf32> -> vector<9x9xf32>
    %cst_35 = arith.constant dense<0xFF800000> : vector<9xf32>
    %100 = vector.multi_reduction <maximumf>, %99, %cst_35 [1] : vector<9x9xf32> to vector<9xf32>
    %101 = vector.shape_cast %100 : vector<9xf32> to vector<9x1xf32>
    %102 = vector.broadcast %101 : vector<9x1xf32> to vector<9x9xf32>
    %103 = arith.subf %99, %102 : vector<9x9xf32>
    %104 = math.exp %103 : vector<9x9xf32>
    %cst_36 = arith.constant dense<0.000000e+00> : vector<9xf32>
    %105 = vector.multi_reduction <add>, %104, %cst_36 [1] : vector<9x9xf32> to vector<9xf32>
    %106 = vector.shape_cast %105 : vector<9xf32> to vector<9x1xf32>
    %107 = vector.broadcast %106 : vector<9x1xf32> to vector<9x9xf32>
    %108 = arith.divf %104, %107 : vector<9x9xf32>
    %109 = vector.extract_strided_slice %4 {offsets = [5, 0, 0], sizes = [1, 9, 4], strides = [1, 1, 1]} : vector<8x9x4xf32> to vector<1x9x4xf32>
    %110 = vector.shape_cast %109 : vector<1x9x4xf32> to vector<9x4xf32>
    %cst_37 = arith.constant dense<0.000000e+00> : vector<9x4xf32>
    %111 = tpu.matmul %108, %110, %cst_37 {dimension_numbers = #tpu.dot_dimension_numbers<[1], [0], [0], [1], [0, 0, 1, 1], [], []>} : vector<9x9xf32>, vector<9x4xf32>, vector<9x4xf32> -> vector<9x4xf32>
    %c0_38 = arith.constant 0 : index
    %c20 = arith.constant 20 : index
    %112 = vector.load %arg6[%c0_38, %c20] : memref<9x32xf32, #tpu.memory_space<vmem>>, vector<9x4xf32>
    tpu.vector_store %arg6[%c0_38, %c20], %111 {strides = array<i32>} : memref<9x32xf32, #tpu.memory_space<vmem>>, vector<9x4xf32>,
    %113 = vector.extract_strided_slice %2 {offsets = [6, 0, 0], sizes = [1, 9, 4], strides = [1, 1, 1]} : vector<8x9x4xf32> to vector<1x9x4xf32>
    %114 = vector.shape_cast %113 : vector<1x9x4xf32> to vector<9x4xf32>
    %115 = vector.extract_strided_slice %3 {offsets = [6, 0, 0], sizes = [1, 9, 4], strides = [1, 1, 1]} : vector<8x9x4xf32> to vector<1x9x4xf32>
    %116 = vector.shape_cast %115 : vector<1x9x4xf32> to vector<9x4xf32>
    %cst_39 = arith.constant dense<0.000000e+00> : vector<9x9xf32>
    %117 = tpu.matmul %114, %116, %cst_39 {dimension_numbers = #tpu.dot_dimension_numbers<[1], [1], [0], [0], [0, 0, 1, 0], [], []>} : vector<9x4xf32>, vector<9x4xf32>, vector<9x9xf32> -> vector<9x9xf32>
    %cst_40 = arith.constant dense<0xFF800000> : vector<9xf32>
    %118 = vector.multi_reduction <maximumf>, %117, %cst_40 [1] : vector<9x9xf32> to vector<9xf32>
    %119 = vector.shape_cast %118 : vector<9xf32> to vector<9x1xf32>
    %120 = vector.broadcast %119 : vector<9x1xf32> to vector<9x9xf32>
    %121 = arith.subf %117, %120 : vector<9x9xf32>
    %122 = math.exp %121 : vector<9x9xf32>
    %cst_41 = arith.constant dense<0.000000e+00> : vector<9xf32>
    %123 = vector.multi_reduction <add>, %122, %cst_41 [1] : vector<9x9xf32> to vector<9xf32>
    %124 = vector.shape_cast %123 : vector<9xf32> to vector<9x1xf32>
    %125 = vector.broadcast %124 : vector<9x1xf32> to vector<9x9xf32>
    %126 = arith.divf %122, %125 : vector<9x9xf32>
    %127 = vector.extract_strided_slice %4 {offsets = [6, 0, 0], sizes = [1, 9, 4], strides = [1, 1, 1]} : vector<8x9x4xf32> to vector<1x9x4xf32>
    %128 = vector.shape_cast %127 : vector<1x9x4xf32> to vector<9x4xf32>
    %cst_42 = arith.constant dense<0.000000e+00> : vector<9x4xf32>
    %129 = tpu.matmul %126, %128, %cst_42 {dimension_numbers = #tpu.dot_dimension_numbers<[1], [0], [0], [1], [0, 0, 1, 1], [], []>} : vector<9x9xf32>, vector<9x4xf32>, vector<9x4xf32> -> vector<9x4xf32>
    %c0_43 = arith.constant 0 : index
    %c24 = arith.constant 24 : index
    %130 = vector.load %arg6[%c0_43, %c24] : memref<9x32xf32, #tpu.memory_space<vmem>>, vector<9x4xf32>
    tpu.vector_store %arg6[%c0_43, %c24], %129 {strides = array<i32>} : memref<9x32xf32, #tpu.memory_space<vmem>>, vector<9x4xf32>,
    %131 = vector.extract_strided_slice %2 {offsets = [7, 0, 0], sizes = [1, 9, 4], strides = [1, 1, 1]} : vector<8x9x4xf32> to vector<1x9x4xf32>
    %132 = vector.shape_cast %131 : vector<1x9x4xf32> to vector<9x4xf32>
    %133 = vector.extract_strided_slice %3 {offsets = [7, 0, 0], sizes = [1, 9, 4], strides = [1, 1, 1]} : vector<8x9x4xf32> to vector<1x9x4xf32>
    %134 = vector.shape_cast %133 : vector<1x9x4xf32> to vector<9x4xf32>
    %cst_44 = arith.constant dense<0.000000e+00> : vector<9x9xf32>
    %135 = tpu.matmul %132, %134, %cst_44 {dimension_numbers = #tpu.dot_dimension_numbers<[1], [1], [0], [0], [0, 0, 1, 0], [], []>} : vector<9x4xf32>, vector<9x4xf32>, vector<9x9xf32> -> vector<9x9xf32>
    %cst_45 = arith.constant dense<0xFF800000> : vector<9xf32>
    %136 = vector.multi_reduction <maximumf>, %135, %cst_45 [1] : vector<9x9xf32> to vector<9xf32>
    %137 = vector.shape_cast %136 : vector<9xf32> to vector<9x1xf32>
    %138 = vector.broadcast %137 : vector<9x1xf32> to vector<9x9xf32>
    %139 = arith.subf %135, %138 : vector<9x9xf32>
    %140 = math.exp %139 : vector<9x9xf32>
    %cst_46 = arith.constant dense<0.000000e+00> : vector<9xf32>
    %141 = vector.multi_reduction <add>, %140, %cst_46 [1] : vector<9x9xf32> to vector<9xf32>
    %142 = vector.shape_cast %141 : vector<9xf32> to vector<9x1xf32>
    %143 = vector.broadcast %142 : vector<9x1xf32> to vector<9x9xf32>
    %144 = arith.divf %140, %143 : vector<9x9xf32>
    %145 = vector.extract_strided_slice %4 {offsets = [7, 0, 0], sizes = [1, 9, 4], strides = [1, 1, 1]} : vector<8x9x4xf32> to vector<1x9x4xf32>
    %146 = vector.shape_cast %145 : vector<1x9x4xf32> to vector<9x4xf32>
    %cst_47 = arith.constant dense<0.000000e+00> : vector<9x4xf32>
    %147 = tpu.matmul %144, %146, %cst_47 {dimension_numbers = #tpu.dot_dimension_numbers<[1], [0], [0], [1], [0, 0, 1, 1], [], []>} : vector<9x9xf32>, vector<9x4xf32>, vector<9x4xf32> -> vector<9x4xf32>
    %c0_48 = arith.constant 0 : index
    %c28 = arith.constant 28 : index
    %148 = vector.load %arg6[%c0_48, %c28] : memref<9x32xf32, #tpu.memory_space<vmem>>, vector<9x4xf32>
    tpu.vector_store %arg6[%c0_48, %c28], %147 {strides = array<i32>} : memref<9x32xf32, #tpu.memory_space<vmem>>, vector<9x4xf32>,
    %c0_49 = arith.constant 0 : index
    %c0_50 = arith.constant 0 : index
    %149 = vector.load %arg6[%c0_49, %c0_50] : memref<9x32xf32, #tpu.memory_space<vmem>>, vector<9x32xf32>
    %c0_51 = arith.constant 0 : index
    %c0_52 = arith.constant 0 : index
    %150 = vector.load %arg4[%c0_51, %c0_52] : memref<32x32xf32, #tpu.memory_space<vmem>>, vector<32x32xf32>
    %cst_53 = arith.constant dense<0.000000e+00> : vector<9x32xf32>
    %151 = tpu.matmul %149, %150, %cst_53 {dimension_numbers = #tpu.dot_dimension_numbers<[1], [0], [0], [1], [0, 0, 1, 1], [], []>} : vector<9x32xf32>, vector<32x32xf32>, vector<9x32xf32> -> vector<9x32xf32>
    %c0_54 = arith.constant 0 : index
    %c0_55 = arith.constant 0 : index
    %152 = vector.load %arg5[%c0_54, %c0_55] : memref<9x32xf32, #tpu.memory_space<vmem>>, vector<9x32xf32>
    tpu.vector_store %arg5[%c0_54, %c0_55], %151 {strides = array<i32>} : memref<9x32xf32, #tpu.memory_space<vmem>>, vector<9x32xf32>,
    return
  }
  func.func @transform_0(%arg0: i32) -> (i32, i32, i32) {
    %c0_i32 = arith.constant 0 : i32
    %c0_i32_0 = arith.constant 0 : i32
    %c0_i32_1 = arith.constant 0 : i32
    %c0_i32_2 = arith.constant 0 : i32
    return %c0_i32, %c0_i32_0, %c0_i32_1 : i32, i32, i32
  }
  func.func @transform_1(%arg0: i32) -> (i32, i32, i32) {
    %c0_i32 = arith.constant 0 : i32
    %c0_i32_0 = arith.constant 0 : i32
    %c0_i32_1 = arith.constant 0 : i32
    %c0_i32_2 = arith.constant 0 : i32
    return %c0_i32, %c0_i32_0, %c0_i32_1 : i32, i32, i32
  }
  func.func @transform_2(%arg0: i32) -> (i32, i32, i32) {
    %c0_i32 = arith.constant 0 : i32
    %c0_i32_0 = arith.constant 0 : i32
    %c0_i32_1 = arith.constant 0 : i32
    %c0_i32_2 = arith.constant 0 : i32
    return %c0_i32, %c0_i32_0, %c0_i32_1 : i32, i32, i32
  }
  func.func @transform_3(%arg0: i32) -> (i32, i32) {
    %c0_i32 = arith.constant 0 : i32
    %c0_i32_0 = arith.constant 0 : i32
    %c0_i32_1 = arith.constant 0 : i32
    return %c0_i32, %c0_i32_0 : i32, i32
  }
  func.func @transform_4(%arg0: i32) -> (i32, i32) {
    %c0_i32 = arith.constant 0 : i32
    %c0_i32_0 = arith.constant 0 : i32
    %c0_i32_1 = arith.constant 0 : i32
    return %c0_i32, %c0_i32_0 : i32, i32
  }
}

module attributes {stable_mosaic.version = 11 : i64} {
  func.func @ln_mlp_kernel(%arg0: i32, %arg1: memref<72x32xf32, #tpu.memory_space<vmem>>, %arg2: memref<1x32xf32, #tpu.memory_space<vmem>>, %arg3: memref<1x32xf32, #tpu.memory_space<vmem>>, %arg4: memref<32x32xf32, #tpu.memory_space<vmem>>, %arg5: memref<1x32xf32, #tpu.memory_space<vmem>>, %arg6: memref<32x32xf32, #tpu.memory_space<vmem>>, %arg7: memref<1x32xf32, #tpu.memory_space<vmem>>, %arg8: memref<72x32xf32, #tpu.memory_space<vmem>>) attributes {dimension_semantics = [#tpu.dimension_semantics<parallel>], iteration_bounds = array<i64: 1>, scalar_prefetch = 0 : i64, scratch_operands = 0 : i64, tpu.core_type = #tpu.core_type<tc>, window_params = [{transform_indices = @transform_0, window_bounds = array<i64: 72, 32>}, {pipeline_mode = #tpu.pipeline_mode<synchronous>, transform_indices = @transform_1, window_bounds = array<i64: 1, 32>}, {pipeline_mode = #tpu.pipeline_mode<synchronous>, transform_indices = @transform_2, window_bounds = array<i64: 1, 32>}, {pipeline_mode = #tpu.pipeline_mode<synchronous>, transform_indices = @transform_3, window_bounds = array<i64: 32, 32>}, {pipeline_mode = #tpu.pipeline_mode<synchronous>, transform_indices = @transform_4, window_bounds = array<i64: 1, 32>}, {pipeline_mode = #tpu.pipeline_mode<synchronous>, transform_indices = @transform_5, window_bounds = array<i64: 32, 32>}, {pipeline_mode = #tpu.pipeline_mode<synchronous>, transform_indices = @transform_6, window_bounds = array<i64: 1, 32>}, {transform_indices = @transform_7, window_bounds = array<i64: 72, 32>}]} {
    %c0 = arith.constant 0 : index
    %c0_0 = arith.constant 0 : index
    %0 = vector.load %arg1[%c0, %c0_0] : memref<72x32xf32, #tpu.memory_space<vmem>>, vector<72x32xf32>
    %cst = arith.constant dense<0.000000e+00> : vector<72xf32>
    %1 = vector.multi_reduction <add>, %0, %cst [1] : vector<72x32xf32> to vector<72xf32>
    %2 = vector.shape_cast %1 : vector<72xf32> to vector<72x1xf32>
    %cst_1 = arith.constant 3.200000e+01 : f32
    %3 = vector.broadcast %cst_1 : f32 to vector<72x1xf32>
    %4 = arith.divf %2, %3 : vector<72x1xf32>
    %5 = vector.broadcast %4 : vector<72x1xf32> to vector<72x32xf32>
    %6 = arith.subf %0, %5 : vector<72x32xf32>
    %7 = arith.mulf %6, %6 : vector<72x32xf32>
    %cst_2 = arith.constant dense<0.000000e+00> : vector<72xf32>
    %8 = vector.multi_reduction <add>, %7, %cst_2 [1] : vector<72x32xf32> to vector<72xf32>
    %9 = vector.shape_cast %8 : vector<72xf32> to vector<72x1xf32>
    %cst_3 = arith.constant 3.200000e+01 : f32
    %10 = vector.broadcast %cst_3 : f32 to vector<72x1xf32>
    %11 = arith.divf %9, %10 : vector<72x1xf32>
    %12 = vector.broadcast %4 : vector<72x1xf32> to vector<72x32xf32>
    %13 = arith.subf %0, %12 : vector<72x32xf32>
    %cst_4 = arith.constant 9.99999974E-6 : f32
    %14 = vector.broadcast %cst_4 : f32 to vector<72x1xf32>
    %15 = arith.addf %11, %14 : vector<72x1xf32>
    %16 = math.rsqrt %15 : vector<72x1xf32>
    %17 = vector.broadcast %16 : vector<72x1xf32> to vector<72x32xf32>
    %18 = arith.mulf %13, %17 : vector<72x32xf32>
    %c0_5 = arith.constant 0 : index
    %c0_6 = arith.constant 0 : index
    %19 = vector.load %arg2[%c0_5, %c0_6] : memref<1x32xf32, #tpu.memory_space<vmem>>, vector<1x32xf32>
    %20 = vector.broadcast %19 : vector<1x32xf32> to vector<72x32xf32>
    %21 = arith.mulf %18, %20 : vector<72x32xf32>
    %c0_7 = arith.constant 0 : index
    %c0_8 = arith.constant 0 : index
    %22 = vector.load %arg3[%c0_7, %c0_8] : memref<1x32xf32, #tpu.memory_space<vmem>>, vector<1x32xf32>
    %23 = vector.broadcast %22 : vector<1x32xf32> to vector<72x32xf32>
    %24 = arith.addf %21, %23 : vector<72x32xf32>
    %c0_9 = arith.constant 0 : index
    %c0_10 = arith.constant 0 : index
    %25 = vector.load %arg4[%c0_9, %c0_10] : memref<32x32xf32, #tpu.memory_space<vmem>>, vector<32x32xf32>
    %cst_11 = arith.constant dense<0.000000e+00> : vector<72x32xf32>
    %26 = tpu.matmul %24, %25, %cst_11 {dimension_numbers = #tpu.dot_dimension_numbers<[1], [0], [0], [1], [0, 0, 1, 1], [], []>} : vector<72x32xf32>, vector<32x32xf32>, vector<72x32xf32> -> vector<72x32xf32>
    %c0_12 = arith.constant 0 : index
    %c0_13 = arith.constant 0 : index
    %27 = vector.load %arg5[%c0_12, %c0_13] : memref<1x32xf32, #tpu.memory_space<vmem>>, vector<1x32xf32>
    %28 = vector.broadcast %27 : vector<1x32xf32> to vector<72x32xf32>
    %29 = arith.addf %26, %28 : vector<72x32xf32>
    %cst_14 = arith.constant 0.000000e+00 : f32
    %30 = vector.broadcast %cst_14 : f32 to vector<72x32xf32>
    %31 = arith.maximumf %29, %30 : vector<72x32xf32>
    %c0_15 = arith.constant 0 : index
    %c0_16 = arith.constant 0 : index
    %32 = vector.load %arg6[%c0_15, %c0_16] : memref<32x32xf32, #tpu.memory_space<vmem>>, vector<32x32xf32>
    %cst_17 = arith.constant dense<0.000000e+00> : vector<72x32xf32>
    %33 = tpu.matmul %31, %32, %cst_17 {dimension_numbers = #tpu.dot_dimension_numbers<[1], [0], [0], [1], [0, 0, 1, 1], [], []>} : vector<72x32xf32>, vector<32x32xf32>, vector<72x32xf32> -> vector<72x32xf32>
    %c0_18 = arith.constant 0 : index
    %c0_19 = arith.constant 0 : index
    %34 = vector.load %arg7[%c0_18, %c0_19] : memref<1x32xf32, #tpu.memory_space<vmem>>, vector<1x32xf32>
    %35 = vector.broadcast %34 : vector<1x32xf32> to vector<72x32xf32>
    %36 = arith.addf %33, %35 : vector<72x32xf32>
    %37 = arith.addf %36, %0 : vector<72x32xf32>
    %c0_20 = arith.constant 0 : index
    %c0_21 = arith.constant 0 : index
    %38 = vector.load %arg8[%c0_20, %c0_21] : memref<72x32xf32, #tpu.memory_space<vmem>>, vector<72x32xf32>
    tpu.vector_store %arg8[%c0_20, %c0_21], %37 {strides = array<i32>} : memref<72x32xf32, #tpu.memory_space<vmem>>, vector<72x32xf32>,
    return
  }
  func.func @transform_0(%arg0: i32) -> (i32, i32) {
    %c0_i32 = arith.constant 0 : i32
    %c0_i32_0 = arith.constant 0 : i32
    return %arg0, %c0_i32 : i32, i32
  }
  func.func @transform_1(%arg0: i32) -> (i32, i32) {
    %c0_i32 = arith.constant 0 : i32
    %c0_i32_0 = arith.constant 0 : i32
    %c0_i32_1 = arith.constant 0 : i32
    return %c0_i32, %c0_i32_0 : i32, i32
  }
  func.func @transform_2(%arg0: i32) -> (i32, i32) {
    %c0_i32 = arith.constant 0 : i32
    %c0_i32_0 = arith.constant 0 : i32
    %c0_i32_1 = arith.constant 0 : i32
    return %c0_i32, %c0_i32_0 : i32, i32
  }
  func.func @transform_3(%arg0: i32) -> (i32, i32) {
    %c0_i32 = arith.constant 0 : i32
    %c0_i32_0 = arith.constant 0 : i32
    %c0_i32_1 = arith.constant 0 : i32
    return %c0_i32, %c0_i32_0 : i32, i32
  }
  func.func @transform_4(%arg0: i32) -> (i32, i32) {
    %c0_i32 = arith.constant 0 : i32
    %c0_i32_0 = arith.constant 0 : i32
    %c0_i32_1 = arith.constant 0 : i32
    return %c0_i32, %c0_i32_0 : i32, i32
  }
  func.func @transform_5(%arg0: i32) -> (i32, i32) {
    %c0_i32 = arith.constant 0 : i32
    %c0_i32_0 = arith.constant 0 : i32
    %c0_i32_1 = arith.constant 0 : i32
    return %c0_i32, %c0_i32_0 : i32, i32
  }
  func.func @transform_6(%arg0: i32) -> (i32, i32) {
    %c0_i32 = arith.constant 0 : i32
    %c0_i32_0 = arith.constant 0 : i32
    %c0_i32_1 = arith.constant 0 : i32
    return %c0_i32, %c0_i32_0 : i32, i32
  }
  func.func @transform_7(%arg0: i32) -> (i32, i32) {
    %c0_i32 = arith.constant 0 : i32
    %c0_i32_0 = arith.constant 0 : i32
    return %arg0, %c0_i32 : i32, i32
  }
}

</mosaic_0001>

<bundles_post_ra>
// kernel: dwablock_forward.4
= control target key start
LH: loop header
LB: loop body
LE: loop exit
PB: predicated region body
PF: predicated region fallthrough
CT: control target
= control target key end

     0   :  { %v1060_v3 = vmov 0.0|0.0   ;;  %vm1061_vm0 = vmmov 0   ;;  %v1062_v4 = vmov 0.0   ;;  %vm96_vm1 = vcmask 261120   ;;  %s1461_s1 = inlined_call_operand.vmem [shape: f32[288,32], index: 1, kind: input, shape index: {}]   ;;  %s1462_s0 = inlined_call_operand.vmem [shape: f32[72,288], index: 0, kind: input, shape index: {}]   ;;  %s1463_s3 = inlined_call_operand.vmem [shape: f32[32,32], index: 3, kind: input, shape index: {}]   ;;  %s1464_s5 = inlined_call_operand.vmem [shape: f32[32,32], index: 5, kind: input, shape index: {}]   ;;  %s1465_s2 = inlined_call_operand.vmem [shape: f32[1,32], index: 2, kind: input, shape index: {}]   ;;  %s1466_s4 = inlined_call_operand.vmem [shape: f32[1,32], index: 4, kind: input, shape index: {}]   ;;  %s1467_s6 = inlined_call_operand.vmem [shape: f32[1,32], index: 6, kind: input, shape index: {}]   ;;  %s1468_s7 = inlined_call_operand.vmem [shape: f32[72,32], index: 7, kind: output, shape index: {}]  }
   0x1   :  { %v69_v0 = vld [vmem:[%s1461_s1 + $0x80] sm:$0xff]  ;;  %v70_v1 = vld [vmem:[%s1461_s1 + $0x88] sm:$0xff]  ;;  %999 = vmatprep.subr.bf16.mxu1 %v1060_v3  ;;  %870 = vmatprep.mubr.msk.f32.mxu1 %vm1061_vm0, %v1062_v4  ;;  %v71_v7 = vld [vmem:[%s1461_s1 + $0x90] sm:$0xff] }
   0x2   :  { %v53_v2 = vld [vmem:[%s1461_s1] sm:$0xff]  ;;  %v967_v5 = vpack.c.bf16 %v70_v1, %v69_v0  ;;  %v54_v6 = vld [vmem:[%s1461_s1 + $0x8] sm:$0xff]  ;;  %v72_v8 = vld [vmem:[%s1461_s1 + $0x98] sm:$0xff] }
   0x3   :  { %v969_v9 = vpack.c.bf16 %v54_v6, %v53_v2  ;;  %v971_v10 = vpack.c.bf16 %v72_v8, %v71_v7  ;;  %v55_v11 = vld [vmem:[%s1461_s1 + $0x10] sm:$0xff]  ;;  %v56_v12 = vld [vmem:[%s1461_s1 + $0x18] sm:$0xff]  ;;  %v73_v13 = vld [vmem:[%s1461_s1 + $0xa0] sm:$0xff] }
   0x4   :  { %968 = vmatprep.subr.bf16.mxu0 %v967_v5  ;;  %v74_v14 = vld [vmem:[%s1461_s1 + $0xa8] sm:$0xff]  ;;  %v973_v15 = vpack.c.bf16 %v56_v12, %v55_v11  ;;  %v57_v17 = vld [vmem:[%s1461_s1 + $0x20] sm:$0xff]  ;;  %v75_v19 = vld [vmem:[%s1461_s1 + $0xb0] sm:$0xff] }
   0x5   :  { %970 = vmatpush3.bf16.msra.mxu0 %v969_v9  ;;  %v975_v16 = vpack.c.bf16 %v74_v14, %v73_v13  ;;  %v58_v18 = vld [vmem:[%s1461_s1 + $0x28] sm:$0xff]  ;;  %v76_v20 = vld [vmem:[%s1461_s1 + $0xb8] sm:$0xff]  ;;  %v59_v23 = vld [vmem:[%s1461_s1 + $0x30] sm:$0xff] }
   0x6   :  { %972 = vmatprep.subr.bf16.mxu0 %v971_v10  ;;  %v977_v21 = vpack.c.bf16 %v58_v18, %v57_v17  ;;  %v979_v22 = vpack.c.bf16 %v76_v20, %v75_v19  ;;  %v60_v24 = vld [vmem:[%s1461_s1 + $0x38] sm:$0xff]  ;;  %v77_v25 = vld [vmem:[%s1461_s1 + $0xc0] sm:$0xff]  ;;  %v78_v26 = vld [vmem:[%s1461_s1 + $0xc8] sm:$0xff] }
   0x7   :  { %v85_v27 = vld [vmem:[%s1461_s1 + $0x100] sm:$0xff]  ;;  %v86_v28 = vld [vmem:[%s1461_s1 + $0x108] sm:$0xff]  ;;  %v981_v30 = vpack.c.bf16 %v60_v24, %v59_v23  ;;  %v87_v32 = vld [vmem:[%s1461_s1 + $0x110] sm:$0xff]  ;;  %v983_v34 = vpack.c.bf16 %v78_v26, %v77_v25 }
   0x8   :  { %v27_v29 = vld [vmem:[%s1462_s0 + $0x8] sm:$0xff]  ;;  %v1000_v31 = vpack.c.bf16 %v86_v28, %v85_v27  ;;  %v88_v33 = vld [vmem:[%s1461_s1 + $0x118] sm:$0xff]  ;;  %v61_v35 = vld [vmem:[%s1461_s1 + $0x40] sm:$0xff] }
   0x9   :  { %974 = vmatpush3.bf16.msra.mxu0 %v973_v15  ;;  %188 = vmatprep.mubr.f32.mxu0 %v27_v29  ;;  %v62_v36 = vld [vmem:[%s1461_s1 + $0x48] sm:$0xff]  ;;  %v79_v37 = vld [vmem:[%s1461_s1 + $0xd0] sm:$0xff]  ;;  %v80_v38 = vld [vmem:[%s1461_s1 + $0xd8] sm:$0xff]  ;;  %v1003_v39 = vpack.c.bf16 %v88_v33, %v87_v32 }
   0xa   :  { %976 = vmatprep.subr.bf16.mxu0 %v975_v16  ;;  %1001 = vmatpush3.bf16.msra.mxu1 %v1000_v31  ;;  %v985_v40 = vpack.c.bf16 %v62_v36, %v61_v35  ;;  %v987_v41 = vpack.c.bf16 %v80_v38, %v79_v37  ;;  %v63_v42 = vld [vmem:[%s1461_s1 + $0x50] sm:$0xff]  ;;  %v64_v43 = vld [vmem:[%s1461_s1 + $0x58] sm:$0xff]  ;;  %v81_v44 = vld [vmem:[%s1461_s1 + $0xe0] sm:$0xff] }
   0xb   :  { %1002 = vmatprep.subr.bf16.mxu1 %v1060_v3  ;;  %v82_v45 = vld [vmem:[%s1461_s1 + $0xe8] sm:$0xff]  ;;  %v28_v46 = vld [vmem:[%s1462_s0 + $0x10] sm:$0xff]  ;;  %v989_v47 = vpack.c.bf16 %v64_v43, %v63_v42  ;;  %v65_v48 = vld [vmem:[%s1461_s1 + $0x60] sm:$0xff] }
   0xc   :  { %v66_v49 = vld [vmem:[%s1461_s1 + $0x68] sm:$0xff]  ;;  %v83_v50 = vld [vmem:[%s1461_s1 + $0xf0] sm:$0xff]  ;;  %v991_v51 = vpack.c.bf16 %v82_v45, %v81_v44  ;;  %v353_v52 = vld [vmem:[%s1463_s3] sm:$0xff] }
   0xd   :  { %978 = vmatpush3.bf16.msra.mxu0 %v977_v21  ;;  %v354_v53 = vld [vmem:[%s1463_s3 + $0x8] sm:$0xff]  ;;  %v355_v54 = vld [vmem:[%s1463_s3 + $0x10] sm:$0xff]  ;;  %v84_v55 = vld [vmem:[%s1461_s1 + $0xf8] sm:$0xff]  ;;  %v993_v59 = vpack.c.bf16 %v66_v49, %v65_v48 }
   0xe   :  { %980 = vmatprep.subr.bf16.mxu0 %v979_v22  ;;  %1004 = vmatpush3.bf16.msra.mxu1 %v1003_v39  ;;  %v31_v56 = vld [vmem:[%s1462_s0 + $0x28] sm:$0xff]  ;;  %v1006_v57 = vpack.c.bf16 %v354_v53, %v353_v52  ;;  %v356_v58 = vld [vmem:[%s1463_s3 + $0x18] sm:$0xff]  ;;  %v995_v61 = vpack.c.bf16 %v84_v55, %v83_v50  ;;  %v67_v62 = vld [vmem:[%s1461_s1 + $0x70] sm:$0xff] }
   0xf   :  { %1005 = vmatprep.subr.bf16.mxu1 %v1060_v3  ;;  %v1009_v60 = vpack.c.bf16 %v356_v58, %v355_v54  ;;  %v68_v63 = vld [vmem:[%s1461_s1 + $0x78] sm:$0xff]  ;;  %v34_v0 = vld [vmem:[%s1462_s0 + $0x40] sm:$0xff]  ;;  %v40_v7 = vld [vmem:[%s1462_s0 + $0x70] sm:$0xff] }
  0x10   :  { %v997_v1 = vpack.c.bf16 %v68_v63, %v67_v62  ;;  %v37_v2 = vld [vmem:[%s1462_s0 + $0x58] sm:$0xff]  ;;  %v26_v5 = vld [vmem:[%s1462_s0] sm:$0xff]  ;;  %v43_v10 = vld [vmem:[%s1462_s0 + $0x88] sm:$0xff] }
  0x11   :  { %982 = vmatpush3.bf16.msra.mxu0 %v981_v30  ;;  %871 = vmatmul.mubr.msk.f32.vlgmr.msra.gmra.mrb[0].mxu1 %vm96_vm1, %v28_v46  ;;  %v30_v6 = vld [vmem:[%s1462_s0 + $0x20] sm:$0xff]  ;;  %v29_v8 = vld [vmem:[%s1462_s0 + $0x18] sm:$0xff]  ;;  %v32_v11 = vld [vmem:[%s1462_s0 + $0x30] sm:$0xff] }
  0x12   :  { %984 = vmatprep.subr.bf16.mxu0 %v983_v34  ;;  %873 = vmatprep.mubr.msk.f32.mxu1 %vm1061_vm0, %v1062_v4  ;;  %v33_v9 = vld [vmem:[%s1462_s0 + $0x38] sm:$0xff]  ;;  %v36_v12 = vld [vmem:[%s1462_s0 + $0x50] sm:$0xff]  ;;  %v46_v13 = vld [vmem:[%s1462_s0 + $0xa0] sm:$0xff] }
  0x13   :  { %1007 = vmatpush3.bf16.msra.mxu1 %v1006_v57  ;;  %v35_v14 = vld [vmem:[%s1462_s0 + $0x48] sm:$0xff]  ;;  %v49_v16 = vld [vmem:[%s1462_s0 + $0xb8] sm:$0xff]  ;;  %v38_v17 = vld [vmem:[%s1462_s0 + $0x60] sm:$0xff] }
  0x14   :  { %1008 = vmatprep.subr.bf16.mxu1 %v1060_v3  ;;  %v39_v15 = vld [vmem:[%s1462_s0 + $0x68] sm:$0xff]  ;;  %v42_v18 = vld [vmem:[%s1462_s0 + $0x80] sm:$0xff]  ;;  %v52_v19 = vld [vmem:[%s1462_s0 + $0xd0] sm:$0xff] }
  0x15   :  { %986 = vmatpush3.bf16.msra.mxu0 %v985_v40  ;;  %874 = vmatmul.mubr.msk.f32.gmra.mrb[2].mxu1 %vm96_vm1, %v31_v56  ;;  %v41_v20 = vld [vmem:[%s1462_s0 + $0x78] sm:$0xff]  ;;  %v44_v22 = vld [vmem:[%s1462_s0 + $0x90] sm:$0xff]  ;;  %v47_v24 = vld [vmem:[%s1462_s0 + $0xa8] sm:$0xff] }
  0x16   :  { %988 = vmatprep.subr.bf16.mxu0 %v987_v41  ;;  %876 = vmatprep.mubr.msk.f32.mxu1 %vm1061_vm0, %v1062_v4  ;;  %v45_v21 = vld [vmem:[%s1462_s0 + $0x98] sm:$0xff]  ;;  %v48_v23 = vld [vmem:[%s1462_s0 + $0xb0] sm:$0xff]  ;;  %v51_v25 = vld [vmem:[%s1462_s0 + $0xc8] sm:$0xff] }
  0x17   :  { %1010 = vmatpush3.bf16.msra.mxu1 %v1009_v60  ;;  %v50_v26 = vld [vmem:[%s1462_s0 + $0xc0] sm:$0xff]  ;;  %v511_v28 = vld [vmem:[%s1464_s5 + $0x8] sm:$0xff]  ;;  %v512_v29 = vld [vmem:[%s1464_s5 + $0x10] sm:$0xff] }
  0x18   :  { %1017 = vmatprep.subr.bf16.mxu1 %v1060_v3  ;;  %v510_v27 = vld [vmem:[%s1464_s5] sm:$0xff]  ;;  %v513_v31 = vld [vmem:[%s1464_s5 + $0x18] sm:$0xff] }
  0x19   :  { %990 = vmatpush3.bf16.msra.mxu0 %v989_v47  ;;  %877 = vmatmul.mubr.msk.f32.gmra.mrb[4].mxu1 %vm96_vm1, %v34_v0  ;;  %v1012_v30 = vpack.c.bf16 %v511_v28, %v510_v27  ;;  %v1015_v32 = vpack.c.bf16 %v513_v31, %v512_v29  ;;  %v1357_v43 = vld [vmem:[%s1465_s2] ss:$0 sm:$0xff] }
  0x1a   :  { %992 = vmatprep.subr.bf16.mxu0 %v991_v51  ;;  %879 = vmatprep.mubr.msk.f32.mxu1 %vm1061_vm0, %v1062_v4 }
  0x1d   :  { %994 = vmatpush3.bf16.msra.mxu0 %v993_v59  ;;  %880 = vmatmul.mubr.msk.f32.gmra.mrb[6].mxu1 %vm96_vm1, %v37_v2 }
  0x1e   :  { %996 = vmatprep.subr.bf16.mxu0 %v995_v61  ;;  %882 = vmatprep.mubr.msk.f32.mxu1 %vm1061_vm0, %v1062_v4 }
  0x21   :  { %998 = vmatpush3.bf16.msra.mxu0 %v997_v1  ;;  %883 = vmatmul.mubr.msk.f32.gmra.mrb[8].mxu1 %vm96_vm1, %v40_v7 }
  0x22   :  { %1011 = vmatprep.subr.bf16.mxu0 %v1060_v3  ;;  %885 = vmatprep.mubr.msk.f32.mxu1 %vm1061_vm0, %v1062_v4 }
  0x24   :  { %189 = vmatmul.mubr.f32.vlgmr.msra.gmra.mrb[0].mxu0 %v26_v5 }
  0x25   :  { %193 = vmatprep.mubr.f32.mxu0 %v30_v6  ;;  %886 = vmatmul.mubr.msk.f32.gmra.mrb[10].mxu1 %vm96_vm1, %v43_v10 }
  0x26   :  { %888 = vmatprep.mubr.msk.f32.mxu1 %vm1061_vm0, %v1062_v4  ;;  %1013 = vmatpush3.bf16.msra.mxu0 %v1012_v30 }
  0x27   :  { %1014 = vmatprep.subr.bf16.mxu0 %v1060_v3 }
  0x28   :  { %194 = vmatmul.mubr.f32.gmra.mrb[2].mxu0 %v29_v8 }
  0x29   :  { %198 = vmatprep.mubr.f32.mxu0 %v33_v9  ;;  %889 = vmatmul.mubr.msk.f32.gmra.mrb[12].mxu1 %vm96_vm1, %v46_v13 }
  0x2a   :  { %891 = vmatprep.mubr.msk.f32.mxu1 %vm1061_vm0, %v1062_v4  ;;  %1016 = vmatpush3.bf16.msra.mxu0 %v1015_v32 }
  0x2c   :  { %199 = vmatmul.mubr.f32.gmra.mrb[4].mxu0 %v32_v11 }
  0x2d   :  { %203 = vmatprep.mubr.f32.mxu0 %v36_v12  ;;  %892 = vmatmul.mubr.msk.f32.gmra.mrb[14].mxu1 %vm96_vm1, %v49_v16 }
  0x2e   :  { %894 = vmatprep.mubr.msk.f32.mxu1 %vm1061_vm0, %v1062_v4 }
  0x30   :  { %204 = vmatmul.mubr.f32.gmra.mrb[6].mxu0 %v35_v14 }
  0x31   :  { %208 = vmatprep.mubr.f32.mxu0 %v39_v15  ;;  %895 = vmatmul.mubr.msk.f32.gmra.mrb[16].mxu1 %vm96_vm1, %v52_v19 }
  0x32   :  { %905 = vmatprep.mubr.msk.f32.mxu1 %vm1061_vm0, %v1062_v4 }
  0x34   :  { %209 = vmatmul.mubr.f32.gmra.mrb[8].mxu0 %v38_v17 }
  0x35   :  { %213 = vmatprep.mubr.f32.mxu0 %v42_v18 }
  0x38   :  { %214 = vmatmul.mubr.f32.gmra.mrb[10].mxu0 %v41_v20 }
  0x39   :  { %218 = vmatprep.mubr.f32.mxu0 %v45_v21 }
  0x3c   :  { %219 = vmatmul.mubr.f32.gmra.mrb[12].mxu0 %v44_v22 }
  0x3d   :  { %223 = vmatprep.mubr.f32.mxu0 %v48_v23 }
  0x40   :  { %224 = vmatmul.mubr.f32.gmra.mrb[14].mxu0 %v47_v24 }
  0x41   :  { %228 = vmatprep.mubr.f32.mxu0 %v51_v25 }
  0x44   :  { %229 = vmatmul.mubr.f32.gmra.mrb[16].mxu0 %v50_v26 }
  0x45   :  { %940 = vmatprep.mubr.msk.f32.mxu0 %vm1061_vm0, %v1062_v4 }
  0xe4   :  { %v300_v33 = vpop.f32.mrb[0].mxu1 }
  0xe5   :  { %v872_v34 = vpop.f32.mrb[1].mxu1 }
  0xe8   :  { %v305_v35 = vpop.f32.mrb[2].mxu1 }
  0xe9   :  { %v875_v36 = vpop.f32.mrb[3].mxu1 }
  0xec   :  { %v310_v37 = vpop.f32.mrb[4].mxu1 }
  0xed   :  { %v878_v38 = vpop.f32.mrb[5].mxu1 }
  0xf0   :  { %v315_v39 = vpop.f32.mrb[6].mxu1 }
  0xf1   :  { %v881_v40 = vpop.f32.mrb[7].mxu1 }
  0xf4   :  { %v320_v45 = vpop.f32.mrb[8].mxu1 }
  0xf5   :  { %v884_v46 = vpop.f32.mrb[9].mxu1 }
  0xf7   :  { %v796_v41 = vpop.f32.mrb[0].mxu0 }
  0xf8   :  { %v797_v42 = vpop.f32.mrb[1].mxu0  ;;  %v325_v52 = vpop.f32.mrb[10].mxu1 }
  0xf9   :  { %v798_v44 = vadd.f32 %v797_v42, %v796_v41  ;;  %v887_v53 = vpop.f32.mrb[11].mxu1 }
  0xfb   :  { %v799_v47 = vpop.f32.mrb[2].mxu0  ;;  %v191_v48 = vadd.f32 %v798_v44, %v1357_v43  ;;  %v735_v44 = vld [vmem:[%s1466_s4] ss:$0 sm:$0xff] }
  0xfc   :  { %v800_v49 = vpop.f32.mrb[3].mxu0  ;;  %v330_v60 = vpop.f32.mrb[12].mxu1 }
  0xfd   :  { %v301_v50 = vadd.f32 %v300_v33, %v191_v48  ;;  %v801_v51 = vadd.f32 %v800_v49, %v799_v47  ;;  %v890_v61 = vpop.f32.mrb[13].mxu1 }
  0xff   :  { %v344_v54 = vmax.f32 %v301_v50, 0.0  ;;  %v802_v55 = vpop.f32.mrb[4].mxu0  ;;  %v196_v56 = vadd.f32 %v801_v51, %v1357_v43 }
 0x100   :  { %v803_v57 = vpop.f32.mrb[5].mxu0  ;;  %v335_v6 = vpop.f32.mrb[14].mxu1 }
 0x101   :  { %v306_v58 = vadd.f32 %v305_v35, %v196_v56  ;;  %v804_v59 = vadd.f32 %v803_v57, %v802_v55  ;;  %906 = vmatmul.mubr.msk.f32.vlgmr.msra.gmra.mrb[18].mxu1 %vm96_vm1, %v344_v54  ;;  %v893_v7 = vpop.f32.mrb[15].mxu1 }
 0x102   :  { %908 = vmatprep.mubr.msk.f32.mxu1 %vm1061_vm0, %v1062_v4  ;;  %1019 = vmatpush3.bf16.msra.mxu1 %v1012_v30 }
 0x103   :  { %v345_v62 = vmax.f32 %v306_v58, 0.0  ;;  %v805_v63 = vpop.f32.mrb[6].mxu0  ;;  %v201_v0 = vadd.f32 %v804_v59, %v1357_v43  ;;  %1018 = vmatprep.subr.bf16.mxu1 %v1060_v3 }
 0x104   :  { %v806_v1 = vpop.f32.mrb[7].mxu0  ;;  %v340_v3 = vpop.f32.mrb[16].mxu1 }
 0x105   :  { %v311_v2 = vadd.f32 %v310_v37, %v201_v0  ;;  %v807_v5 = vadd.f32 %v806_v1, %v805_v63  ;;  %909 = vmatmul.mubr.msk.f32.gmra.mrb[20].mxu1 %vm96_vm1, %v345_v62  ;;  %v896_v14 = vpop.f32.mrb[17].mxu1 }
 0x106   :  { %911 = vmatprep.mubr.msk.f32.mxu1 %vm1061_vm0, %v1062_v4  ;;  %1020 = vmatpush3.bf16.msra.mxu1 %v1015_v32 }
 0x107   :  { %v346_v8 = vmax.f32 %v311_v2, 0.0  ;;  %v808_v9 = vpop.f32.mrb[8].mxu0  ;;  %v206_v10 = vadd.f32 %v807_v5, %v1357_v43 }
 0x108   :  { %v809_v11 = vpop.f32.mrb[9].mxu0 }
 0x109   :  { %v316_v12 = vadd.f32 %v315_v39, %v206_v10  ;;  %v810_v13 = vadd.f32 %v809_v11, %v808_v9  ;;  %912 = vmatmul.mubr.msk.f32.gmra.mrb[22].mxu1 %vm96_vm1, %v346_v8 }
 0x10a   :  { %914 = vmatprep.mubr.msk.f32.mxu1 %vm1061_vm0, %v1062_v4 }
 0x10b   :  { %v347_v15 = vmax.f32 %v316_v12, 0.0  ;;  %v811_v16 = vpop.f32.mrb[10].mxu0  ;;  %v211_v17 = vadd.f32 %v810_v13, %v1357_v43 }
 0x10c   :  { %v812_v18 = vpop.f32.mrb[11].mxu0 }
 0x10d   :  { %v321_v19 = vadd.f32 %v320_v45, %v211_v17  ;;  %v813_v20 = vadd.f32 %v812_v18, %v811_v16  ;;  %915 = vmatmul.mubr.msk.f32.gmra.mrb[24].mxu1 %vm96_vm1, %v347_v15  ;;  %v745_v17 = vld [vmem:[%s1467_s6] ss:$0 sm:$0xff] }
 0x10e   :  { %917 = vmatprep.mubr.msk.f32.mxu1 %vm1061_vm0, %v1062_v4 }
 0x10f   :  { %v348_v21 = vmax.f32 %v321_v19, 0.0  ;;  %v814_v22 = vpop.f32.mrb[12].mxu0  ;;  %v216_v23 = vadd.f32 %v813_v20, %v1357_v43 }
 0x110   :  { %v815_v24 = vpop.f32.mrb[13].mxu0 }
 0x111   :  { %v326_v25 = vadd.f32 %v325_v52, %v216_v23  ;;  %v816_v26 = vadd.f32 %v815_v24, %v814_v22  ;;  %918 = vmatmul.mubr.msk.f32.gmra.mrb[26].mxu1 %vm96_vm1, %v348_v21 }
 0x112   :  { %920 = vmatprep.mubr.msk.f32.mxu1 %vm1061_vm0, %v1062_v4 }
 0x113   :  { %v349_v27 = vmax.f32 %v326_v25, 0.0  ;;  %v817_v28 = vpop.f32.mrb[14].mxu0  ;;  %v221_v29 = vadd.f32 %v816_v26, %v1357_v43 }
 0x114   :  { %v818_v30 = vpop.f32.mrb[15].mxu0 }
 0x115   :  { %v331_v31 = vadd.f32 %v330_v60, %v221_v29  ;;  %v819_v32 = vadd.f32 %v818_v30, %v817_v28  ;;  %921 = vmatmul.mubr.msk.f32.gmra.mrb[28].mxu1 %vm96_vm1, %v349_v27 }
 0x116   :  { %923 = vmatprep.mubr.msk.f32.mxu1 %vm1061_vm0, %v1062_v4 }
 0x117   :  { %v350_v33 = vmax.f32 %v331_v31, 0.0  ;;  %v820_v34 = vpop.f32.mrb[16].mxu0  ;;  %v226_v35 = vadd.f32 %v819_v32, %v1357_v43 }
 0x118   :  { %v821_v36 = vpop.f32.mrb[17].mxu0 }
 0x119   :  { %v336_v37 = vadd.f32 %v335_v6, %v226_v35  ;;  %v822_v38 = vadd.f32 %v821_v36, %v820_v34  ;;  %924 = vmatmul.mubr.msk.f32.gmra.mrb[30].mxu1 %vm96_vm1, %v350_v33 }
 0x11a   :  { %926 = vmatprep.mubr.msk.f32.mxu1 %vm1061_vm0, %v1062_v4 }
 0x11b   :  { %v351_v39 = vmax.f32 %v336_v37, 0.0  ;;  %v231_v40 = vadd.f32 %v822_v38, %v1357_v43 }
 0x11d   :  { %v341_v41 = vadd.f32 %v340_v3, %v231_v40  ;;  %927 = vmatmul.mubr.msk.f32.gmra.mrb[32].mxu1 %vm96_vm1, %v351_v39 }
 0x11e   :  { %929 = vmatprep.mubr.msk.f32.mxu1 %vm1061_vm0, %v1062_v4 }
 0x11f   :  { %v352_v42 = vmax.f32 %v341_v41, 0.0 }
 0x121   :  { %930 = vmatmul.mubr.msk.f32.gmra.mrb[34].mxu1 %vm96_vm1, %v352_v42 }
 0x122   :  { %958 = vmatprep.mubr.msk.f32.mxu1 %vm1061_vm0, %v1062_v4 }
 0x1d4   :  { %v457_v45 = vpop.f32.mrb[18].mxu1 }
 0x1d5   :  { %v458_v46 = vadd.f32 %v735_v44, %v457_v45  ;;  %v907_v47 = vpop.f32.mrb[19].mxu1 }
 0x1d7   :  { %v501_v43 = vmax.f32 %v458_v46, 0.0 }
 0x1d8   :  { %v462_v48 = vpop.f32.mrb[20].mxu1 }
 0x1d9   :  { %v463_v49 = vadd.f32 %v735_v44, %v462_v48  ;;  %v910_v50 = vpop.f32.mrb[21].mxu1  ;;  %941 = vmatmul.mubr.msk.f32.vlgmr.msra.gmra.mrb[18].mxu0 %vm96_vm1, %v501_v43 }
 0x1da   :  { %943 = vmatprep.mubr.msk.f32.mxu0 %vm1061_vm0, %v1062_v4 }
 0x1db   :  { %v502_v51 = vmax.f32 %v463_v49, 0.0 }
 0x1dc   :  { %v467_v52 = vpop.f32.mrb[22].mxu1 }
 0x1dd   :  { %v468_v53 = vadd.f32 %v735_v44, %v467_v52  ;;  %v913_v54 = vpop.f32.mrb[23].mxu1  ;;  %944 = vmatmul.mubr.msk.f32.gmra.mrb[20].mxu0 %vm96_vm1, %v502_v51 }
 0x1de   :  { %946 = vmatprep.mubr.msk.f32.mxu0 %vm1061_vm0, %v1062_v4 }
 0x1df   :  { %v503_v55 = vmax.f32 %v468_v53, 0.0 }
 0x1e0   :  { %v472_v56 = vpop.f32.mrb[24].mxu1 }
 0x1e1   :  { %v473_v57 = vadd.f32 %v735_v44, %v472_v56  ;;  %v916_v58 = vpop.f32.mrb[25].mxu1  ;;  %947 = vmatmul.mubr.msk.f32.gmra.mrb[22].mxu0 %vm96_vm1, %v503_v55 }
 0x1e2   :  { %949 = vmatprep.mubr.msk.f32.mxu0 %vm1061_vm0, %v1062_v4 }
 0x1e3   :  { %v504_v59 = vmax.f32 %v473_v57, 0.0 }
 0x1e4   :  { %v477_v60 = vpop.f32.mrb[26].mxu1 }
 0x1e5   :  { %v478_v61 = vadd.f32 %v735_v44, %v477_v60  ;;  %v919_v62 = vpop.f32.mrb[27].mxu1  ;;  %950 = vmatmul.mubr.msk.f32.gmra.mrb[24].mxu0 %vm96_vm1, %v504_v59 }
 0x1e6   :  { %952 = vmatprep.mubr.msk.f32.mxu0 %vm1061_vm0, %v1062_v4 }
 0x1e7   :  { %v505_v63 = vmax.f32 %v478_v61, 0.0 }
 0x1e8   :  { %v482_v0 = vpop.f32.mrb[28].mxu1 }
 0x1e9   :  { %v483_v1 = vadd.f32 %v735_v44, %v482_v0  ;;  %v922_v2 = vpop.f32.mrb[29].mxu1  ;;  %953 = vmatmul.mubr.msk.f32.gmra.mrb[26].mxu0 %vm96_vm1, %v505_v63 }
 0x1ea   :  { %955 = vmatprep.mubr.msk.f32.mxu0 %vm1061_vm0, %v1062_v4 }
 0x1eb   :  { %v506_v5 = vmax.f32 %v483_v1, 0.0 }
 0x1ec   :  { %v487_v6 = vpop.f32.mrb[30].mxu1 }
 0x1ed   :  { %v488_v7 = vadd.f32 %v735_v44, %v487_v6  ;;  %v925_v8 = vpop.f32.mrb[31].mxu1  ;;  %956 = vmatmul.mubr.msk.f32.gmra.mrb[28].mxu0 %vm96_vm1, %v506_v5 }
 0x1ef   :  { %v507_v9 = vmax.f32 %v488_v7, 0.0 }
 0x1f0   :  { %v492_v10 = vpop.f32.mrb[32].mxu1 }
 0x1f1   :  { %v493_v11 = vadd.f32 %v735_v44, %v492_v10  ;;  %v928_v12 = vpop.f32.mrb[33].mxu1  ;;  %959 = vmatmul.mubr.msk.f32.vlgmr.msra.gmra.mrb[36].mxu1 %vm96_vm1, %v507_v9 }
 0x1f2   :  { %961 = vmatprep.mubr.msk.f32.mxu1 %vm1061_vm0, %v1062_v4 }
 0x1f3   :  { %v508_v13 = vmax.f32 %v493_v11, 0.0 }
 0x1f4   :  { %v497_v3 = vpop.f32.mrb[34].mxu1 }
 0x1f5   :  { %v498_v14 = vadd.f32 %v735_v44, %v497_v3  ;;  %v931_v15 = vpop.f32.mrb[35].mxu1  ;;  %962 = vmatmul.mubr.msk.f32.gmra.mrb[38].mxu1 %vm96_vm1, %v508_v13 }
 0x1f6   :  { %964 = vmatprep.mubr.msk.f32.mxu1 %vm1061_vm0, %v1062_v4 }
 0x1f7   :  { %v509_v16 = vmax.f32 %v498_v14, 0.0 }
 0x1f9   :  { %965 = vmatmul.mubr.msk.f32.gmra.mrb[40].mxu1 %vm96_vm1, %v509_v16 }
 0x2ac   :  { %v614_v18 = vpop.f32.mrb[18].mxu0 }
 0x2ad   :  { %v615_v19 = vadd.f32 %v745_v17, %v614_v18  ;;  %v942_v20 = vpop.f32.mrb[19].mxu0 }
 0x2af   :  { %v755_v21 = vmul.f32 -1.442695, %v615_v19 }
 0x2b0   :  { %v619_v22 = vpop.f32.mrb[20].mxu0 }
 0x2b1   :  { %1024 = vpow2.f32 %v755_v21  ;;  %v620_v23 = vadd.f32 %v745_v17, %v619_v22  ;;  %v945_v24 = vpop.f32.mrb[21].mxu0 }
 0x2b3   :  { %v756_v25 = vmul.f32 -1.442695, %v620_v23 }
 0x2b4   :  { %v624_v26 = vpop.f32.mrb[22].mxu0 }
 0x2b5   :  { %1026 = vpow2.f32 %v756_v25  ;;  %v625_v27 = vadd.f32 %v745_v17, %v624_v26  ;;  %v948_v4 = vpop.f32.mrb[23].mxu0 }
 0x2b7   :  { %v757_v28 = vmul.f32 -1.442695, %v625_v27 }
 0x2b8   :  { %v629_v29 = vpop.f32.mrb[24].mxu0 }
 0x2b9   :  { %1028 = vpow2.f32 %v757_v28  ;;  %v630_v30 = vadd.f32 %v745_v17, %v629_v29  ;;  %v951_v31 = vpop.f32.mrb[25].mxu0 }
 0x2bb   :  { %v1025_v32 = vpop.eup %1024  ;;  %v758_v33 = vmul.f32 -1.442695, %v630_v30 }
 0x2bc   :  { %v685_v34 = vadd.f32 1.0, %v1025_v32  ;;  %v634_v35 = vpop.f32.mrb[26].mxu0 }
 0x2bd   :  { %1030 = vpow2.f32 %v758_v33  ;;  %v635_v36 = vadd.f32 %v745_v17, %v634_v35  ;;  %v954_v37 = vpop.f32.mrb[27].mxu0 }
 0x2be   :  { %1032 = vrcp.f32 %v685_v34 }
 0x2bf   :  { %v1027_v38 = vpop.eup %1026  ;;  %v759_v39 = vmul.f32 -1.442695, %v635_v36 }
 0x2c0   :  { %v686_v40 = vadd.f32 1.0, %v1027_v38  ;;  %v639_v41 = vpop.f32.mrb[28].mxu0 }
 0x2c1   :  { %1034 = vpow2.f32 %v759_v39  ;;  %v640_v42 = vadd.f32 %v745_v17, %v639_v41  ;;  %v957_v44 = vpop.f32.mrb[29].mxu0 }
 0x2c2   :  { %1036 = vrcp.f32 %v686_v40 }
 0x2c3   :  { %v1029_v45 = vpop.eup %1028  ;;  %v760_v46 = vmul.f32 -1.442695, %v640_v42 }
 0x2c4   :  { %v687_v47 = vadd.f32 1.0, %v1029_v45  ;;  %v644_v43 = vpop.f32.mrb[36].mxu1 }
 0x2c5   :  { %1038 = vpow2.f32 %v760_v46  ;;  %v645_v48 = vadd.f32 %v745_v17, %v644_v43  ;;  %v960_v49 = vpop.f32.mrb[37].mxu1 }
 0x2c6   :  { %1040 = vrcp.f32 %v687_v47 }
 0x2c7   :  { %v1031_v50 = vpop.eup %1030  ;;  %v761_v51 = vmul.f32 -1.442695, %v645_v48 }
 0x2c8   :  { %v1033_v52 = vpop.eup %1032  ;;  %v688_v53 = vadd.f32 1.0, %v1031_v50  ;;  %v649_v54 = vpop.f32.mrb[38].mxu1 }
 0x2c9   :  { %712 = vst.msk [vmem:[%s1468_s7] sm:$0xff] %vm96_vm1, %v1033_v52  ;;  %1042 = vpow2.f32 %v761_v51  ;;  %v650_v55 = vadd.f32 %v745_v17, %v649_v54  ;;  %v963_v56 = vpop.f32.mrb[39].mxu1 }
 0x2ca   :  { %1044 = vrcp.f32 %v688_v53 }
 0x2cb   :  { %v1035_v57 = vpop.eup %1034  ;;  %v762_v58 = vmul.f32 -1.442695, %v650_v55 }
 0x2cc   :  { %v1037_v59 = vpop.eup %1036  ;;  %v689_v60 = vadd.f32 1.0, %v1035_v57  ;;  %v654_v61 = vpop.f32.mrb[40].mxu1 }
 0x2cd   :  { %713 = vst.msk [vmem:[%s1468_s7 + $0x8] sm:$0xff] %vm96_vm1, %v1037_v59  ;;  %1046 = vpow2.f32 %v762_v58  ;;  %v655_v62 = vadd.f32 %v745_v17, %v654_v61  ;;  %v966_v63 = vpop.f32.mrb[41].mxu1 }
 0x2ce   :  { %1048 = vrcp.f32 %v689_v60 }
 0x2cf   :  { %v1039_v0 = vpop.eup %1038  ;;  %v763_v1 = vmul.f32 -1.442695, %v655_v62 }
 0x2d0   :  { %v1041_v2 = vpop.eup %1040  ;;  %v690_v5 = vadd.f32 1.0, %v1039_v0 }
 0x2d1   :  { %714 = vst.msk [vmem:[%s1468_s7 + $0x10] sm:$0xff] %vm96_vm1, %v1041_v2  ;;  %1050 = vpow2.f32 %v763_v1 }
 0x2d2   :  { %1052 = vrcp.f32 %v690_v5 }
 0x2d3   :  { %v1043_v6 = vpop.eup %1042 }
 0x2d4   :  { %v1045_v7 = vpop.eup %1044  ;;  %v691_v8 = vadd.f32 1.0, %v1043_v6 }
 0x2d5   :  { %715 = vst.msk [vmem:[%s1468_s7 + $0x18] sm:$0xff] %vm96_vm1, %v1045_v7 }
 0x2d6   :  { %1054 = vrcp.f32 %v691_v8 }
 0x2d7   :  { %v1047_v9 = vpop.eup %1046 }
 0x2d8   :  { %v1049_v10 = vpop.eup %1048  ;;  %v692_v11 = vadd.f32 1.0, %v1047_v9 }
 0x2d9   :  { %716 = vst.msk [vmem:[%s1468_s7 + $0x20] sm:$0xff] %vm96_vm1, %v1049_v10 }
 0x2da   :  { %1056 = vrcp.f32 %v692_v11 }
 0x2db   :  { %v1051_v12 = vpop.eup %1050 }
 0x2dc   :  { %v1053_v13 = vpop.eup %1052  ;;  %v693_v3 = vadd.f32 1.0, %v1051_v12 }
 0x2dd   :  { %717 = vst.msk [vmem:[%s1468_s7 + $0x28] sm:$0xff] %vm96_vm1, %v1053_v13 }
 0x2de   :  { %1058 = vrcp.f32 %v693_v3 }
 0x2e0   :  { %v1055_v14 = vpop.eup %1054 }
 0x2e1   :  { %718 = vst.msk [vmem:[%s1468_s7 + $0x30] sm:$0xff] %vm96_vm1, %v1055_v14 }
 0x2e4   :  { %v1057_v15 = vpop.eup %1056 }
 0x2e5   :  { %719 = vst.msk [vmem:[%s1468_s7 + $0x38] sm:$0xff] %vm96_vm1, %v1057_v15 }
 0x2e8   :  { %v1059_v16 = vpop.eup %1058 }
 0x2e9   :  { %720 = vst.msk [vmem:[%s1468_s7 + $0x40] sm:$0xff] %vm96_vm1, %v1059_v16 }

// kernel: squeeze.1
= control target key start
LH: loop header
LB: loop body
LE: loop exit
PB: predicated region body
PF: predicated region fallthrough
CT: control target
= control target key end

     0   :  { %vm7_vm0 = vcmask 261120   ;;  %s51_s8 = smov 96   ;;  %s52_s9 = smov 64   ;;  %s79_s0 = inlined_call_operand.vmem [shape: f32[288], index: 0, kind: input, shape index: {}]   ;;  %s80_s1 = inlined_call_operand.vmem [shape: f32[1,3,3,32], index: 1, kind: output, shape index: {}]  }
   0x1   :  { %v4_v0 = vld [vmem:[%s79_s0] sm:$0xf]  ;;  %s50_s0 = smov 32  }
   0x2   :  { %5 = vst [vmem:[#allocation1] sm:$0xf] %v4_v0 }
   0x9   :  { %v21_v1 = vld [vmem:[#allocation1] sm:$0x3]  }
   0xa   :  { %v9_v2 = vld [vmem:[#allocation1] sm:$0x3]   ;;  %22 = vrot.lane.b32.xlu1 %v21_v1, %s50_s0 }
   0xb   :  { %10 = vrot.lane.b32.xlu0 %v9_v2, %s51_s8  ;;  %v6_v3 = vld [vmem:[#allocation1] sm:$0x7]  }
   0xc   :  { %v15_v4 = vld [vmem:[#allocation1] sm:$0x3]   ;;  %8 = vst.msk [vmem:[#allocation0] ss:$9 sm:$0x7] %vm7_vm0, %v6_v3  }
   0xf   :  { %16 = vrot.lane.b32.xlu0 %v15_v4, %s52_s9 }
  0x7c   :  { %v23_v5 = vpop.permute.xlu1 %22  }
  0x7d   :  { %v11_v6 = vpop.permute.xlu0 %10   ;;  %26 = vst.msk [vmem:[#allocation0 + $0x8] ss:$9 sm:$0x3] %vm7_vm0, %v23_v5  }
  0x7e   :  { %14 = vst.msk [vmem:[#allocation0 + $0x1] ss:$9 sm:$0x3] %vm7_vm0, %v11_v6  }
  0x81   :  { %v17_v7 = vpop.permute.xlu0 %16  }
  0x82   :  { %20 = vst.msk [vmem:[#allocation0 + $0x2] ss:$14 sm:$0x3] %vm7_vm0, %v17_v7  }
  0x85   :  { %v34_v8 = vld [vmem:[#allocation0 + $0x8] sm:$0xf] }
  0x86   :  { %45 = vst [vmem:[%s80_s1 + $0x4] sm:$0xf] %v34_v8 }
  0x89   :  { %v30_v9 = vld [vmem:[#allocation0] sm:$0xf]  ;;  %v39_v10 = vld [vmem:[#allocation0 + $0x10] sm:$0xf] }
  0x8a   :  { %32 = vst [vmem:[%s80_s1] sm:$0xf] %v30_v9  ;;  %46 = vst [vmem:[%s80_s1 + $0x8] sm:$0xf] %v39_v10 }

// kernel: dwablock_forward.5
= control target key start
LH: loop header
LB: loop body
LE: loop exit
PB: predicated region body
PF: predicated region fallthrough
CT: control target
= control target key end

     0   :  { %vm75_vm0 = vcmask 261120   ;;  %vm432_vm1 = vcmask 785408   ;;  %s814_s1 = inlined_call_operand.vmem [shape: f32[288,32], index: 1, kind: input, shape index: {}]   ;;  %s815_s0 = inlined_call_operand.vmem [shape: f32[16,288], index: 0, kind: input, shape index: {}]   ;;  %s816_s3 = inlined_call_operand.vmem [shape: f32[32,32], index: 3, kind: input, shape index: {}]   ;;  %s817_s5 = inlined_call_operand.vmem [shape: f32[32,96], index: 5, kind: input, shape index: {}]   ;;  %s818_s2 = inlined_call_operand.vmem [shape: f32[1,32], index: 2, kind: input, shape index: {}]   ;;  %s819_s4 = inlined_call_operand.vmem [shape: f32[1,32], index: 4, kind: input, shape index: {}]   ;;  %s820_s6 = inlined_call_operand.vmem [shape: f32[1,96], index: 6, kind: input, shape index: {}]   ;;  %s821_s7 = inlined_call_operand.vmem [shape: f32[16,96], index: 7, kind: output, shape index: {}]  }
   0x1   :  { %v48_v0 = vld [vmem:[%s814_s1 + $0x80] sm:$0xff]  ;;  %v49_v1 = vld [vmem:[%s814_s1 + $0x88] sm:$0xff]  ;;  %v50_v5 = vld [vmem:[%s814_s1 + $0x90] sm:$0xff] }
   0x2   :  { %v32_v2 = vld [vmem:[%s814_s1] sm:$0xff]  ;;  %v539_v3 = vpack.c.bf16 %v49_v1, %v48_v0  ;;  %v33_v4 = vld [vmem:[%s814_s1 + $0x8] sm:$0xff]  ;;  %v51_v6 = vld [vmem:[%s814_s1 + $0x98] sm:$0xff] }
   0x3   :  { %v541_v7 = vpack.c.bf16 %v33_v4, %v32_v2  ;;  %v543_v8 = vpack.c.bf16 %v51_v6, %v50_v5  ;;  %v34_v9 = vld [vmem:[%s814_s1 + $0x10] sm:$0xff]  ;;  %v35_v10 = vld [vmem:[%s814_s1 + $0x18] sm:$0xff]  ;;  %v52_v11 = vld [vmem:[%s814_s1 + $0xa0] sm:$0xff] }
   0x4   :  { %540 = vmatprep.subr.bf16.mxu0 %v539_v3  ;;  %v53_v12 = vld [vmem:[%s814_s1 + $0xa8] sm:$0xff]  ;;  %v545_v13 = vpack.c.bf16 %v35_v10, %v34_v9  ;;  %v36_v15 = vld [vmem:[%s814_s1 + $0x20] sm:$0xff]  ;;  %v54_v17 = vld [vmem:[%s814_s1 + $0xb0] sm:$0xff] }
   0x5   :  { %542 = vmatpush3.bf16.msra.mxu0 %v541_v7  ;;  %v547_v14 = vpack.c.bf16 %v53_v12, %v52_v11  ;;  %v37_v16 = vld [vmem:[%s814_s1 + $0x28] sm:$0xff]  ;;  %v55_v18 = vld [vmem:[%s814_s1 + $0xb8] sm:$0xff]  ;;  %v38_v21 = vld [vmem:[%s814_s1 + $0x30] sm:$0xff] }
   0x6   :  { %544 = vmatprep.subr.bf16.mxu0 %v543_v8  ;;  %v549_v19 = vpack.c.bf16 %v37_v16, %v36_v15  ;;  %v551_v20 = vpack.c.bf16 %v55_v18, %v54_v17  ;;  %v39_v22 = vld [vmem:[%s814_s1 + $0x38] sm:$0xff]  ;;  %v56_v23 = vld [vmem:[%s814_s1 + $0xc0] sm:$0xff]  ;;  %v57_v24 = vld [vmem:[%s814_s1 + $0xc8] sm:$0xff] }
   0x7   :  { %v64_v25 = vld [vmem:[%s814_s1 + $0x100] sm:$0xff]  ;;  %v65_v26 = vld [vmem:[%s814_s1 + $0x108] sm:$0xff]  ;;  %v553_v29 = vpack.c.bf16 %v39_v22, %v38_v21  ;;  %v66_v30 = vld [vmem:[%s814_s1 + $0x110] sm:$0xff]  ;;  %v555_v32 = vpack.c.bf16 %v57_v24, %v56_v23 }
   0x8   :  { %v571_v27 = vpack.c.bf16 %v65_v26, %v64_v25  ;;  %v27_v28 = vld [vmem:[%s815_s0 + $0x8] sm:$0xff]  ;;  %v67_v31 = vld [vmem:[%s814_s1 + $0x118] sm:$0xff]  ;;  %v40_v33 = vld [vmem:[%s814_s1 + $0x40] sm:$0xff] }
   0x9   :  { %546 = vmatpush3.bf16.msra.mxu0 %v545_v13  ;;  %146 = vmatprep.mubr.f32.mxu0 %v27_v28  ;;  %v41_v34 = vld [vmem:[%s814_s1 + $0x48] sm:$0xff]  ;;  %v575_v35 = vpack.c.bf16 %v67_v31, %v66_v30  ;;  %v28_v36 = vld [vmem:[%s815_s0 + $0x10] sm:$0xff]  ;;  %v59_v38 = vld [vmem:[%s814_s1 + $0xd8] sm:$0xff] }
   0xa   :  { %548 = vmatprep.subr.bf16.mxu0 %v547_v14  ;;  %572 = vmatprep.subr.bf16.mxu1 %v571_v27  ;;  %v58_v37 = vld [vmem:[%s814_s1 + $0xd0] sm:$0xff]  ;;  %v557_v39 = vpack.c.bf16 %v41_v34, %v40_v33  ;;  %v43_v42 = vld [vmem:[%s814_s1 + $0x58] sm:$0xff]  ;;  %v60_v43 = vld [vmem:[%s814_s1 + $0xe0] sm:$0xff] }
   0xb   :  { %574 = vmatpush3.bf16.msra.mxu1 %v571_v27  ;;  %514 = vmatprep.mubr.msk.f32.mxu1 %vm75_vm0, %v28_v36  ;;  %v559_v40 = vpack.c.bf16 %v59_v38, %v58_v37  ;;  %v42_v41 = vld [vmem:[%s814_s1 + $0x50] sm:$0xff]  ;;  %v61_v44 = vld [vmem:[%s814_s1 + $0xe8] sm:$0xff]  ;;  %v44_v48 = vld [vmem:[%s814_s1 + $0x60] sm:$0xff] }
   0xc   :  { %576 = vmatprep.subr.bf16.mxu1 %v575_v35  ;;  %v31_v45 = vld [vmem:[%s815_s0 + $0x28] sm:$0xff]  ;;  %v561_v46 = vpack.c.bf16 %v43_v42, %v42_v41  ;;  %v563_v47 = vpack.c.bf16 %v61_v44, %v60_v43  ;;  %v62_v50 = vld [vmem:[%s814_s1 + $0xf0] sm:$0xff]  ;;  %v63_v51 = vld [vmem:[%s814_s1 + $0xf8] sm:$0xff] }
   0xd   :  { %550 = vmatpush3.bf16.msra.mxu0 %v549_v19  ;;  %v45_v49 = vld [vmem:[%s814_s1 + $0x68] sm:$0xff]  ;;  %v567_v53 = vpack.c.bf16 %v63_v51, %v62_v50  ;;  %v46_v54 = vld [vmem:[%s814_s1 + $0x70] sm:$0xff]  ;;  %v47_v55 = vld [vmem:[%s814_s1 + $0x78] sm:$0xff] }
   0xe   :  { %552 = vmatprep.subr.bf16.mxu0 %v551_v20  ;;  %v565_v52 = vpack.c.bf16 %v45_v49, %v44_v48  ;;  %v569_v56 = vpack.c.bf16 %v47_v55, %v46_v54  ;;  %v26_v57 = vld [vmem:[%s815_s0] sm:$0xff]  ;;  %v29_v59 = vld [vmem:[%s815_s0 + $0x18] sm:$0xff]  ;;  %v235_v61 = vld [vmem:[%s816_s3 + $0x8] sm:$0xff] }
   0xf   :  { %578 = vmatpush3.bf16.msra.mxu1 %v575_v35  ;;  %v30_v58 = vld [vmem:[%s815_s0 + $0x20] sm:$0xff]  ;;  %v236_v63 = vld [vmem:[%s816_s3 + $0x10] sm:$0xff]  ;;  %v237_v0 = vld [vmem:[%s816_s3 + $0x18] sm:$0xff] }
  0x10   :  { %v234_v60 = vld [vmem:[%s816_s3] sm:$0xff]  ;;  %v583_v1 = vpack.c.bf16 %v237_v0, %v236_v63  ;;  %v329_v3 = vld [vmem:[%s817_s5 + $0x8] sm:$0xff]  ;;  %v330_v20 = vld [vmem:[%s817_s5 + $0x10] sm:$0xff] }
  0x11   :  { %554 = vmatpush3.bf16.msra.mxu0 %v553_v29  ;;  %v579_v62 = vpack.c.bf16 %v235_v61, %v234_v60  ;;  %v328_v2 = vld [vmem:[%s817_s5] sm:$0xff]  ;;  %v331_v21 = vld [vmem:[%s817_s5 + $0x18] sm:$0xff] }
  0x12   :  { %556 = vmatprep.subr.bf16.mxu0 %v555_v32  ;;  %515 = vmatmul.mubr.msk.f32.vlgmr.msra.gmra.mrb[0].mxu1 %vm75_vm0, %v31_v45  ;;  %v587_v4 = vpack.c.bf16 %v329_v3, %v328_v2  ;;  %v439_v9 = vld [vmem:[%s818_s2] ss:$0 sm:$0xff]  ;;  %v591_v22 = vpack.c.bf16 %v331_v21, %v330_v20 }
  0x13   :  { %580 = vmatprep.subr.bf16.mxu1 %v579_v62  ;;  %v442_v23 = vld [vmem:[%s819_s4] ss:$0 sm:$0xff] }
  0x14   :  { %582 = vmatpush3.bf16.msra.mxu1 %v579_v62  ;;  %v445_v30 = vld [vmem:[%s820_s6] ss:$0 sm:$0xff] }
  0x15   :  { %558 = vmatpush3.bf16.msra.mxu0 %v557_v39  ;;  %584 = vmatprep.subr.bf16.mxu1 %v583_v1 }
  0x16   :  { %560 = vmatprep.subr.bf16.mxu0 %v559_v40 }
  0x18   :  { %586 = vmatpush3.bf16.msra.mxu1 %v583_v1 }
  0x19   :  { %562 = vmatpush3.bf16.msra.mxu0 %v561_v46  ;;  %588 = vmatprep.subr.bf16.mxu1 %v587_v4 }
  0x1a   :  { %564 = vmatprep.subr.bf16.mxu0 %v563_v47 }
  0x1d   :  { %566 = vmatpush3.bf16.msra.mxu0 %v565_v52 }
  0x1e   :  { %568 = vmatprep.subr.bf16.mxu0 %v567_v53 }
  0x21   :  { %570 = vmatpush3.bf16.msra.mxu0 %v569_v56 }
  0x24   :  { %147 = vmatmul.mubr.f32.vlgmr.msra.gmra.mrb[0].mxu0 %v26_v57 }
  0x25   :  { %151 = vmatprep.mubr.f32.mxu0 %v30_v58 }
  0x28   :  { %152 = vmatmul.mubr.f32.gmra.mrb[2].mxu0 %v29_v59 }
  0xe5   :  { %v516_v5 = vpop.f32.mrb[0].mxu1 }
  0xe6   :  { %v223_v6 = vpop.f32.mrb[1].mxu1 }
  0xf7   :  { %v482_v7 = vpop.f32.mrb[0].mxu0 }
  0xf8   :  { %v483_v8 = vpop.f32.mrb[1].mxu0 }
  0xf9   :  { %v484_v10 = vadd.f32 %v483_v8, %v482_v7 }
  0xfb   :  { %v485_v11 = vpop.f32.mrb[2].mxu0  ;;  %v149_v12 = vadd.f32 %v484_v10, %v439_v9 }
  0xfc   :  { %v486_v13 = vpop.f32.mrb[3].mxu0 }
  0xfd   :  { %v487_v14 = vadd.f32 %v486_v13, %v485_v11  ;;  %v224_v15 = vadd.f32 %v223_v6, %v149_v12 }
  0xff   :  { %v154_v16 = vadd.f32 %v487_v14, %v439_v9  ;;  %v232_v17 = vmax.f32 %v224_v15, 0.0 }
 0x101   :  { %v229_v18 = vadd.f32 %v516_v5, %v154_v16  ;;  %525 = vmatprep.mubr.msk.f32.mxu1 %vm75_vm0, %v232_v17 }
 0x103   :  { %v233_v19 = vmax.f32 %v229_v18, 0.0 }
 0x105   :  { %526 = vmatmul.mubr.msk.f32.vlgmr.msra.gmra.mrb[2].mxu1 %vm75_vm0, %v233_v19 }
 0x106   :  { %590 = vmatpush3.bf16.msra.mxu1 %v587_v4 }
 0x107   :  { %592 = vmatprep.subr.bf16.mxu1 %v591_v22 }
 0x10a   :  { %594 = vmatpush3.bf16.msra.mxu1 %v591_v22 }
 0x1d8   :  { %v527_v24 = vpop.f32.mrb[2].mxu1 }
 0x1d9   :  { %v323_v25 = vadd.f32 %v527_v24, %v442_v23  ;;  %v317_v26 = vpop.f32.mrb[3].mxu1 }
 0x1da   :  { %v318_v27 = vadd.f32 %v442_v23, %v317_v26 }
 0x1db   :  { %v327_v29 = vmax.f32 %v323_v25, 0.0 }
 0x1dc   :  { %v326_v28 = vmax.f32 %v318_v27, 0.0 }
 0x1de   :  { %536 = vmatprep.mubr.msk.f32.mxu1 %vm75_vm0, %v326_v28 }
 0x1df   :  { %537 = vmatmul.mubr.msk.f32.vlgmr.msra.gmra.mrb[4].mxu1 %vm75_vm0, %v327_v29 }
 0x2b2   :  { %v538_v31 = vpop.f32.mrb[4].mxu1 }
 0x2b3   :  { %v417_v32 = vadd.f32 %v538_v31, %v445_v30  ;;  %v411_v33 = vpop.f32.mrb[5].mxu1 }
 0x2b4   :  { %v412_v34 = vadd.f32 %v445_v30, %v411_v33 }
 0x2b5   :  { %v449_v35 = vmul.f32 -1.442695, %v417_v32 }
 0x2b6   :  { %v448_v36 = vmul.f32 -1.442695, %v412_v34 }
 0x2b7   :  { %595 = vpow2.f32 %v449_v35 }
 0x2b8   :  { %597 = vpow2.f32 %v448_v36 }
 0x2c1   :  { %v596_v37 = vpop.eup %595 }
 0x2c2   :  { %v598_v38 = vpop.eup %597  ;;  %v427_v39 = vadd.f32 1.0, %v596_v37 }
 0x2c3   :  { %v426_v40 = vadd.f32 1.0, %v598_v38 }
 0x2c4   :  { %599 = vrcp.f32 %v427_v39 }
 0x2c5   :  { %601 = vrcp.f32 %v426_v40 }
 0x2ce   :  { %v600_v41 = vpop.eup %599 }
 0x2cf   :  { %v602_v42 = vpop.eup %601  ;;  %434 = vst.msk [vmem:[%s821_s7 + $0x8] sm:$0xff] %vm432_vm1, %v600_v41 }
 0x2d0   :  { %433 = vst.msk [vmem:[%s821_s7] sm:$0xff] %vm432_vm1, %v602_v42 }

// kernel: dwablock_forward.6
= control target key start
LH: loop header
LB: loop body
LE: loop exit
PB: predicated region body
PF: predicated region fallthrough
CT: control target
= control target key end

     0   :  { %vm81_vm0 = vcmask 31744   ;;  %vm169_vm2 = vcmask 72704   ;;  %vm173_vm3 = vcmask 65536   ;;  %vm199_vm4 = vcmask 1040384   ;;  %s2240_s28 = smov 8   ;;  %s2241_s7 = smov 12   ;;  %s2602_s1 = inlined_call_operand.vmem [shape: f32[8,9,4], index: 1, kind: input, shape index: {}]   ;;  %s2603_s0 = inlined_call_operand.vmem [shape: f32[8,9,4], index: 0, kind: input, shape index: {}]   ;;  %s2604_s2 = inlined_call_operand.vmem [shape: f32[8,9,4], index: 2, kind: input, shape index: {}]   ;;  %s2605_s3 = inlined_call_operand.vmem [shape: f32[32,32], index: 3, kind: input, shape index: {}]   ;;  %s2606_s4 = inlined_call_operand.vmem [shape: f32[9,32], index: 4, kind: output, shape index: {}]  }
   0x1   :  { %v49_v0 = vld [vmem:[%s2602_s1] sm:$0xff]  ;;  %v50_v1 = vld [vmem:[%s2602_s1 + $0x8] sm:$0x1]  ;;  %vm2279_vm1 = vmpackc.low %vm81_vm0, %vm81_vm0  ;;  %vm2238_vm5 = vmmov 1   ;;  %vm279_vm7 = vcmask 24576   ;;  %s2242_s8 = smov 16  }
   0x2   :  { %v2062_v3 = vpack.c.bf16 %v50_v1, %v49_v0  ;;  %v17_v4 = vld [vmem:[%s2603_s0] sm:$0xff]  ;;  %v18_v6 = vld [vmem:[%s2603_s0 + $0x8] sm:$0x1]  ;;  %vm2305_vm6 = vmpackc.low %vm199_vm4, %vm2238_vm5  ;;  %s2244_s9 = smov 24   ;;  %vm484_vm8 = vcmask 57376   ;;  %vm482_vm9 = vcmask 64544  }
   0x3   :  { %v33_v5 = vmul.f32 0.5, %v17_v4  ;;  %v34_v7 = vmul.f32 0.5, %v18_v6  ;;  %v65_v22 = vld [vmem:[%s2604_s2] sm:$0xff]  ;;  %v66_v23 = vld [vmem:[%s2604_s2 + $0x8] sm:$0x1]  ;;  %v51_v26 = vld [vmem:[%s2602_s1 + $0x10] sm:$0xff] }
   0x4   :  { %2064 = vmatprep.subr.msk.bf16.mxu0 %vm2279_vm1, %v2062_v3  ;;  %v2068_v24 = vpack.c.bf16 %v66_v23, %v65_v22  ;;  %v52_v27 = vld [vmem:[%s2602_s1 + $0x18] sm:$0x1]  ;;  %v53_v29 = vld [vmem:[%s2602_s1 + $0x20] sm:$0xff]  ;;  %v54_v30 = vld [vmem:[%s2602_s1 + $0x28] sm:$0x1]  ;;  %vm687_vm10 = vcmask 97344  }
   0x5   :  { %2067 = vmatpush3.bf16.xpose.msk.msra.mxu0 %vm2279_vm1, %v2062_v3  ;;  %1943 = vmatprep.mubr.msk.f32.mxu0 %vm81_vm0, %v33_v5  ;;  %v2074_v28 = vpack.c.bf16 %v52_v27, %v51_v26  ;;  %v2086_v31 = vpack.c.bf16 %v54_v30, %v53_v29  ;;  %v21_v32 = vld [vmem:[%s2603_s0 + $0x20] sm:$0xff]  ;;  %v22_v33 = vld [vmem:[%s2603_s0 + $0x28] sm:$0x1]  ;;  %v19_v40 = vld [vmem:[%s2603_s0 + $0x10] sm:$0xff]  ;;  %vm892_vm11 = vcmask 130144   ;;  %vm689_vm12 = vcmask 90176  }
   0x6   :  { %2070 = vmatprep.subr.msk.bf16.mxu1 %vm2305_vm6, %v2068_v24  ;;  %v37_v34 = vmul.f32 0.5, %v21_v32  ;;  %v38_v35 = vmul.f32 0.5, %v22_v33  ;;  %v35_v42 = vmul.f32 0.5, %v19_v40  ;;  %v20_v44 = vld [vmem:[%s2603_s0 + $0x18] sm:$0x1]  ;;  %vm1097_vm13 = vcmask 162944  }
   0x7   :  { %2073 = vmatpush3.bf16.msk.msra.mxu1 %vm2305_vm6, %v2068_v24  ;;  %2088 = vmatprep.subr.msk.bf16.mxu0 %vm2279_vm1, %v2086_v31  ;;  %v36_v45 = vmul.f32 0.5, %v20_v44  ;;  %v55_v24 = vld [vmem:[%s2602_s1 + $0x30] sm:$0xff]  ;;  %v56_v26 = vld [vmem:[%s2602_s1 + $0x38] sm:$0x1]  ;;  %vm894_vm14 = vcmask 122976   ;;  %vm1302_vm15 = vcmask 195744  }
   0x8   :  { %2076 = vmatprep.subr.msk.bf16.mxu1 %vm2279_vm1, %v2074_v28  ;;  %v2098_v30 = vpack.c.bf16 %v56_v26, %v55_v24  ;;  %vm1509_vm4 = vcmask 221376   ;;  %s2245_s18 = smov 28   ;;  %vm1712_vm5 = vcmask 261344  }
   0xc   :  { %1944 = vmatmul.mubr.msk.f32.vlgmr.msra.gmra.mrb[0].mxu0 %vm81_vm0, %v34_v7 }
   0xd   :  { %2091 = vmatpush3.bf16.xpose.msk.msra.mxu0 %vm2279_vm1, %v2086_v31  ;;  %1971 = vmatprep.mubr.msk.f32.mxu0 %vm81_vm0, %v37_v34  ;;  %v23_v31 = vld [vmem:[%s2603_s0 + $0x30] sm:$0xff] }
  0x14   :  { %1972 = vmatmul.mubr.msk.f32.vlgmr.msra.gmra.mrb[2].mxu0 %vm81_vm0, %v38_v35  ;;  %v39_v35 = vmul.f32 0.5, %v23_v31  ;;  %v60_v31 = vld [vmem:[%s2602_s1 + $0x58] sm:$0x1] }
  0xdf   :  { %v1945_v8 = vpop.f32.mrb[0].mxu0 }
  0xe0   :  { %v160_v9 = vpop.f32.mrb[1].mxu0  ;;  %v174_v11 = vsel %vm173_vm3, %v1945_v8, -inf }
  0xe1   :  { %v170_v10 = vsel %vm169_vm2, %v160_v9, -inf }
  0xe2   :  { %171 = vmax.xlane.f32.xlu0 %v170_v10 }
  0xe6   :  { %175 = vmax.xlane.f32.xlu0 %v174_v11 }
  0xe7   :  { %v1973_v46 = vpop.f32.mrb[2].mxu0 }
  0xe8   :  { %v564_v47 = vpop.f32.mrb[3].mxu0  ;;  %v576_v54 = vsel %vm173_vm3, %v1973_v46, -inf }
  0xe9   :  { %v573_v55 = vsel %vm169_vm2, %v564_v47, -inf }
 0x16f   :  { %v172_v12 = vpop.xlane.xlu0 %171 }
 0x170   :  { %v177_v13 = vsub.f32 %v160_v9, %v172_v12 }
 0x172   :  { %v179_v14 = vmul.f32 1.442695, %v177_v13  ;;  %v67_v13 = vld [vmem:[%s2604_s2 + $0x10] sm:$0xff] }
 0x173   :  { %v176_v15 = vpop.xlane.xlu0 %175 }
 0x174   :  { %2174 = vpow2.f32 %v179_v14  ;;  %v178_v16 = vsub.f32 %v1945_v8, %v176_v15  ;;  %v68_v14 = vld [vmem:[%s2604_s2 + $0x18] sm:$0x1] }
 0x175   :  { %v2080_v15 = vpack.c.bf16 %v68_v14, %v67_v13 }
 0x176   :  { %v181_v17 = vmul.f32 1.442695, %v178_v16  ;;  %v69_v16 = vld [vmem:[%s2604_s2 + $0x20] sm:$0xff] }
 0x178   :  { %2176 = vpow2.f32 %v181_v17  ;;  %v70_v17 = vld [vmem:[%s2604_s2 + $0x28] sm:$0x1] }
 0x17e   :  { %v2175_v18 = vpop.eup %2174 }
 0x17f   :  { %v183_v19 = vsel %vm169_vm2, %v2175_v18, 0.0 }
 0x180   :  { %184 = vadd.xlane.f32.xlu1 %v183_v19 }
 0x182   :  { %v2177_v20 = vpop.eup %2176 }
 0x183   :  { %v186_v21 = vsel %vm173_vm3, %v2177_v20, 0.0 }
 0x184   :  { %187 = vadd.xlane.f32.xlu1 %v186_v21 }
 0x20d   :  { %v185_v36 = vpop.xlane.xlu1 %184 }
 0x20e   :  { %2178 = vrcp.f32 %v185_v36 }
 0x211   :  { %v188_v37 = vpop.xlane.xlu1 %187 }
 0x212   :  { %2180 = vrcp.f32 %v188_v37  ;;  %v24_v37 = vld [vmem:[%s2603_s0 + $0x38] sm:$0x1] }
 0x218   :  { %v2179_v38 = vpop.eup %2178 }
 0x219   :  { %v190_v39 = vmul.f32 %v2179_v38, %v2175_v18  ;;  %v2092_v18 = vpack.c.bf16 %v70_v17, %v69_v16  ;;  %v40_v38 = vmul.f32 0.5, %v24_v37 }
 0x21b   :  { %1950 = vmatprep.mubr.msk.f32.mxu1 %vm169_vm2, %v190_v39 }
 0x21c   :  { %v2181_v41 = vpop.eup %2180 }
 0x21d   :  { %v192_v43 = vmul.f32 %v2181_v41, %v2177_v20 }
 0x21f   :  { %1951 = vmatmul.mubr.msk.f32.vlgmr.msra.gmra.mrb[0].mxu1 %vm169_vm2, %v192_v43 }
 0x220   :  { %2079 = vmatpush3.bf16.xpose.msk.msra.mxu1 %vm2279_vm1, %v2074_v28  ;;  %1957 = vmatprep.mubr.msk.f32.mxu1 %vm81_vm0, %v35_v42 }
 0x221   :  { %2082 = vmatprep.subr.msk.bf16.mxu1 %vm2305_vm6, %v2080_v15 }
 0x227   :  { %1958 = vmatmul.mubr.msk.f32.vlgmr.msra.gmra.mrb[2].mxu1 %vm81_vm0, %v36_v45 }
 0x228   :  { %2085 = vmatpush3.bf16.msk.msra.mxu1 %vm2305_vm6, %v2080_v15 }
 0x229   :  { %2094 = vmatprep.subr.msk.bf16.mxu1 %vm2305_vm6, %v2092_v18 }
 0x2f2   :  { %v1952_v48 = vpop.f32.mrb[0].mxu1 }
 0x2f3   :  { %280 = vst.msk [vmem:[#allocation2 + $0x8] sm:$0x1] %vm279_vm7, %v1952_v48  ;;  %v269_v49 = vpop.f32.mrb[1].mxu1  ;;  %vm1805_vm7 = vcmask 253952  }
 0x2f4   :  { %278 = vst.msk [vmem:[#allocation2] sm:$0xff] %vm81_vm0, %v269_v49 }
 0x2fa   :  { %v1959_v50 = vpop.f32.mrb[2].mxu1 }
 0x2fb   :  { %v359_v51 = vpop.f32.mrb[3].mxu1  ;;  %v371_v52 = vsel %vm173_vm3, %v1959_v50, -inf }
 0x2fc   :  { %372 = vmax.xlane.f32.xlu1 %v371_v52  ;;  %v368_v53 = vsel %vm169_vm2, %v359_v51, -inf }
 0x2fd   :  { %369 = vmax.xlane.f32.xlu0 %v368_v53 }
 0x300   :  { %577 = vmax.xlane.f32.xlu1 %v576_v54 }
 0x301   :  { %574 = vmax.xlane.f32.xlu0 %v573_v55 }
 0x389   :  { %v373_v56 = vpop.xlane.xlu1 %372 }
 0x38a   :  { %v375_v57 = vsub.f32 %v1959_v50, %v373_v56  ;;  %v370_v58 = vpop.xlane.xlu0 %369 }
 0x38b   :  { %v374_v59 = vsub.f32 %v359_v51, %v370_v58  ;;  %v72_v58 = vld [vmem:[%s2604_s2 + $0x38] sm:$0x1] }
 0x38c   :  { %v378_v60 = vmul.f32 1.442695, %v375_v57  ;;  %v71_v57 = vld [vmem:[%s2604_s2 + $0x30] sm:$0xff] }
 0x38d   :  { %v376_v61 = vmul.f32 1.442695, %v374_v59  ;;  %v578_v62 = vpop.xlane.xlu1 %577  ;;  %v2104_v59 = vpack.c.bf16 %v72_v58, %v71_v57 }
 0x38e   :  { %2182 = vpow2.f32 %v378_v60  ;;  %v580_v63 = vsub.f32 %v1973_v46, %v578_v62  ;;  %v575_v0 = vpop.xlane.xlu0 %574  ;;  %v57_v60 = vld [vmem:[%s2602_s1 + $0x40] sm:$0xff] }
 0x38f   :  { %2184 = vpow2.f32 %v376_v61  ;;  %v579_v1 = vsub.f32 %v564_v47, %v575_v0  ;;  %2106 = vmatprep.subr.msk.bf16.mxu0 %vm2305_vm6, %v2104_v59  ;;  %v58_v61 = vld [vmem:[%s2602_s1 + $0x48] sm:$0x1] }
 0x390   :  { %v583_v3 = vmul.f32 1.442695, %v580_v63  ;;  %2109 = vmatpush3.bf16.msk.msra.mxu0 %vm2305_vm6, %v2104_v59  ;;  %v2110_v62 = vpack.c.bf16 %v58_v61, %v57_v60 }
 0x391   :  { %v581_v4 = vmul.f32 1.442695, %v579_v1  ;;  %v25_v1 = vld [vmem:[%s2603_s0 + $0x40] sm:$0xff] }
 0x392   :  { %2186 = vpow2.f32 %v583_v3  ;;  %2112 = vmatprep.subr.msk.bf16.mxu0 %vm2279_vm1, %v2110_v62 }
 0x393   :  { %2188 = vpow2.f32 %v581_v4 }
 0x398   :  { %v2183_v5 = vpop.eup %2182 }
 0x399   :  { %v2185_v6 = vpop.eup %2184  ;;  %v383_v7 = vsel %vm173_vm3, %v2183_v5, 0.0 }
 0x39a   :  { %384 = vadd.xlane.f32.xlu1 %v383_v7  ;;  %v380_v8 = vsel %vm169_vm2, %v2185_v6, 0.0 }
 0x39b   :  { %381 = vadd.xlane.f32.xlu0 %v380_v8  ;;  %v26_v8 = vld [vmem:[%s2603_s0 + $0x48] sm:$0x1] }
 0x39c   :  { %v2187_v9 = vpop.eup %2186 }
 0x39d   :  { %v2189_v10 = vpop.eup %2188  ;;  %v588_v11 = vsel %vm173_vm3, %v2187_v9, 0.0 }
 0x39e   :  { %589 = vadd.xlane.f32.xlu1 %v588_v11  ;;  %v585_v12 = vsel %vm169_vm2, %v2189_v10, 0.0 }
 0x39f   :  { %586 = vadd.xlane.f32.xlu0 %v585_v12 }
 0x427   :  { %v385_v19 = vpop.xlane.xlu1 %384 }
 0x428   :  { %2190 = vrcp.f32 %v385_v19  ;;  %v382_v20 = vpop.xlane.xlu0 %381 }
 0x429   :  { %2192 = vrcp.f32 %v382_v20 }
 0x42b   :  { %v590_v21 = vpop.xlane.xlu1 %589 }
 0x42c   :  { %2194 = vrcp.f32 %v590_v21  ;;  %v587_v22 = vpop.xlane.xlu0 %586 }
 0x42d   :  { %2196 = vrcp.f32 %v587_v22 }
 0x432   :  { %v2191_v23 = vpop.eup %2190 }
 0x433   :  { %v2193_v27 = vpop.eup %2192  ;;  %v389_v29 = vmul.f32 %v2191_v23, %v2183_v5 }
 0x434   :  { %v387_v28 = vmul.f32 %v2193_v27, %v2185_v6  ;;  %v41_v6 = vmul.f32 0.5, %v25_v1  ;;  %v73_v27 = vld [vmem:[%s2604_s2 + $0x40] sm:$0xff] }
 0x436   :  { %v2195_v32 = vpop.eup %2194  ;;  %1964 = vmatprep.mubr.msk.f32.mxu1 %vm169_vm2, %v387_v28  ;;  %v74_v28 = vld [vmem:[%s2604_s2 + $0x48] sm:$0x1] }
 0x437   :  { %v2197_v33 = vpop.eup %2196  ;;  %1965 = vmatmul.mubr.msk.f32.vlgmr.msra.gmra.mrb[4].mxu1 %vm169_vm2, %v389_v29  ;;  %v594_v36 = vmul.f32 %v2195_v32, %v2187_v9  ;;  %v42_v9 = vmul.f32 0.5, %v26_v8  ;;  %v2116_v29 = vpack.c.bf16 %v74_v28, %v73_v27  ;;  %v29_v8 = vld [vmem:[%s2603_s0 + $0x60] sm:$0xff] }
 0x438   :  { %2097 = vmatpush3.bf16.msk.msra.mxu1 %vm2305_vm6, %v2092_v18  ;;  %v592_v34 = vmul.f32 %v2197_v33, %v2189_v10 }
 0x439   :  { %2100 = vmatprep.subr.msk.bf16.mxu1 %vm2279_vm1, %v2098_v30 }
 0x43a   :  { %1978 = vmatprep.mubr.msk.f32.mxu1 %vm169_vm2, %v592_v34 }
 0x43b   :  { %1979 = vmatmul.mubr.msk.f32.vlgmr.msra.gmra.mrb[6].mxu1 %vm169_vm2, %v594_v36 }
 0x43c   :  { %1985 = vmatprep.mubr.msk.f32.mxu1 %vm81_vm0, %v39_v35  ;;  %v27_v35 = vld [vmem:[%s2603_s0 + $0x50] sm:$0xff] }
 0x441   :  { %2103 = vmatpush3.bf16.xpose.msk.msra.mxu1 %vm2279_vm1, %v2098_v30  ;;  %v59_v30 = vld [vmem:[%s2602_s1 + $0x50] sm:$0xff] }
 0x442   :  { %2118 = vmatprep.subr.msk.bf16.mxu1 %vm2305_vm6, %v2116_v29  ;;  %v2122_v32 = vpack.c.bf16 %v60_v31, %v59_v30 }
 0x448   :  { %1986 = vmatmul.mubr.msk.f32.vlgmr.msra.gmra.mrb[8].mxu1 %vm81_vm0, %v40_v38 }
 0x449   :  { %2121 = vmatpush3.bf16.msk.msra.mxu1 %vm2305_vm6, %v2116_v29 }
 0x44a   :  { %2124 = vmatprep.subr.msk.bf16.mxu1 %vm2279_vm1, %v2122_v32 }
 0x50a   :  { %v2402_v39 = vpop.f32.mrb[4].mxu1 }
 0x50b   :  { %v2404_v40 = vpop.f32.mrb[5].mxu1 }
 0x50e   :  { %v2406_v41 = vpop.f32.mrb[6].mxu1 }
 0x50f   :  { %v2408_v42 = vpop.f32.mrb[7].mxu1 }
 0x51b   :  { %v1987_v43 = vpop.f32.mrb[8].mxu1 }
 0x51c   :  { %v769_v44 = vpop.f32.mrb[9].mxu1  ;;  %v781_v45 = vsel %vm173_vm3, %v1987_v43, -inf }
 0x51d   :  { %782 = vmax.xlane.f32.xlu1 %v781_v45  ;;  %v778_v46 = vsel %vm169_vm2, %v769_v44, -inf  ;;  %v28_v45 = vld [vmem:[%s2603_s0 + $0x58] sm:$0x1] }
 0x51e   :  { %779 = vmax.xlane.f32.xlu0 %v778_v46  ;;  %v44_v46 = vmul.f32 0.5, %v28_v45 }
 0x5aa   :  { %v783_v47 = vpop.xlane.xlu1 %782 }
 0x5ab   :  { %v785_v48 = vsub.f32 %v1987_v43, %v783_v47  ;;  %v780_v49 = vpop.xlane.xlu0 %779  ;;  %v43_v43 = vmul.f32 0.5, %v27_v35  ;;  %v77_v35 = vld [vmem:[%s2604_s2 + $0x60] sm:$0xff] }
 0x5ac   :  { %v784_v50 = vsub.f32 %v769_v44, %v780_v49 }
 0x5ad   :  { %v788_v51 = vmul.f32 1.442695, %v785_v48 }
 0x5ae   :  { %v786_v52 = vmul.f32 1.442695, %v784_v50 }
 0x5af   :  { %2198 = vpow2.f32 %v788_v51 }
 0x5b0   :  { %2200 = vpow2.f32 %v786_v52 }
 0x5b9   :  { %v2199_v53 = vpop.eup %2198 }
 0x5ba   :  { %v2201_v54 = vpop.eup %2200  ;;  %v793_v55 = vsel %vm173_vm3, %v2199_v53, 0.0 }
 0x5bb   :  { %794 = vadd.xlane.f32.xlu1 %v793_v55  ;;  %v790_v56 = vsel %vm169_vm2, %v2201_v54, 0.0 }
 0x5bc   :  { %791 = vadd.xlane.f32.xlu0 %v790_v56 }
 0x648   :  { %v795_v63 = vpop.xlane.xlu1 %794 }
 0x649   :  { %2202 = vrcp.f32 %v795_v63  ;;  %v792_v0 = vpop.xlane.xlu0 %791  ;;  %v75_v63 = vld [vmem:[%s2604_s2 + $0x50] sm:$0xff] }
 0x64a   :  { %2204 = vrcp.f32 %v792_v0  ;;  %v76_v0 = vld [vmem:[%s2604_s2 + $0x58] sm:$0x1] }
 0x64b   :  { %v2128_v1 = vpack.c.bf16 %v76_v0, %v75_v63 }
 0x653   :  { %v2203_v3 = vpop.eup %2202 }
 0x654   :  { %v2205_v4 = vpop.eup %2204  ;;  %v799_v7 = vmul.f32 %v2203_v3, %v2199_v53  ;;  %v61_v3 = vld [vmem:[%s2602_s1 + $0x60] sm:$0xff] }
 0x655   :  { %v797_v5 = vmul.f32 %v2205_v4, %v2201_v54  ;;  %v62_v4 = vld [vmem:[%s2602_s1 + $0x68] sm:$0x1] }
 0x657   :  { %1992 = vmatprep.mubr.msk.f32.mxu0 %vm169_vm2, %v797_v5  ;;  %v2134_v5 = vpack.c.bf16 %v62_v4, %v61_v3 }
 0x658   :  { %1993 = vmatmul.mubr.msk.f32.vlgmr.msra.gmra.mrb[4].mxu0 %vm169_vm2, %v799_v7 }
 0x659   :  { %2115 = vmatpush3.bf16.xpose.msk.msra.mxu0 %vm2279_vm1, %v2110_v62  ;;  %1999 = vmatprep.mubr.msk.f32.mxu0 %vm81_vm0, %v41_v6 }
 0x65a   :  { %2130 = vmatprep.subr.msk.bf16.mxu0 %vm2305_vm6, %v2128_v1 }
 0x660   :  { %2000 = vmatmul.mubr.msk.f32.vlgmr.msra.gmra.mrb[6].mxu0 %vm81_vm0, %v42_v9 }
 0x661   :  { %2133 = vmatpush3.bf16.msk.msra.mxu0 %vm2305_vm6, %v2128_v1 }
 0x662   :  { %2136 = vmatprep.subr.msk.bf16.mxu0 %vm2279_vm1, %v2134_v5 }
 0x72b   :  { %v2444_v10 = vpop.f32.mrb[4].mxu0 }
 0x72c   :  { %v2446_v11 = vpop.f32.mrb[5].mxu0 }
 0x733   :  { %v2001_v12 = vpop.f32.mrb[6].mxu0 }
 0x734   :  { %v974_v13 = vpop.f32.mrb[7].mxu0  ;;  %v986_v14 = vsel %vm173_vm3, %v2001_v12, -inf }
 0x735   :  { %987 = vmax.xlane.f32.xlu1 %v986_v14  ;;  %v983_v15 = vsel %vm169_vm2, %v974_v13, -inf  ;;  %v45_v14 = vmul.f32 0.5, %v29_v8 }
 0x736   :  { %984 = vmax.xlane.f32.xlu0 %v983_v15 }
 0x7c2   :  { %v988_v16 = vpop.xlane.xlu1 %987 }
 0x7c3   :  { %v990_v17 = vsub.f32 %v2001_v12, %v988_v16  ;;  %v985_v18 = vpop.xlane.xlu0 %984  ;;  %v30_v16 = vld [vmem:[%s2603_s0 + $0x68] sm:$0x1] }
 0x7c4   :  { %v989_v19 = vsub.f32 %v974_v13, %v985_v18 }
 0x7c5   :  { %v993_v20 = vmul.f32 1.442695, %v990_v17  ;;  %v46_v17 = vmul.f32 0.5, %v30_v16 }
 0x7c6   :  { %v991_v21 = vmul.f32 1.442695, %v989_v19 }
 0x7c7   :  { %2206 = vpow2.f32 %v993_v20 }
 0x7c8   :  { %2208 = vpow2.f32 %v991_v21 }
 0x7d1   :  { %v2207_v22 = vpop.eup %2206 }
 0x7d2   :  { %v2209_v23 = vpop.eup %2208  ;;  %v998_v24 = vsel %vm173_vm3, %v2207_v22, 0.0 }
 0x7d3   :  { %999 = vadd.xlane.f32.xlu1 %v998_v24  ;;  %v995_v26 = vsel %vm169_vm2, %v2209_v23, 0.0 }
 0x7d4   :  { %996 = vadd.xlane.f32.xlu0 %v995_v26 }
 0x860   :  { %v1000_v33 = vpop.xlane.xlu1 %999 }
 0x861   :  { %2210 = vrcp.f32 %v1000_v33  ;;  %v997_v34 = vpop.xlane.xlu0 %996 }
 0x862   :  { %2212 = vrcp.f32 %v997_v34 }
 0x86b   :  { %v2211_v36 = vpop.eup %2210 }
 0x86c   :  { %v2213_v37 = vpop.eup %2212  ;;  %v1004_v44 = vmul.f32 %v2211_v36, %v2207_v22  ;;  %v78_v36 = vld [vmem:[%s2604_s2 + $0x68] sm:$0x1] }
 0x86d   :  { %v1002_v38 = vmul.f32 %v2213_v37, %v2209_v23  ;;  %v2140_v37 = vpack.c.bf16 %v78_v36, %v77_v35 }
 0x86f   :  { %2006 = vmatprep.mubr.msk.f32.mxu1 %vm169_vm2, %v1002_v38  ;;  %v63_v38 = vld [vmem:[%s2602_s1 + $0x70] sm:$0xff] }
 0x870   :  { %2007 = vmatmul.mubr.msk.f32.vlgmr.msra.gmra.mrb[10].mxu1 %vm169_vm2, %v1004_v44 }
 0x871   :  { %2127 = vmatpush3.bf16.xpose.msk.msra.mxu1 %vm2279_vm1, %v2122_v32  ;;  %2013 = vmatprep.mubr.msk.f32.mxu1 %vm81_vm0, %v43_v43  ;;  %v64_v43 = vld [vmem:[%s2602_s1 + $0x78] sm:$0x1] }
 0x872   :  { %2142 = vmatprep.subr.msk.bf16.mxu1 %vm2305_vm6, %v2140_v37  ;;  %v2146_v44 = vpack.c.bf16 %v64_v43, %v63_v38 }
 0x878   :  { %2014 = vmatmul.mubr.msk.f32.vlgmr.msra.gmra.mrb[12].mxu1 %vm81_vm0, %v44_v46 }
 0x879   :  { %2145 = vmatpush3.bf16.msk.msra.mxu1 %vm2305_vm6, %v2140_v37 }
 0x87a   :  { %2148 = vmatprep.subr.msk.bf16.mxu1 %vm2279_vm1, %v2146_v44 }
 0x943   :  { %v2482_v47 = vpop.f32.mrb[10].mxu1 }
 0x944   :  { %v2484_v48 = vpop.f32.mrb[11].mxu1 }
 0x94b   :  { %v2015_v49 = vpop.f32.mrb[12].mxu1 }
 0x94c   :  { %v1179_v50 = vpop.f32.mrb[13].mxu1  ;;  %v1191_v51 = vsel %vm173_vm3, %v2015_v49, -inf }
 0x94d   :  { %1192 = vmax.xlane.f32.xlu1 %v1191_v51  ;;  %v1188_v52 = vsel %vm169_vm2, %v1179_v50, -inf }
 0x94e   :  { %1189 = vmax.xlane.f32.xlu0 %v1188_v52 }
 0x9da   :  { %v1193_v53 = vpop.xlane.xlu1 %1192 }
 0x9db   :  { %v1195_v54 = vsub.f32 %v2015_v49, %v1193_v53  ;;  %v1190_v55 = vpop.xlane.xlu0 %1189  ;;  %v31_v49 = vld [vmem:[%s2603_s0 + $0x70] sm:$0xff] }
 0x9dc   :  { %v1194_v56 = vsub.f32 %v1179_v50, %v1190_v55  ;;  %v47_v53 = vmul.f32 0.5, %v31_v49  ;;  %v32_v55 = vld [vmem:[%s2603_s0 + $0x78] sm:$0x1]  ;;  %s2239_s0 = smov 4  }
 0x9dd   :  { %v1198_v57 = vmul.f32 1.442695, %v1195_v54 }
 0x9de   :  { %v1196_v58 = vmul.f32 1.442695, %v1194_v56  ;;  %v48_v56 = vmul.f32 0.5, %v32_v55 }
 0x9df   :  { %2214 = vpow2.f32 %v1198_v57 }
 0x9e0   :  { %2216 = vpow2.f32 %v1196_v58 }
 0x9e9   :  { %v2215_v59 = vpop.eup %2214 }
 0x9ea   :  { %v2217_v60 = vpop.eup %2216  ;;  %v1203_v61 = vsel %vm173_vm3, %v2215_v59, 0.0 }
 0x9eb   :  { %1204 = vadd.xlane.f32.xlu1 %v1203_v61  ;;  %v1200_v62 = vsel %vm169_vm2, %v2217_v60, 0.0 }
 0x9ec   :  { %1201 = vadd.xlane.f32.xlu0 %v1200_v62 }
 0xa78   :  { %v1205_v6 = vpop.xlane.xlu1 %1204 }
 0xa79   :  { %2218 = vrcp.f32 %v1205_v6  ;;  %v1202_v7 = vpop.xlane.xlu0 %1201 }
 0xa7a   :  { %2220 = vrcp.f32 %v1202_v7 }
 0xa83   :  { %v2219_v9 = vpop.eup %2218 }
 0xa84   :  { %v2221_v12 = vpop.eup %2220  ;;  %v1209_v15 = vmul.f32 %v2219_v9, %v2215_v59  ;;  %v79_v9 = vld [vmem:[%s2604_s2 + $0x70] sm:$0xff] }
 0xa85   :  { %v1207_v13 = vmul.f32 %v2221_v12, %v2217_v60  ;;  %v80_v12 = vld [vmem:[%s2604_s2 + $0x78] sm:$0x1]  ;;  %s2243_s2 = smov 20  }
 0xa87   :  { %2020 = vmatprep.mubr.msk.f32.mxu0 %vm169_vm2, %v1207_v13  ;;  %v2152_v13 = vpack.c.bf16 %v80_v12, %v79_v9 }
 0xa88   :  { %2021 = vmatmul.mubr.msk.f32.vlgmr.msra.gmra.mrb[8].mxu0 %vm169_vm2, %v1209_v15 }
 0xa89   :  { %2139 = vmatpush3.bf16.xpose.msk.msra.mxu0 %vm2279_vm1, %v2134_v5  ;;  %2027 = vmatprep.mubr.msk.f32.mxu0 %vm81_vm0, %v45_v14 }
 0xa8a   :  { %2154 = vmatprep.subr.msk.bf16.mxu0 %vm2305_vm6, %v2152_v13 }
 0xa90   :  { %2028 = vmatmul.mubr.msk.f32.vlgmr.msra.gmra.mrb[10].mxu0 %vm81_vm0, %v46_v17 }
 0xa91   :  { %2157 = vmatpush3.bf16.msk.msra.mxu0 %vm2305_vm6, %v2152_v13  ;;  %vm1722_vm6 = vcmask 261120  }
 0xb5b   :  { %v2520_v18 = vpop.f32.mrb[8].mxu0 }
 0xb5c   :  { %v2522_v19 = vpop.f32.mrb[9].mxu0 }
 0xb63   :  { %v2029_v20 = vpop.f32.mrb[10].mxu0 }
 0xb64   :  { %v1384_v21 = vpop.f32.mrb[11].mxu0  ;;  %v1396_v22 = vsel %vm173_vm3, %v2029_v20, -inf }
 0xb65   :  { %1397 = vmax.xlane.f32.xlu1 %v1396_v22  ;;  %v1393_v23 = vsel %vm169_vm2, %v1384_v21, -inf }
 0xb66   :  { %1394 = vmax.xlane.f32.xlu0 %v1393_v23  ;;  %v1718_v23 = vld [vmem:[%s2605_s3] sm:$0xff] }
 0xbf2   :  { %v1398_v24 = vpop.xlane.xlu1 %1397 }
 0xbf3   :  { %v1400_v26 = vsub.f32 %v2029_v20, %v1398_v24  ;;  %v1395_v27 = vpop.xlane.xlu0 %1394  ;;  %v1719_v24 = vld [vmem:[%s2605_s3 + $0x8] sm:$0xff] }
 0xbf4   :  { %v1399_v28 = vsub.f32 %v1384_v21, %v1395_v27  ;;  %v1720_v27 = vld [vmem:[%s2605_s3 + $0x10] sm:$0xff] }
 0xbf5   :  { %v1403_v29 = vmul.f32 1.442695, %v1400_v26  ;;  %v2158_v26 = vpack.c.bf16 %v1719_v24, %v1718_v23 }
 0xbf6   :  { %v1401_v30 = vmul.f32 1.442695, %v1399_v28  ;;  %v1721_v28 = vld [vmem:[%s2605_s3 + $0x18] sm:$0xff] }
 0xbf7   :  { %2222 = vpow2.f32 %v1403_v29  ;;  %2159 = vmatprep.subr.bf16.mxu0 %v2158_v26  ;;  %v2162_v29 = vpack.c.bf16 %v1721_v28, %v1720_v27 }
 0xbf8   :  { %2224 = vpow2.f32 %v1401_v30 }
 0xc01   :  { %v2223_v31 = vpop.eup %2222 }
 0xc02   :  { %v2225_v32 = vpop.eup %2224  ;;  %v1408_v33 = vsel %vm173_vm3, %v2223_v31, 0.0 }
 0xc03   :  { %1409 = vadd.xlane.f32.xlu1 %v1408_v33  ;;  %v1405_v34 = vsel %vm169_vm2, %v2225_v32, 0.0 }
 0xc04   :  { %1406 = vadd.xlane.f32.xlu0 %v1405_v34 }
 0xc90   :  { %v1410_v45 = vpop.xlane.xlu1 %1409 }
 0xc91   :  { %2226 = vrcp.f32 %v1410_v45  ;;  %v1407_v46 = vpop.xlane.xlu0 %1406 }
 0xc92   :  { %2228 = vrcp.f32 %v1407_v46 }
 0xc9b   :  { %v2227_v50 = vpop.eup %2226 }
 0xc9c   :  { %v2229_v51 = vpop.eup %2228  ;;  %v1414_v54 = vmul.f32 %v2227_v50, %v2223_v31 }
 0xc9d   :  { %v1412_v52 = vmul.f32 %v2229_v51, %v2225_v32 }
 0xc9f   :  { %2034 = vmatprep.mubr.msk.f32.mxu1 %vm169_vm2, %v1412_v52 }
 0xca0   :  { %2035 = vmatmul.mubr.msk.f32.vlgmr.msra.gmra.mrb[14].mxu1 %vm169_vm2, %v1414_v54 }
 0xca1   :  { %2151 = vmatpush3.bf16.xpose.msk.msra.mxu1 %vm2279_vm1, %v2146_v44  ;;  %2041 = vmatprep.mubr.msk.f32.mxu1 %vm81_vm0, %v47_v53  ;;  %vm1507_vm1 = vcmask 228544  }
 0xca8   :  { %2042 = vmatmul.mubr.msk.f32.vlgmr.msra.gmra.mrb[16].mxu1 %vm81_vm0, %v48_v56  ;;  %vm1099_vm0 = vcmask 155776  }
 0xd73   :  { %v2036_v57 = vpop.f32.mrb[14].mxu1 }
 0xd74   :  { %v1490_v58 = vpop.f32.mrb[15].mxu1 }
 0xd7b   :  { %v2043_v59 = vpop.f32.mrb[16].mxu1 }
 0xd7c   :  { %v1589_v60 = vpop.f32.mrb[17].mxu1  ;;  %v1601_v61 = vsel %vm173_vm3, %v2043_v59, -inf }
 0xd7d   :  { %1602 = vmax.xlane.f32.xlu1 %v1601_v61  ;;  %v1598_v62 = vsel %vm169_vm2, %v1589_v60, -inf }
 0xd7e   :  { %1599 = vmax.xlane.f32.xlu0 %v1598_v62 }
 0xe0a   :  { %v1603_v2 = vpop.xlane.xlu1 %1602 }
 0xe0b   :  { %v1605_v63 = vsub.f32 %v2043_v59, %v1603_v2  ;;  %v1600_v0 = vpop.xlane.xlu0 %1599 }
 0xe0c   :  { %v1604_v1 = vsub.f32 %v1589_v60, %v1600_v0 }
 0xe0d   :  { %v1608_v3 = vmul.f32 1.442695, %v1605_v63 }
 0xe0e   :  { %v1606_v4 = vmul.f32 1.442695, %v1604_v1 }
 0xe0f   :  { %2230 = vpow2.f32 %v1608_v3 }
 0xe10   :  { %2232 = vpow2.f32 %v1606_v4 }
 0xe19   :  { %v2231_v5 = vpop.eup %2230 }
 0xe1a   :  { %v2233_v6 = vpop.eup %2232  ;;  %v1613_v7 = vsel %vm173_vm3, %v2231_v5, 0.0  ;;  %vm1304_vm3 = vcmask 188576  }
 0xe1b   :  { %1614 = vadd.xlane.f32.xlu1 %v1613_v7  ;;  %v1610_v8 = vsel %vm169_vm2, %v2233_v6, 0.0 }
 0xe1c   :  { %1611 = vadd.xlane.f32.xlu0 %v1610_v8 }
 0xe2c   :  { %478 = vrot.lane.b32.xlu1 %v2402_v39, %s2239_s0 }
 0xe30   :  { %681 = vrot.lane.b32.xlu1 %v2408_v42, %s2240_s28 }
 0xe32   :  { %476 = vrot.lane.b32.xlu0 %v2404_v40, %s2239_s0 }
 0xe34   :  { %683 = vrot.lane.b32.xlu1 %v2406_v41, %s2240_s28 }
 0xe36   :  { %886 = vrot.lane.b32.xlu0 %v2446_v11, %s2241_s7 }
 0xe38   :  { %888 = vrot.lane.b32.xlu1 %v2444_v10, %s2241_s7 }
 0xe3a   :  { %1091 = vrot.lane.b32.xlu0 %v2484_v48, %s2242_s8 }
 0xe3c   :  { %1093 = vrot.lane.b32.xlu1 %v2482_v47, %s2242_s8 }
 0xe3e   :  { %1296 = vrot.lane.b32.xlu0 %v2522_v19, %s2243_s2 }
 0xe40   :  { %1298 = vrot.lane.b32.xlu1 %v2520_v18, %s2243_s2 }
 0xe42   :  { %1501 = vrot.lane.b32.xlu0 %v1490_v58, %s2244_s9 }
 0xe44   :  { %1503 = vrot.lane.b32.xlu1 %v2036_v57, %s2244_s9 }
 0xea8   :  { %v1615_v25 = vpop.xlane.xlu1 %1614 }
 0xea9   :  { %2234 = vrcp.f32 %v1615_v25  ;;  %v1612_v39 = vpop.xlane.xlu0 %1611 }
 0xeaa   :  { %2236 = vrcp.f32 %v1612_v39 }
 0xeac   :  { %v479_v40 = vpop.permute.xlu1 %478 }
 0xead   :  { %485 = vst.msk [vmem:[#allocation2 + $0x8] sm:$0x1] %vm484_vm8, %v479_v40  ;;  %v477_v41 = vpop.permute.xlu0 %476 }
 0xeae   :  { %483 = vst.msk [vmem:[#allocation2] sm:$0xff] %vm482_vm9, %v477_v41 }
 0xeb0   :  { %v682_v42 = vpop.permute.xlu1 %681 }
 0xeb1   :  { %688 = vst.msk [vmem:[#allocation2] sm:$0xff] %vm687_vm10, %v682_v42  ;;  %v887_v10 = vpop.permute.xlu0 %886 }
 0xeb2   :  { %893 = vst.msk [vmem:[#allocation2] sm:$0xff] %vm892_vm11, %v887_v10 }
 0xeb3   :  { %v2235_v11 = vpop.eup %2234 }
 0xeb4   :  { %v2237_v47 = vpop.eup %2236  ;;  %v684_v48 = vpop.permute.xlu1 %683  ;;  %v1619_v16 = vmul.f32 %v2235_v11, %v2231_v5 }
 0xeb5   :  { %690 = vst.msk [vmem:[#allocation2 + $0x8] sm:$0x1] %vm689_vm12, %v684_v48  ;;  %v1092_v14 = vpop.permute.xlu0 %1091  ;;  %v1617_v15 = vmul.f32 %v2237_v47, %v2233_v6 }
 0xeb6   :  { %1098 = vst.msk [vmem:[#allocation2] sm:$0xff] %vm1097_vm13, %v1092_v14 }
 0xeb7   :  { %2048 = vmatprep.mubr.msk.f32.mxu0 %vm169_vm2, %v1617_v15 }
 0xeb8   :  { %v889_v17 = vpop.permute.xlu1 %888  ;;  %2049 = vmatmul.mubr.msk.f32.vlgmr.msra.gmra.mrb[12].mxu0 %vm169_vm2, %v1619_v16  ;;  %vm1714_vm2 = vcmask 254176  }
 0xeb9   :  { %895 = vst.msk [vmem:[#allocation2 + $0x8] sm:$0x1] %vm894_vm14, %v889_v17  ;;  %v1297_v18 = vpop.permute.xlu0 %1296  ;;  %2161 = vmatpush3.bf16.msra.mxu0 %v2158_v26 }
 0xeba   :  { %1303 = vst.msk [vmem:[#allocation2] sm:$0xff] %vm1302_vm15, %v1297_v18  ;;  %2163 = vmatprep.subr.bf16.mxu0 %v2162_v29 }
 0xebc   :  { %v1094_v19 = vpop.permute.xlu1 %1093 }
 0xebd   :  { %1100 = vst.msk [vmem:[#allocation2 + $0x8] sm:$0x1] %vm1099_vm0, %v1094_v19  ;;  %v1502_v20 = vpop.permute.xlu0 %1501  ;;  %2165 = vmatpush3.bf16.msra.mxu0 %v2162_v29 }
 0xebe   :  { %1508 = vst.msk [vmem:[#allocation2] sm:$0xff] %vm1507_vm1, %v1502_v20 }
 0xec0   :  { %v1299_v21 = vpop.permute.xlu1 %1298 }
 0xec1   :  { %1305 = vst.msk [vmem:[#allocation2 + $0x8] sm:$0x1] %vm1304_vm3, %v1299_v21 }
 0xec4   :  { %v1504_v22 = vpop.permute.xlu1 %1503 }
 0xec5   :  { %1510 = vst.msk [vmem:[#allocation2 + $0x8] sm:$0x1] %vm1509_vm4, %v1504_v22 }
 0xf8b   :  { %v2050_v30 = vpop.f32.mrb[12].mxu0 }
 0xf8c   :  { %1708 = vrot.lane.b32.xlu1 %v2050_v30, %s2245_s18  ;;  %v1695_v31 = vpop.f32.mrb[13].mxu0 }
 0xf8d   :  { %1706 = vrot.lane.b32.xlu0 %v1695_v31, %s2245_s18 }
 0xffe   :  { %v1709_v32 = vpop.permute.xlu1 %1708 }
 0xfff   :  { %1715 = vst.msk [vmem:[#allocation2 + $0x8] sm:$0x1] %vm1714_vm2, %v1709_v32  ;;  %v1707_v33 = vpop.permute.xlu0 %1706 }
0x1000   :  { %1713 = vst.msk [vmem:[#allocation2] sm:$0xff] %vm1712_vm5, %v1707_v33 }
0x1006   :  { %v1717_v35 = vld [vmem:[#allocation2 + $0x8] sm:$0x1] }
0x1007   :  { %v1716_v34 = vld [vmem:[#allocation2] sm:$0xff] }
0x1008   :  { %2059 = vmatprep.mubr.msk.f32.mxu0 %vm1722_vm6, %v1716_v34 }
0x1009   :  { %2060 = vmatmul.mubr.msk.f32.vlgmr.msra.gmra.mrb[14].mxu0 %vm1722_vm6, %v1717_v35 }
0x10dc   :  { %v2061_v36 = vpop.f32.mrb[14].mxu0 }
0x10dd   :  { %1806 = vst.msk [vmem:[%s2606_s4 + $0x8] sm:$0x1] %vm1805_vm7, %v2061_v36  ;;  %v1795_v37 = vpop.f32.mrb[15].mxu0 }
0x10de   :  { %1804 = vst.msk [vmem:[%s2606_s4] sm:$0xff] %vm1722_vm6, %v1795_v37 }

// kernel: dwablock_forward.7
= control target key start
LH: loop header
LB: loop body
LE: loop exit
PB: predicated region body
PF: predicated region fallthrough
CT: control target
= control target key end

     0   :  { %vm35_vm0 = vcmask 261120   ;;  %vm665_vm1 = vmmov 0   ;;  %s979_s0 = inlined_call_operand.vmem [shape: f32[72,32], index: 0, kind: input, shape index: {}]   ;;  %s980_s3 = inlined_call_operand.vmem [shape: f32[32,32], index: 3, kind: input, shape index: {}]   ;;  %s981_s5 = inlined_call_operand.vmem [shape: f32[32,32], index: 5, kind: input, shape index: {}]   ;;  %s982_s1 = inlined_call_operand.vmem [shape: f32[1,32], index: 1, kind: input, shape index: {}]   ;;  %s983_s2 = inlined_call_operand.vmem [shape: f32[1,32], index: 2, kind: input, shape index: {}]   ;;  %s984_s4 = inlined_call_operand.vmem [shape: f32[1,32], index: 4, kind: input, shape index: {}]   ;;  %s985_s6 = inlined_call_operand.vmem [shape: f32[1,32], index: 6, kind: input, shape index: {}]   ;;  %s986_s7 = inlined_call_operand.vmem [shape: f32[72,32], index: 7, kind: output, shape index: {}]  }
   0x1   :  { %v710_v0 = vld [vmem:[%s979_s0] sm:$0xff]  ;;  %v715_v1 = vld [vmem:[%s979_s0 + $0x10] sm:$0xff]  ;;  %v720_v2 = vld [vmem:[%s979_s0 + $0x8] sm:$0xff] }
   0x2   :  { %v36_v3 = vsel %vm35_vm0, %v710_v0, 0.0  ;;  %v42_v4 = vsel %vm35_vm0, %v715_v1, 0.0  ;;  %v729_v5 = vld [vmem:[%s979_s0 + $0x18] sm:$0xff]  ;;  %v39_v6 = vsel %vm35_vm0, %v720_v2, 0.0  ;;  %v738_v8 = vld [vmem:[%s979_s0 + $0x20] sm:$0xff]  ;;  %v743_v9 = vld [vmem:[%s979_s0 + $0x28] sm:$0xff] }
   0x3   :  { %37 = vadd.xlane.f32.xlu0 %v36_v3  ;;  %43 = vadd.xlane.f32.xlu1 %v42_v4  ;;  %v45_v7 = vsel %vm35_vm0, %v729_v5, 0.0  ;;  %v48_v10 = vsel %vm35_vm0, %v738_v8, 0.0  ;;  %v51_v11 = vsel %vm35_vm0, %v743_v9, 0.0  ;;  %v752_v12 = vld [vmem:[%s979_s0 + $0x30] sm:$0xff]  ;;  %v757_v13 = vld [vmem:[%s979_s0 + $0x38] sm:$0xff]  ;;  %v766_v16 = vld [vmem:[%s979_s0 + $0x40] sm:$0xff] }
   0x4   :  { %v54_v14 = vsel %vm35_vm0, %v752_v12, 0.0  ;;  %v57_v15 = vsel %vm35_vm0, %v757_v13, 0.0  ;;  %v60_v17 = vsel %vm35_vm0, %v766_v16, 0.0  ;;  %v186_v63 = vld [vmem:[%s980_s3] sm:$0xff]  ;;  %v187_v3 = vld [vmem:[%s980_s3 + $0x8] sm:$0xff] }
   0x5   :  { %v632_v4 = vpack.c.bf16 %v187_v3, %v186_v63 }
   0x7   :  { %40 = vadd.xlane.f32.xlu0 %v39_v6  ;;  %46 = vadd.xlane.f32.xlu1 %v45_v7  ;;  %v664_v6 = vmov 0.0|0.0   ;;  %v188_v7 = vld [vmem:[%s980_s3 + $0x10] sm:$0xff] }
   0x8   :  { %631 = vmatprep.subr.bf16.mxu0 %v664_v6  ;;  %637 = vmatprep.subr.bf16.mxu1 %v664_v6 }
   0x9   :  { %633 = vmatpush3.bf16.msra.mxu0 %v632_v4 }
   0xa   :  { %634 = vmatprep.subr.bf16.mxu0 %v664_v6 }
   0xb   :  { %49 = vadd.xlane.f32.xlu0 %v48_v10  ;;  %52 = vadd.xlane.f32.xlu1 %v51_v11  ;;  %v189_v10 = vld [vmem:[%s980_s3 + $0x18] sm:$0xff] }
   0xc   :  { %v635_v11 = vpack.c.bf16 %v189_v10, %v188_v7 }
   0xe   :  { %636 = vmatpush3.bf16.msra.mxu0 %v635_v11 }
   0xf   :  { %55 = vadd.xlane.f32.xlu0 %v54_v14  ;;  %58 = vadd.xlane.f32.xlu1 %v57_v15  ;;  %v666_v14 = vmov 0.0   ;;  %v343_v15 = vld [vmem:[%s981_s5] sm:$0xff] }
  0x10   :  { %569 = vmatprep.mubr.msk.f32.mxu0 %vm665_vm1, %v666_v14  ;;  %604 = vmatprep.mubr.msk.f32.mxu1 %vm665_vm1, %v666_v14 }
  0x13   :  { %61 = vadd.xlane.f32.xlu0 %v60_v17  ;;  %v344_v17 = vld [vmem:[%s981_s5 + $0x8] sm:$0xff] }
  0x90   :  { %v38_v18 = vpop.xlane.xlu0 %37  ;;  %v44_v19 = vpop.xlane.xlu1 %43 }
  0x91   :  { %v64_v20 = vmul.f32 0.03125, %v38_v18  ;;  %v66_v21 = vmul.f32 0.03125, %v44_v19  ;;  %v638_v18 = vpack.c.bf16 %v344_v17, %v343_v15 }
  0x93   :  { %v771_v22 = vsub.f32 %v710_v0, %v64_v20  ;;  %v774_v23 = vsub.f32 %v715_v1, %v66_v21  ;;  %639 = vmatpush3.bf16.msra.mxu1 %v638_v18 }
  0x94   :  { %v41_v24 = vpop.xlane.xlu0 %40  ;;  %v47_v25 = vpop.xlane.xlu1 %46  ;;  %640 = vmatprep.subr.bf16.mxu1 %v664_v6 }
  0x95   :  { %v65_v26 = vmul.f32 0.03125, %v41_v24  ;;  %v67_v27 = vmul.f32 0.03125, %v47_v25  ;;  %v82_v28 = vmul.f32 %v771_v22, %v771_v22  ;;  %v84_v29 = vmul.f32 %v774_v23, %v774_v23 }
  0x97   :  { %v781_v30 = vsub.f32 %v720_v2, %v65_v26  ;;  %v784_v31 = vsub.f32 %v729_v5, %v67_v27  ;;  %v91_v32 = vsel %vm35_vm0, %v82_v28, 0.0  ;;  %v97_v35 = vsel %vm35_vm0, %v84_v29, 0.0 }
  0x98   :  { %92 = vadd.xlane.f32.xlu1 %v91_v32  ;;  %v50_v33 = vpop.xlane.xlu0 %49  ;;  %v53_v34 = vpop.xlane.xlu1 %52 }
  0x99   :  { %v68_v36 = vmul.f32 0.03125, %v50_v33  ;;  %v69_v37 = vmul.f32 0.03125, %v53_v34  ;;  %v83_v38 = vmul.f32 %v781_v30, %v781_v30  ;;  %v85_v39 = vmul.f32 %v784_v31, %v784_v31 }
  0x9b   :  { %v793_v40 = vsub.f32 %v738_v8, %v68_v36  ;;  %v796_v41 = vsub.f32 %v743_v9, %v69_v37  ;;  %v94_v42 = vsel %vm35_vm0, %v83_v38, 0.0  ;;  %v100_v45 = vsel %vm35_vm0, %v85_v39, 0.0 }
  0x9c   :  { %98 = vadd.xlane.f32.xlu1 %v97_v35  ;;  %95 = vadd.xlane.f32.xlu0 %v94_v42  ;;  %v56_v43 = vpop.xlane.xlu0 %55  ;;  %v59_v44 = vpop.xlane.xlu1 %58 }
  0x9d   :  { %v70_v46 = vmul.f32 0.03125, %v56_v43  ;;  %v71_v47 = vmul.f32 0.03125, %v59_v44  ;;  %v86_v48 = vmul.f32 %v793_v40, %v793_v40  ;;  %v87_v49 = vmul.f32 %v796_v41, %v796_v41  ;;  %v849_v44 = vld [vmem:[%s982_s1] ss:$0 sm:$0xff] }
  0x9f   :  { %v805_v50 = vsub.f32 %v752_v12, %v70_v46  ;;  %v808_v51 = vsub.f32 %v757_v13, %v71_v47  ;;  %v103_v52 = vsel %vm35_vm0, %v86_v48, 0.0  ;;  %v106_v55 = vsel %vm35_vm0, %v87_v49, 0.0  ;;  %v514_v49 = vld [vmem:[%s983_s2] ss:$0 sm:$0xff] }
  0xa0   :  { %101 = vadd.xlane.f32.xlu0 %v100_v45  ;;  %104 = vadd.xlane.f32.xlu1 %v103_v52  ;;  %v62_v53 = vpop.xlane.xlu0 %61 }
  0xa1   :  { %v72_v54 = vmul.f32 0.03125, %v62_v53  ;;  %v88_v56 = vmul.f32 %v805_v50, %v805_v50  ;;  %v89_v57 = vmul.f32 %v808_v51, %v808_v51 }
  0xa3   :  { %v817_v58 = vsub.f32 %v766_v16, %v72_v54  ;;  %v109_v59 = vsel %vm35_vm0, %v88_v56, 0.0  ;;  %v112_v60 = vsel %vm35_vm0, %v89_v57, 0.0 }
  0xa4   :  { %107 = vadd.xlane.f32.xlu0 %v106_v55  ;;  %110 = vadd.xlane.f32.xlu1 %v109_v59 }
  0xa5   :  { %v90_v61 = vmul.f32 %v817_v58, %v817_v58 }
  0xa7   :  { %v115_v62 = vsel %vm35_vm0, %v90_v61, 0.0 }
  0xa8   :  { %113 = vadd.xlane.f32.xlu0 %v112_v60  ;;  %116 = vadd.xlane.f32.xlu1 %v115_v62 }
 0x125   :  { %v93_v19 = vpop.xlane.xlu1 %92 }
 0x126   :  { %v118_v20 = vmul.f32 0.03125, %v93_v19 }
 0x128   :  { %v127_v21 = vadd.f32 1e-05, %v118_v20 }
 0x129   :  { %v99_v24 = vpop.xlane.xlu1 %98  ;;  %v96_v25 = vpop.xlane.xlu0 %95 }
 0x12a   :  { %646 = vrsqrt.f32 %v127_v21  ;;  %v120_v26 = vmul.f32 0.03125, %v99_v24  ;;  %v119_v27 = vmul.f32 0.03125, %v96_v25 }
 0x12c   :  { %v129_v28 = vadd.f32 1e-05, %v120_v26  ;;  %v128_v29 = vadd.f32 1e-05, %v119_v27 }
 0x12d   :  { %v105_v32 = vpop.xlane.xlu1 %104  ;;  %v102_v33 = vpop.xlane.xlu0 %101 }
 0x12e   :  { %648 = vrsqrt.f32 %v129_v28  ;;  %v122_v34 = vmul.f32 0.03125, %v105_v32  ;;  %v121_v35 = vmul.f32 0.03125, %v102_v33 }
 0x12f   :  { %650 = vrsqrt.f32 %v128_v29 }
 0x130   :  { %v130_v36 = vadd.f32 1e-05, %v121_v35  ;;  %v131_v37 = vadd.f32 1e-05, %v122_v34  ;;  %v346_v35 = vld [vmem:[%s981_s5 + $0x18] sm:$0xff] }
 0x131   :  { %v108_v38 = vpop.xlane.xlu0 %107  ;;  %v111_v39 = vpop.xlane.xlu1 %110 }
 0x132   :  { %v123_v42 = vmul.f32 0.03125, %v108_v38  ;;  %652 = vrsqrt.f32 %v130_v36  ;;  %v124_v45 = vmul.f32 0.03125, %v111_v39 }
 0x133   :  { %654 = vrsqrt.f32 %v131_v37  ;;  %v515_v37 = vld [vmem:[%s984_s4] ss:$0 sm:$0xff] }
 0x134   :  { %v647_v43 = vpop.eup %646  ;;  %v132_v46 = vadd.f32 1e-05, %v123_v42  ;;  %v133_v55 = vadd.f32 1e-05, %v124_v45 }
 0x135   :  { %v145_v47 = vmul.f32 %v647_v43, %v771_v22  ;;  %v114_v48 = vpop.xlane.xlu0 %113  ;;  %v117_v59 = vpop.xlane.xlu1 %116 }
 0x136   :  { %656 = vrsqrt.f32 %v132_v46  ;;  %v125_v56 = vmul.f32 0.03125, %v114_v48  ;;  %v126_v63 = vmul.f32 0.03125, %v117_v59 }
 0x137   :  { %v161_v52 = vmul.f32 %v849_v44, %v145_v47  ;;  %658 = vrsqrt.f32 %v133_v55 }
 0x138   :  { %v649_v53 = vpop.eup %648  ;;  %v134_v3 = vadd.f32 1e-05, %v125_v56 }
 0x139   :  { %v651_v54 = vpop.eup %650  ;;  %v177_v57 = vadd.f32 %v514_v49, %v161_v52  ;;  %v147_v61 = vmul.f32 %v649_v53, %v774_v23  ;;  %v135_v23 = vadd.f32 1e-05, %v126_v63 }
 0x13a   :  { %v146_v60 = vmul.f32 %v651_v54, %v781_v30  ;;  %660 = vrsqrt.f32 %v134_v3 }
 0x13b   :  { %570 = vmatmul.mubr.msk.f32.vlgmr.msra.gmra.mrb[0].mxu0 %vm35_vm0, %v177_v57  ;;  %v163_v6 = vmul.f32 %v849_v44, %v147_v61  ;;  %662 = vrsqrt.f32 %v135_v23 }
 0x13c   :  { %572 = vmatprep.mubr.msk.f32.mxu0 %vm665_vm1, %v666_v14  ;;  %v162_v22 = vmul.f32 %v849_v44, %v146_v60  ;;  %v653_v62 = vpop.eup %652 }
 0x13d   :  { %v148_v7 = vmul.f32 %v653_v62, %v784_v31  ;;  %v655_v10 = vpop.eup %654  ;;  %v179_v30 = vadd.f32 %v514_v49, %v163_v6 }
 0x13e   :  { %v178_v4 = vadd.f32 %v514_v49, %v162_v22  ;;  %v149_v15 = vmul.f32 %v655_v10, %v793_v40 }
 0x13f   :  { %v164_v11 = vmul.f32 %v849_v44, %v148_v7 }
 0x140   :  { %573 = vmatmul.mubr.msk.f32.gmra.mrb[2].mxu0 %vm35_vm0, %v178_v4  ;;  %v657_v17 = vpop.eup %656  ;;  %v165_v18 = vmul.f32 %v849_v44, %v149_v15 }
 0x141   :  { %575 = vmatprep.mubr.msk.f32.mxu0 %vm665_vm1, %v666_v14  ;;  %v180_v31 = vadd.f32 %v514_v49, %v164_v11  ;;  %v150_v19 = vmul.f32 %v657_v17, %v796_v41  ;;  %v659_v20 = vpop.eup %658 }
 0x142   :  { %v181_v21 = vadd.f32 %v514_v49, %v165_v18  ;;  %v151_v24 = vmul.f32 %v659_v20, %v805_v50 }
 0x143   :  { %v166_v40 = vmul.f32 %v849_v44, %v150_v19 }
 0x144   :  { %576 = vmatmul.mubr.msk.f32.gmra.mrb[4].mxu0 %vm35_vm0, %v179_v30  ;;  %v661_v25 = vpop.eup %660  ;;  %v167_v41 = vmul.f32 %v849_v44, %v151_v24 }
 0x145   :  { %578 = vmatprep.mubr.msk.f32.mxu0 %vm665_vm1, %v666_v14  ;;  %v182_v26 = vadd.f32 %v514_v49, %v166_v40  ;;  %v152_v27 = vmul.f32 %v661_v25, %v808_v51  ;;  %v663_v28 = vpop.eup %662 }
 0x146   :  { %v183_v29 = vadd.f32 %v514_v49, %v167_v41  ;;  %v153_v32 = vmul.f32 %v663_v28, %v817_v58  ;;  %v345_v58 = vld [vmem:[%s981_s5 + $0x10] sm:$0xff] }
 0x147   :  { %v168_v50 = vmul.f32 %v849_v44, %v152_v27  ;;  %v641_v36 = vpack.c.bf16 %v346_v35, %v345_v58 }
 0x148   :  { %579 = vmatmul.mubr.msk.f32.gmra.mrb[6].mxu0 %vm35_vm0, %v180_v31  ;;  %v169_v34 = vmul.f32 %v849_v44, %v153_v32 }
 0x149   :  { %581 = vmatprep.mubr.msk.f32.mxu0 %vm665_vm1, %v666_v14  ;;  %v184_v33 = vadd.f32 %v514_v49, %v168_v50  ;;  %642 = vmatpush3.bf16.msra.mxu1 %v641_v36 }
 0x14a   :  { %v185_v51 = vadd.f32 %v514_v49, %v169_v34 }
 0x14c   :  { %582 = vmatmul.mubr.msk.f32.gmra.mrb[8].mxu0 %vm35_vm0, %v181_v21  ;;  %v525_v21 = vld [vmem:[%s985_s6] ss:$0 sm:$0xff] }
 0x14d   :  { %584 = vmatprep.mubr.msk.f32.mxu0 %vm665_vm1, %v666_v14 }
 0x150   :  { %585 = vmatmul.mubr.msk.f32.gmra.mrb[10].mxu0 %vm35_vm0, %v182_v26 }
 0x151   :  { %587 = vmatprep.mubr.msk.f32.mxu0 %vm665_vm1, %v666_v14 }
 0x154   :  { %588 = vmatmul.mubr.msk.f32.gmra.mrb[12].mxu0 %vm35_vm0, %v183_v29 }
 0x155   :  { %590 = vmatprep.mubr.msk.f32.mxu0 %vm665_vm1, %v666_v14 }
 0x158   :  { %591 = vmatmul.mubr.msk.f32.gmra.mrb[14].mxu0 %vm35_vm0, %v184_v33 }
 0x159   :  { %593 = vmatprep.mubr.msk.f32.mxu0 %vm665_vm1, %v666_v14 }
 0x15c   :  { %594 = vmatmul.mubr.msk.f32.gmra.mrb[16].mxu0 %vm35_vm0, %v185_v51 }
 0x20e   :  { %v290_v38 = vpop.f32.mrb[0].mxu0 }
 0x20f   :  { %v291_v39 = vadd.f32 %v515_v37, %v290_v38  ;;  %v571_v42 = vpop.f32.mrb[1].mxu0 }
 0x211   :  { %v334_v43 = vmax.f32 %v291_v39, 0.0 }
 0x213   :  { %v295_v44 = vpop.f32.mrb[2].mxu0  ;;  %605 = vmatmul.mubr.msk.f32.vlgmr.msra.gmra.mrb[0].mxu1 %vm35_vm0, %v334_v43 }
 0x214   :  { %v296_v45 = vadd.f32 %v515_v37, %v295_v44  ;;  %v574_v46 = vpop.f32.mrb[3].mxu0  ;;  %607 = vmatprep.mubr.msk.f32.mxu1 %vm665_vm1, %v666_v14 }
 0x216   :  { %v335_v47 = vmax.f32 %v296_v45, 0.0 }
 0x217   :  { %v300_v48 = vpop.f32.mrb[4].mxu0 }
 0x218   :  { %v301_v49 = vadd.f32 %v515_v37, %v300_v48  ;;  %v577_v52 = vpop.f32.mrb[5].mxu0  ;;  %608 = vmatmul.mubr.msk.f32.gmra.mrb[2].mxu1 %vm35_vm0, %v335_v47 }
 0x219   :  { %610 = vmatprep.mubr.msk.f32.mxu1 %vm665_vm1, %v666_v14 }
 0x21a   :  { %v336_v53 = vmax.f32 %v301_v49, 0.0 }
 0x21b   :  { %v305_v54 = vpop.f32.mrb[6].mxu0 }
 0x21c   :  { %v306_v55 = vadd.f32 %v515_v37, %v305_v54  ;;  %v580_v56 = vpop.f32.mrb[7].mxu0  ;;  %611 = vmatmul.mubr.msk.f32.gmra.mrb[4].mxu1 %vm35_vm0, %v336_v53 }
 0x21d   :  { %613 = vmatprep.mubr.msk.f32.mxu1 %vm665_vm1, %v666_v14 }
 0x21e   :  { %v337_v57 = vmax.f32 %v306_v55, 0.0 }
 0x21f   :  { %v310_v59 = vpop.f32.mrb[8].mxu0 }
 0x220   :  { %v311_v60 = vadd.f32 %v515_v37, %v310_v59  ;;  %v583_v61 = vpop.f32.mrb[9].mxu0  ;;  %614 = vmatmul.mubr.msk.f32.gmra.mrb[6].mxu1 %vm35_vm0, %v337_v57 }
 0x221   :  { %616 = vmatprep.mubr.msk.f32.mxu1 %vm665_vm1, %v666_v14 }
 0x222   :  { %v338_v22 = vmax.f32 %v311_v60, 0.0 }
 0x223   :  { %v315_v62 = vpop.f32.mrb[10].mxu0 }
 0x224   :  { %v316_v63 = vadd.f32 %v515_v37, %v315_v62  ;;  %v586_v3 = vpop.f32.mrb[11].mxu0  ;;  %617 = vmatmul.mubr.msk.f32.gmra.mrb[8].mxu1 %vm35_vm0, %v338_v22 }
 0x225   :  { %619 = vmatprep.mubr.msk.f32.mxu1 %vm665_vm1, %v666_v14 }
 0x226   :  { %v339_v4 = vmax.f32 %v316_v63, 0.0 }
 0x227   :  { %v320_v6 = vpop.f32.mrb[12].mxu0 }
 0x228   :  { %v321_v7 = vadd.f32 %v515_v37, %v320_v6  ;;  %v589_v10 = vpop.f32.mrb[13].mxu0  ;;  %620 = vmatmul.mubr.msk.f32.gmra.mrb[10].mxu1 %vm35_vm0, %v339_v4 }
 0x229   :  { %622 = vmatprep.mubr.msk.f32.mxu1 %vm665_vm1, %v666_v14 }
 0x22a   :  { %v340_v23 = vmax.f32 %v321_v7, 0.0 }
 0x22b   :  { %v325_v30 = vpop.f32.mrb[14].mxu0 }
 0x22c   :  { %v326_v11 = vadd.f32 %v515_v37, %v325_v30  ;;  %v592_v15 = vpop.f32.mrb[15].mxu0  ;;  %623 = vmatmul.mubr.msk.f32.gmra.mrb[12].mxu1 %vm35_vm0, %v340_v23 }
 0x22d   :  { %625 = vmatprep.mubr.msk.f32.mxu1 %vm665_vm1, %v666_v14 }
 0x22e   :  { %v341_v17 = vmax.f32 %v326_v11, 0.0 }
 0x22f   :  { %v330_v31 = vpop.f32.mrb[16].mxu0 }
 0x230   :  { %v331_v18 = vadd.f32 %v515_v37, %v330_v31  ;;  %v595_v19 = vpop.f32.mrb[17].mxu0  ;;  %626 = vmatmul.mubr.msk.f32.gmra.mrb[14].mxu1 %vm35_vm0, %v341_v17 }
 0x231   :  { %628 = vmatprep.mubr.msk.f32.mxu1 %vm665_vm1, %v666_v14 }
 0x232   :  { %v342_v20 = vmax.f32 %v331_v18, 0.0 }
 0x234   :  { %629 = vmatmul.mubr.msk.f32.gmra.mrb[16].mxu1 %vm35_vm0, %v342_v20 }
 0x2e6   :  { %v447_v40 = vpop.f32.mrb[0].mxu1 }
 0x2e7   :  { %v448_v24 = vadd.f32 %v525_v21, %v447_v40  ;;  %v606_v25 = vpop.f32.mrb[1].mxu1 }
 0x2e9   :  { %v491_v26 = vadd.f32 %v448_v24, %v710_v0 }
 0x2eb   :  { %500 = vst.msk [vmem:[%s986_s7] sm:$0xff] %vm35_vm0, %v491_v26  ;;  %v452_v41 = vpop.f32.mrb[2].mxu1 }
 0x2ec   :  { %v453_v27 = vadd.f32 %v525_v21, %v452_v41  ;;  %v609_v14 = vpop.f32.mrb[3].mxu1 }
 0x2ee   :  { %v492_v28 = vadd.f32 %v453_v27, %v720_v2 }
 0x2ef   :  { %v457_v29 = vpop.f32.mrb[4].mxu1 }
 0x2f0   :  { %501 = vst.msk [vmem:[%s986_s7 + $0x8] sm:$0xff] %vm35_vm0, %v492_v28  ;;  %v458_v50 = vadd.f32 %v525_v21, %v457_v29  ;;  %v612_v32 = vpop.f32.mrb[5].mxu1 }
 0x2f2   :  { %v493_v0 = vadd.f32 %v458_v50, %v715_v1 }
 0x2f3   :  { %v462_v33 = vpop.f32.mrb[6].mxu1 }
 0x2f4   :  { %502 = vst.msk [vmem:[%s986_s7 + $0x10] sm:$0xff] %vm35_vm0, %v493_v0  ;;  %v463_v34 = vadd.f32 %v525_v21, %v462_v33  ;;  %v615_v51 = vpop.f32.mrb[7].mxu1 }
 0x2f6   :  { %v494_v2 = vadd.f32 %v463_v34, %v729_v5 }
 0x2f7   :  { %v467_v58 = vpop.f32.mrb[8].mxu1 }
 0x2f8   :  { %503 = vst.msk [vmem:[%s986_s7 + $0x18] sm:$0xff] %vm35_vm0, %v494_v2  ;;  %v468_v35 = vadd.f32 %v525_v21, %v467_v58  ;;  %v618_v36 = vpop.f32.mrb[9].mxu1 }
 0x2fa   :  { %v495_v1 = vadd.f32 %v468_v35, %v738_v8 }
 0x2fb   :  { %v472_v37 = vpop.f32.mrb[10].mxu1 }
 0x2fc   :  { %504 = vst.msk [vmem:[%s986_s7 + $0x20] sm:$0xff] %vm35_vm0, %v495_v1  ;;  %v473_v38 = vadd.f32 %v525_v21, %v472_v37  ;;  %v621_v39 = vpop.f32.mrb[11].mxu1 }
 0x2fe   :  { %v496_v5 = vadd.f32 %v473_v38, %v743_v9 }
 0x2ff   :  { %v477_v42 = vpop.f32.mrb[12].mxu1 }
 0x300   :  { %505 = vst.msk [vmem:[%s986_s7 + $0x28] sm:$0xff] %vm35_vm0, %v496_v5  ;;  %v478_v43 = vadd.f32 %v525_v21, %v477_v42  ;;  %v624_v44 = vpop.f32.mrb[13].mxu1 }
 0x302   :  { %v497_v8 = vadd.f32 %v478_v43, %v752_v12 }
 0x303   :  { %v482_v45 = vpop.f32.mrb[14].mxu1 }
 0x304   :  { %506 = vst.msk [vmem:[%s986_s7 + $0x30] sm:$0xff] %vm35_vm0, %v497_v8  ;;  %v483_v46 = vadd.f32 %v525_v21, %v482_v45  ;;  %v627_v47 = vpop.f32.mrb[15].mxu1 }
 0x306   :  { %v498_v9 = vadd.f32 %v483_v46, %v757_v13 }
 0x307   :  { %v487_v48 = vpop.f32.mrb[16].mxu1 }
 0x308   :  { %507 = vst.msk [vmem:[%s986_s7 + $0x38] sm:$0xff] %vm35_vm0, %v498_v9  ;;  %v488_v49 = vadd.f32 %v525_v21, %v487_v48  ;;  %v630_v52 = vpop.f32.mrb[17].mxu1 }
 0x30a   :  { %v499_v12 = vadd.f32 %v488_v49, %v766_v16 }
 0x30c   :  { %508 = vst.msk [vmem:[%s986_s7 + $0x40] sm:$0xff] %vm35_vm0, %v499_v12 }

</bundles_post_ra>
